<compile_context>
chip_gen: v6e
topology: v6e:2x2x1
jax: 0.10.0
libtpu: 0.0.40
codegen_flags: <defaults>
</compile_context>

<pallas_src>
import functools

import jax
import jax.numpy as jnp
from jax.experimental import pallas as pl
from jax.experimental.pallas import tpu as pltpu

K_CHEB = 5  # ChebConv filter size K used by GConvLSTM(..., 5)

_VMEM = pl.BlockSpec(memory_space=pltpu.MemorySpace.VMEM)


# ----------------------------------------------------------------------------
# Fused Pallas kernel: full window x layer recurrence + decoder + log_softmax
# ----------------------------------------------------------------------------
def _fused_forward_kernel(*refs, n_layers, window, k_cheb, hidden_dim,
                          output_dim, out_width):
    """Inputs (refs, in order):
         l_ref     : [window, N, N] bf16   dense scaled Laplacians per step
         x_ref     : [N, Din0]      bf16   node embedding (layer-0 X, constant)
         wxp0_ref  : [K, Din0, 4*Dh] bf16  layer-0 gate-fused ChebConv-on-X W
         whp0_ref  : [K, Dh,   4*Dh] bf16  layer-0 gate-fused ChebConv-on-H W
         per layer l in 1..n_layers-1:
           wcat_ref: [K, 2*Dh, 4*Dh] bf16  fused [X|H] gate weights
         wd_ref    : [Dh, Dout]     bf16   decoder Linear weight
         consts_ref: [8*n_layers+8, 4*Dh] f32
                     row 8l   : folded bias (ChebConv bx+bh + gate b), gates i|f|c|o
                     rows 8l+1..8l+4 : peephole w_c rows (i,f,c,o), cols [:Dh]
                     row 8*n_layers  : decoder bias, cols [:Dout]
       Output:
         out_ref   : [N, out_width] f32   [log_softmax(logits) | H0 | C0 | ... | pad]
    """
    l_ref, x_ref, wxp0_ref, whp0_ref = refs[0], refs[1], refs[2], refs[3]
    wcat_refs = refs[4:3 + n_layers]
    wd_ref = refs[3 + n_layers]
    consts_ref = refs[4 + n_layers]
    out_ref = refs[5 + n_layers]

    dh = hidden_dim
    n = x_ref.shape[0]
    bf16, f32 = jnp.bfloat16, jnp.float32

    # Hoist loop-invariant tiny constants out of the unrolled recurrence.
    biases = [consts_ref[8 * l:8 * l + 1, :] for l in range(n_layers)]      # [1,4Dh]
    peeps = [consts_ref[8 * l + 1:8 * l + 5, :dh] for l in range(n_layers)]  # [4,Dh]
    bd = consts_ref[8 * n_layers:8 * n_layers + 1, :output_dim]              # [1,Dout]

    # Per-timestep Laplacian and 2*L, computed once (off the recurrent chain).
    Ls = [l_ref[t] for t in range(window)]
    L2s = [L + L for L in Ls]

    x0 = x_ref[...]  # bf16 [N, Din0]

    def cheb_chain(L, L2, z_bf16):
        # T_0 = Z, T_1 = L Z, T_k = 2L T_{k-1} - T_{k-2}; f32 accumulation.
        ts = [z_bf16]
        if k_cheb > 1:
            ts.append(jnp.dot(L, z_bf16, preferred_element_type=f32))
        for _ in range(2, k_cheb):
            ts.append(jnp.dot(L2, ts[-1].astype(bf16),
                              preferred_element_type=f32) - ts[-2])
        return ts

    def gate_accum(ts, w_ref, pre0=None):
        # Lane-dense [N, 4*Dh = 128] fused-gate pre-activation accumulation.
        # TODO(synk): on v7x, express this K-term reduce as a single
        # contraction so Mosaic accumulates in the MRB; the add-chain is the
        # right shape for the FIFO result path on v5e/v6e.
        pre = pre0
        for k in range(k_cheb):
            term = jnp.dot(ts[k].astype(bf16), w_ref[k],
                           preferred_element_type=f32)
            pre = term if pre is None else pre + term
        return pre

    def gates(pre, c_prev, wc):
        # All-f32 gate math (sigmoid/tanh/peephole).  Fuses the model-level
        # F.relu(h): the relu'd h is the stored state AND the next input,
        # matching the reference forward.
        i_g = jax.nn.sigmoid(pre[:, 0:dh] + wc[0:1, :] * c_prev)
        f_g = jax.nn.sigmoid(pre[:, dh:2 * dh] + wc[1:2, :] * c_prev)
        c_new = f_g * c_prev + i_g * jnp.tanh(pre[:, 2 * dh:3 * dh])
        o_g = jax.nn.sigmoid(pre[:, 3 * dh:4 * dh] + wc[3:4, :] * c_new)
        h_new = o_g * jnp.tanh(c_new)
        return jnp.maximum(h_new, 0.0), c_new

    # Hoisted: layer-0 X-path depends only on L[t] and constant x0 -> compute
    # all window contributions before the H recurrence (independent MXU work
    # the scheduler can interleave under the dependent chain).
    x_contribs = [gate_accum(cheb_chain(Ls[t], L2s[t], x0), wxp0_ref)
                  for t in range(window)]

    # h0 = None in the reference model => ones init (init__hidd uses torch.ones)
    H = [jnp.ones((n, dh), f32) for _ in range(n_layers)]
    C = [jnp.ones((n, dh), f32) for _ in range(n_layers)]

    # TODO(synk): if window / n_layers / hidden_dim grow, switch this static
    # unroll to lax.fori_loop with H/C staged in VMEM scratch (static `for`
    # does not bound live ranges -> spills).
    for t in range(window):
        L, L2 = Ls[t], L2s[t]
        # Layer 0: H-only Chebyshev chain + hoisted X contribution.
        th = cheb_chain(L, L2, H[0].astype(bf16))
        pre = gate_accum(th, whp0_ref, pre0=x_contribs[t]) + biases[0]
        h, c = gates(pre, C[0], peeps[0])
        H[0], C[0] = h, c
        cur = h
        # Layers >= 1: single fused chain on Z = [x_in | H] with packed
        # [Din+Dh, 4*Dh] weights -> one chain matmul + one gate matmul per k.
        for layer in range(1, n_layers):
            z = jnp.concatenate([cur, H[layer]], axis=-1).astype(bf16)
            tz = cheb_chain(L, L2, z)
            pre = gate_accum(tz, wcat_refs[layer - 1]) + biases[layer]
            h, c = gates(pre, C[layer], peeps[layer])
            H[layer], C[layer] = h, c
            cur = h

    # Decoder Linear + log_softmax(dim=1) fused into the same kernel.
    # TODO(synk): `Decoder` is not defined in the reference file; assumed to be
    # a single Linear(hidden_dim, output_dim) layer.
    logits = jnp.dot(H[n_layers - 1].astype(bf16), wd_ref[...],
                     preferred_element_type=f32) + bd
    m = jnp.max(logits, axis=1, keepdims=True)
    zc = logits - m
    logp = zc - jnp.log(jnp.sum(jnp.exp(zc), axis=1, keepdims=True))

    # Single lane-dense packed output slab (one unmasked 128-lane-wide store).
    pieces = [logp]
    for layer in range(n_layers):
        pieces.append(H[layer])
        pieces.append(C[layer])
    used = output_dim + 2 * n_layers * dh
    if out_width > used:
        pieces.append(jnp.zeros((n, out_width - used), f32))
    out_ref[...] = jnp.concatenate(pieces, axis=-1)


# ----------------------------------------------------------------------------
# Wrapper
# ----------------------------------------------------------------------------
def forward(L_hats, node_embedding, layer_params, decoder_params):
    """Mirrors GConvLSTMModel2.forward (h0=None => ones init). Single launch.

    layer_params[l] = (wxp [K,Din,4Dh], whp [K,Dh,4Dh], bias [1,4Dh], wcp [4,Dh])
    decoder_params  = (wd [Dh,Dout], bd [1,Dout])
    """
    window, n, _ = L_hats.shape
    n_layers = len(layer_params)
    hidden_dim = layer_params[0][3].shape[-1]
    wd, bd = decoder_params
    output_dim = wd.shape[-1]
    four_dh = 4 * hidden_dim
    used = output_dim + 2 * n_layers * hidden_dim
    out_width = 128 * pl.cdiv(used, 128)

    # bf16 for every matmul input (f32 accumulate in-kernel): ~3x fewer MXU
    # pushes per dot and half the L DMA bytes.
    l_b = L_hats.astype(jnp.bfloat16)
    x_b = node_embedding.astype(jnp.bfloat16)
    wxp0_b = layer_params[0][0].astype(jnp.bfloat16)
    whp0_b = layer_params[0][1].astype(jnp.bfloat16)
    wcat_b = []
    for l in range(1, n_layers):
        wxp, whp = layer_params[l][0], layer_params[l][1]
        wcat_b.append(jnp.concatenate([wxp, whp], axis=1).astype(jnp.bfloat16))
    wd_b = wd.astype(jnp.bfloat16)

    # Consolidate every tiny per-layer constant (folded bias, peephole rows)
    # plus the decoder bias into ONE f32 array: one DMA instead of 2*n_layers+1.
    consts = jnp.zeros((8 * n_layers + 8, four_dh), jnp.float32)
    for l, (_, _, bias, wcp) in enumerate(layer_params):
        consts = consts.at[8 * l, :].set(bias[0])
        consts = consts.at[8 * l + 1:8 * l + 5, :hidden_dim].set(wcp)
    consts = consts.at[8 * n_layers, :output_dim].set(bd[0])

    kernel = functools.partial(
        _fused_forward_kernel, n_layers=n_layers, window=window,
        k_cheb=K_CHEB, hidden_dim=hidden_dim, output_dim=output_dim,
        out_width=out_width)

    inputs = [l_b, x_b, wxp0_b, whp0_b] + wcat_b + [wd_b, consts]

    # TODO(synk): for large N, tile L_hats with a (1, TN, N) row-block
    # BlockSpec (t as an 'arbitrary' grid axis, bf16 L) sized for v7x's 64 MiB
    # VMEM and set vmem_limit_bytes; add a leading 'parallel' batch grid axis
    # if multiple independent graphs/sequences are processed so v7x's second
    # TensorCore is used.  At the toy N=16, whole-array VMEM residency with no
    # grid is optimal.
    packed = pl.pallas_call(
        kernel,
        out_shape=jax.ShapeDtypeStruct((n, out_width), jnp.float32),
        in_specs=[_VMEM] * len(inputs),
        out_specs=_VMEM,
    )(*inputs)

    out = packed[:, :output_dim]
    hidden = []
    off = output_dim
    for _ in range(n_layers):
        h = packed[:, off:off + hidden_dim]
        c = packed[:, off + hidden_dim:off + 2 * hidden_dim]
        off += 2 * hidden_dim
        hidden.append((h, c))
    return out, hidden


# ----------------------------------------------------------------------------
# JAX glue: graph densification + weight packing
# ----------------------------------------------------------------------------
def build_scaled_laplacian(edge_index, edge_weight, n_nodes):
    """Dense L_hat = 2/lambda_max * (I - D^-1/2 A D^-1/2) - I with lambda_max=2.

    L_hat[i, j] reads source node j, writes target node i => propagate is L @ X.
    (Degree from the source scatter: matches PyG sym-norm ChebConv for
    undirected graphs with symmetric weights.)
    """
    src, dst = edge_index[0], edge_index[1]
    A = jnp.zeros((n_nodes, n_nodes), jnp.float32).at[dst, src].add(edge_weight)
    deg = jnp.zeros((n_nodes,), jnp.float32).at[src].add(edge_weight)
    d_inv_sqrt = jnp.where(deg > 0, jax.lax.rsqrt(jnp.maximum(deg, 1e-12)), 0.0)
    return -(d_inv_sqrt[:, None] * A * d_inv_sqrt[None, :])


def pack_layer_params(wx, bx, wh, bh, wc, b):
    """Pack per-gate ChebConv weights into fused, lane-dense (4*Dh-wide) form.

    wx: [4, K, Din, Dh], wh: [4, K, Dh, Dh], bx/bh/b: [4, 1, Dh], wc: [4, 1, Dh]
    Returns (wxp [K, Din, 4*Dh], whp [K, Dh, 4*Dh], bias [1, 4*Dh], wcp [4, Dh]).
    Gate order along the packed lane axis is i | f | c | o.
    """
    n_gates = wx.shape[0]
    wxp = jnp.concatenate([wx[g] for g in range(n_gates)], axis=-1)
    whp = jnp.concatenate([wh[g] for g in range(n_gates)], axis=-1)
    bias = jnp.concatenate([bx[g] + bh[g] + b[g] for g in range(n_gates)],
                           axis=-1)
    wcp = wc[:, 0, :]
    return wxp, whp, bias, wcp


# ----------------------------------------------------------------------------
# Deterministic parameter / input construction
# ----------------------------------------------------------------------------
def init_params(key, input_dim, hidden_dim, output_dim, n_layers, n_nodes):
    keys = jax.random.split(key, n_layers + 2)
    node_emb = jax.random.uniform(keys[0], (n_nodes, input_dim), jnp.float32,
                                  -1.0, 1.0)
    layer_params = []
    for l in range(n_layers):
        din = input_dim if l == 0 else hidden_dim
        ks = jax.random.split(keys[1 + l], 3)
        sx = (2.0 / (din + hidden_dim)) ** 0.5
        sh = (2.0 / (2 * hidden_dim)) ** 0.5
        wx = sx * jax.random.normal(ks[0], (4, K_CHEB, din, hidden_dim), jnp.float32)
        wh = sh * jax.random.normal(ks[1], (4, K_CHEB, hidden_dim, hidden_dim),
                                    jnp.float32)
        bx = jnp.zeros((4, 1, hidden_dim), jnp.float32)
        bh = jnp.zeros((4, 1, hidden_dim), jnp.float32)
        wc = 0.1 * jax.random.normal(ks[2], (4, 1, hidden_dim), jnp.float32)
        wc = wc.at[2].set(0.0)  # cell-candidate gate has no peephole term
        b = jnp.zeros((4, 1, hidden_dim), jnp.float32)
        layer_params.append(pack_layer_params(wx, bx, wh, bh, wc, b))
    kd = keys[1 + n_layers]
    wd = (2.0 / (hidden_dim + output_dim)) ** 0.5 * jax.random.normal(
        kd, (hidden_dim, output_dim), jnp.float32)
    bd = jnp.zeros((1, output_dim), jnp.float32)
    return node_emb, layer_params, (wd, bd)


def make_graph_sequence(key, n_nodes, window):
    # Undirected ring graph (both directions), different random weights per step.
    src = jnp.arange(n_nodes, dtype=jnp.int32)
    dst = (src + 1) % n_nodes
    edge_index = jnp.stack([jnp.concatenate([src, dst]),
                            jnp.concatenate([dst, src])], axis=0)   # [2, 2N]
    edge_indices, edge_weights = [], []
    for t in range(window):
        kt = jax.random.fold_in(key, t)
        w_half = jax.random.uniform(kt, (n_nodes,), jnp.float32, 0.5, 1.5)
        w = jnp.concatenate([w_half, w_half])  # symmetric weights
        edge_indices.append(edge_index)
        edge_weights.append(w)
    return jnp.stack(edge_indices), jnp.stack(edge_weights)


if __name__ == "__main__":
    n_nodes, input_dim, hidden_dim, output_dim, n_layers, window = 16, 8, 32, 8, 2, 4

    key = jax.random.PRNGKey(0)
    k_param, k_graph = jax.random.split(key)

    node_emb, layer_params, decoder_params = init_params(
        k_param, input_dim, hidden_dim, output_dim, n_layers, n_nodes)
    edge_indices, edge_weights = make_graph_sequence(k_graph, n_nodes, window)

    # Glue: densify each timestep's sparse graph to a scaled Laplacian.
    L_hats = jnp.stack([
        build_scaled_laplacian(edge_indices[t], edge_weights[t], n_nodes)
        for t in range(window)
    ])  # [window, N, N]

    fwd = jax.jit(forward)
    out, hidden = fwd(L_hats, node_emb, layer_params, decoder_params)
    out = jax.block_until_ready(out)
    jax.block_until_ready(hidden)

    assert out.shape == (n_nodes, output_dim)
    assert len(hidden) == n_layers
    assert hidden[0][0].shape == (n_nodes, hidden_dim)
    assert hidden[0][1].shape == (n_nodes, hidden_dim)
    assert bool(jnp.all(jnp.isfinite(out)))
    # rows of log_softmax should (log-)sum to ~0
    assert bool(jnp.allclose(jnp.sum(jnp.exp(out), axis=1), 1.0, atol=1e-4))
    print("KERNEL_OK")
</pallas_src>

<mosaic_0001>
module attributes {stable_mosaic.version = 11 : i64} {
  func.func @_fused_forward_kernel(%arg0: memref<4x16x16xbf16, #tpu.memory_space<vmem>>, %arg1: memref<16x8xbf16, #tpu.memory_space<vmem>>, %arg2: memref<5x8x128xbf16, #tpu.memory_space<vmem>>, %arg3: memref<5x32x128xbf16, #tpu.memory_space<vmem>>, %arg4: memref<5x64x128xbf16, #tpu.memory_space<vmem>>, %arg5: memref<32x8xbf16, #tpu.memory_space<vmem>>, %arg6: memref<24x128xf32, #tpu.memory_space<vmem>>, %arg7: memref<16x256xf32, #tpu.memory_space<vmem>>) attributes {dimension_semantics = [], scalar_prefetch = 0 : i64, scratch_operands = 0 : i64, tpu.core_type = #tpu.core_type<tc>} {
    %c0 = arith.constant 0 : index
    %c0_0 = arith.constant 0 : index
    %0 = vector.load %arg6[%c0, %c0_0] : memref<24x128xf32, #tpu.memory_space<vmem>>, vector<1x128xf32>
    %c8 = arith.constant 8 : index
    %c0_1 = arith.constant 0 : index
    %1 = vector.load %arg6[%c8, %c0_1] : memref<24x128xf32, #tpu.memory_space<vmem>>, vector<1x128xf32>
    %c1 = arith.constant 1 : index
    %c0_2 = arith.constant 0 : index
    %2 = vector.load %arg6[%c1, %c0_2] : memref<24x128xf32, #tpu.memory_space<vmem>>, vector<4x32xf32>
    %c9 = arith.constant 9 : index
    %c0_3 = arith.constant 0 : index
    %3 = vector.load %arg6[%c9, %c0_3] : memref<24x128xf32, #tpu.memory_space<vmem>>, vector<4x32xf32>
    %c16 = arith.constant 16 : index
    %c0_4 = arith.constant 0 : index
    %4 = vector.load %arg6[%c16, %c0_4] : memref<24x128xf32, #tpu.memory_space<vmem>>, vector<1x8xf32>
    %c0_5 = arith.constant 0 : index
    %c0_6 = arith.constant 0 : index
    %c0_7 = arith.constant 0 : index
    %5 = vector.load %arg0[%c0_5, %c0_6, %c0_7] : memref<4x16x16xbf16, #tpu.memory_space<vmem>>, vector<1x16x16xbf16>
    %6 = vector.shape_cast %5 : vector<1x16x16xbf16> to vector<16x16xbf16>
    %c1_8 = arith.constant 1 : index
    %c0_9 = arith.constant 0 : index
    %c0_10 = arith.constant 0 : index
    %7 = vector.load %arg0[%c1_8, %c0_9, %c0_10] : memref<4x16x16xbf16, #tpu.memory_space<vmem>>, vector<1x16x16xbf16>
    %8 = vector.shape_cast %7 : vector<1x16x16xbf16> to vector<16x16xbf16>
    %c2 = arith.constant 2 : index
    %c0_11 = arith.constant 0 : index
    %c0_12 = arith.constant 0 : index
    %9 = vector.load %arg0[%c2, %c0_11, %c0_12] : memref<4x16x16xbf16, #tpu.memory_space<vmem>>, vector<1x16x16xbf16>
    %10 = vector.shape_cast %9 : vector<1x16x16xbf16> to vector<16x16xbf16>
    %c3 = arith.constant 3 : index
    %c0_13 = arith.constant 0 : index
    %c0_14 = arith.constant 0 : index
    %11 = vector.load %arg0[%c3, %c0_13, %c0_14] : memref<4x16x16xbf16, #tpu.memory_space<vmem>>, vector<1x16x16xbf16>
    %12 = vector.shape_cast %11 : vector<1x16x16xbf16> to vector<16x16xbf16>
    %13 = arith.addf %6, %6 : vector<16x16xbf16>
    %14 = arith.addf %8, %8 : vector<16x16xbf16>
    %15 = arith.addf %10, %10 : vector<16x16xbf16>
    %16 = arith.addf %12, %12 : vector<16x16xbf16>
    %c0_15 = arith.constant 0 : index
    %c0_16 = arith.constant 0 : index
    %17 = vector.load %arg1[%c0_15, %c0_16] : memref<16x8xbf16, #tpu.memory_space<vmem>>, vector<16x8xbf16>
    %cst = arith.constant dense<0.000000e+00> : vector<16x8xf32>
    %18 = tpu.matmul %6, %17, %cst {dimension_numbers = #tpu.dot_dimension_numbers<[1], [0], [0], [1], [0, 0, 1, 1], [], []>} : vector<16x16xbf16>, vector<16x8xbf16>, vector<16x8xf32> -> vector<16x8xf32>
    %19 = arith.truncf %18 : vector<16x8xf32> to vector<16x8xbf16>
    %cst_17 = arith.constant dense<0.000000e+00> : vector<16x8xf32>
    %20 = tpu.matmul %13, %19, %cst_17 {dimension_numbers = #tpu.dot_dimension_numbers<[1], [0], [0], [1], [0, 0, 1, 1], [], []>} : vector<16x16xbf16>, vector<16x8xbf16>, vector<16x8xf32> -> vector<16x8xf32>
    %21 = arith.extf %17 : vector<16x8xbf16> to vector<16x8xf32>
    %22 = arith.subf %20, %21 : vector<16x8xf32>
    %23 = arith.truncf %22 : vector<16x8xf32> to vector<16x8xbf16>
    %cst_18 = arith.constant dense<0.000000e+00> : vector<16x8xf32>
    %24 = tpu.matmul %13, %23, %cst_18 {dimension_numbers = #tpu.dot_dimension_numbers<[1], [0], [0], [1], [0, 0, 1, 1], [], []>} : vector<16x16xbf16>, vector<16x8xbf16>, vector<16x8xf32> -> vector<16x8xf32>
    %25 = arith.subf %24, %18 : vector<16x8xf32>
    %26 = arith.truncf %25 : vector<16x8xf32> to vector<16x8xbf16>
    %cst_19 = arith.constant dense<0.000000e+00> : vector<16x8xf32>
    %27 = tpu.matmul %13, %26, %cst_19 {dimension_numbers = #tpu.dot_dimension_numbers<[1], [0], [0], [1], [0, 0, 1, 1], [], []>} : vector<16x16xbf16>, vector<16x8xbf16>, vector<16x8xf32> -> vector<16x8xf32>
    %28 = arith.subf %27, %22 : vector<16x8xf32>
    %c0_20 = arith.constant 0 : index
    %c0_21 = arith.constant 0 : index
    %c0_22 = arith.constant 0 : index
    %29 = vector.load %arg2[%c0_20, %c0_21, %c0_22] : memref<5x8x128xbf16, #tpu.memory_space<vmem>>, vector<1x8x128xbf16>
    %30 = vector.shape_cast %29 : vector<1x8x128xbf16> to vector<8x128xbf16>
    %cst_23 = arith.constant dense<0.000000e+00> : vector<16x128xf32>
    %31 = tpu.matmul %17, %30, %cst_23 {dimension_numbers = #tpu.dot_dimension_numbers<[1], [0], [0], [1], [0, 0, 1, 1], [], []>} : vector<16x8xbf16>, vector<8x128xbf16>, vector<16x128xf32> -> vector<16x128xf32>
    %32 = arith.truncf %18 : vector<16x8xf32> to vector<16x8xbf16>
    %c1_24 = arith.constant 1 : index
    %c0_25 = arith.constant 0 : index
    %c0_26 = arith.constant 0 : index
    %33 = vector.load %arg2[%c1_24, %c0_25, %c0_26] : memref<5x8x128xbf16, #tpu.memory_space<vmem>>, vector<1x8x128xbf16>
    %34 = vector.shape_cast %33 : vector<1x8x128xbf16> to vector<8x128xbf16>
    %cst_27 = arith.constant dense<0.000000e+00> : vector<16x128xf32>
    %35 = tpu.matmul %32, %34, %cst_27 {dimension_numbers = #tpu.dot_dimension_numbers<[1], [0], [0], [1], [0, 0, 1, 1], [], []>} : vector<16x8xbf16>, vector<8x128xbf16>, vector<16x128xf32> -> vector<16x128xf32>
    %36 = arith.addf %31, %35 : vector<16x128xf32>
    %37 = arith.truncf %22 : vector<16x8xf32> to vector<16x8xbf16>
    %c2_28 = arith.constant 2 : index
    %c0_29 = arith.constant 0 : index
    %c0_30 = arith.constant 0 : index
    %38 = vector.load %arg2[%c2_28, %c0_29, %c0_30] : memref<5x8x128xbf16, #tpu.memory_space<vmem>>, vector<1x8x128xbf16>
    %39 = vector.shape_cast %38 : vector<1x8x128xbf16> to vector<8x128xbf16>
    %cst_31 = arith.constant dense<0.000000e+00> : vector<16x128xf32>
    %40 = tpu.matmul %37, %39, %cst_31 {dimension_numbers = #tpu.dot_dimension_numbers<[1], [0], [0], [1], [0, 0, 1, 1], [], []>} : vector<16x8xbf16>, vector<8x128xbf16>, vector<16x128xf32> -> vector<16x128xf32>
    %41 = arith.addf %36, %40 : vector<16x128xf32>
    %42 = arith.truncf %25 : vector<16x8xf32> to vector<16x8xbf16>
    %c3_32 = arith.constant 3 : index
    %c0_33 = arith.constant 0 : index
    %c0_34 = arith.constant 0 : index
    %43 = vector.load %arg2[%c3_32, %c0_33, %c0_34] : memref<5x8x128xbf16, #tpu.memory_space<vmem>>, vector<1x8x128xbf16>
    %44 = vector.shape_cast %43 : vector<1x8x128xbf16> to vector<8x128xbf16>
    %cst_35 = arith.constant dense<0.000000e+00> : vector<16x128xf32>
    %45 = tpu.matmul %42, %44, %cst_35 {dimension_numbers = #tpu.dot_dimension_numbers<[1], [0], [0], [1], [0, 0, 1, 1], [], []>} : vector<16x8xbf16>, vector<8x128xbf16>, vector<16x128xf32> -> vector<16x128xf32>
    %46 = arith.addf %41, %45 : vector<16x128xf32>
    %47 = arith.truncf %28 : vector<16x8xf32> to vector<16x8xbf16>
    %c4 = arith.constant 4 : index
    %c0_36 = arith.constant 0 : index
    %c0_37 = arith.constant 0 : index
    %48 = vector.load %arg2[%c4, %c0_36, %c0_37] : memref<5x8x128xbf16, #tpu.memory_space<vmem>>, vector<1x8x128xbf16>
    %49 = vector.shape_cast %48 : vector<1x8x128xbf16> to vector<8x128xbf16>
    %cst_38 = arith.constant dense<0.000000e+00> : vector<16x128xf32>
    %50 = tpu.matmul %47, %49, %cst_38 {dimension_numbers = #tpu.dot_dimension_numbers<[1], [0], [0], [1], [0, 0, 1, 1], [], []>} : vector<16x8xbf16>, vector<8x128xbf16>, vector<16x128xf32> -> vector<16x128xf32>
    %51 = arith.addf %46, %50 : vector<16x128xf32>
    %cst_39 = arith.constant dense<0.000000e+00> : vector<16x8xf32>
    %52 = tpu.matmul %8, %17, %cst_39 {dimension_numbers = #tpu.dot_dimension_numbers<[1], [0], [0], [1], [0, 0, 1, 1], [], []>} : vector<16x16xbf16>, vector<16x8xbf16>, vector<16x8xf32> -> vector<16x8xf32>
    %53 = arith.truncf %52 : vector<16x8xf32> to vector<16x8xbf16>
    %cst_40 = arith.constant dense<0.000000e+00> : vector<16x8xf32>
    %54 = tpu.matmul %14, %53, %cst_40 {dimension_numbers = #tpu.dot_dimension_numbers<[1], [0], [0], [1], [0, 0, 1, 1], [], []>} : vector<16x16xbf16>, vector<16x8xbf16>, vector<16x8xf32> -> vector<16x8xf32>
    %55 = arith.extf %17 : vector<16x8xbf16> to vector<16x8xf32>
    %56 = arith.subf %54, %55 : vector<16x8xf32>
    %57 = arith.truncf %56 : vector<16x8xf32> to vector<16x8xbf16>
    %cst_41 = arith.constant dense<0.000000e+00> : vector<16x8xf32>
    %58 = tpu.matmul %14, %57, %cst_41 {dimension_numbers = #tpu.dot_dimension_numbers<[1], [0], [0], [1], [0, 0, 1, 1], [], []>} : vector<16x16xbf16>, vector<16x8xbf16>, vector<16x8xf32> -> vector<16x8xf32>
    %59 = arith.subf %58, %52 : vector<16x8xf32>
    %60 = arith.truncf %59 : vector<16x8xf32> to vector<16x8xbf16>
    %cst_42 = arith.constant dense<0.000000e+00> : vector<16x8xf32>
    %61 = tpu.matmul %14, %60, %cst_42 {dimension_numbers = #tpu.dot_dimension_numbers<[1], [0], [0], [1], [0, 0, 1, 1], [], []>} : vector<16x16xbf16>, vector<16x8xbf16>, vector<16x8xf32> -> vector<16x8xf32>
    %62 = arith.subf %61, %56 : vector<16x8xf32>
    %c0_43 = arith.constant 0 : index
    %c0_44 = arith.constant 0 : index
    %c0_45 = arith.constant 0 : index
    %63 = vector.load %arg2[%c0_43, %c0_44, %c0_45] : memref<5x8x128xbf16, #tpu.memory_space<vmem>>, vector<1x8x128xbf16>
    %64 = vector.shape_cast %63 : vector<1x8x128xbf16> to vector<8x128xbf16>
    %cst_46 = arith.constant dense<0.000000e+00> : vector<16x128xf32>
    %65 = tpu.matmul %17, %64, %cst_46 {dimension_numbers = #tpu.dot_dimension_numbers<[1], [0], [0], [1], [0, 0, 1, 1], [], []>} : vector<16x8xbf16>, vector<8x128xbf16>, vector<16x128xf32> -> vector<16x128xf32>
    %66 = arith.truncf %52 : vector<16x8xf32> to vector<16x8xbf16>
    %c1_47 = arith.constant 1 : index
    %c0_48 = arith.constant 0 : index
    %c0_49 = arith.constant 0 : index
    %67 = vector.load %arg2[%c1_47, %c0_48, %c0_49] : memref<5x8x128xbf16, #tpu.memory_space<vmem>>, vector<1x8x128xbf16>
    %68 = vector.shape_cast %67 : vector<1x8x128xbf16> to vector<8x128xbf16>
    %cst_50 = arith.constant dense<0.000000e+00> : vector<16x128xf32>
    %69 = tpu.matmul %66, %68, %cst_50 {dimension_numbers = #tpu.dot_dimension_numbers<[1], [0], [0], [1], [0, 0, 1, 1], [], []>} : vector<16x8xbf16>, vector<8x128xbf16>, vector<16x128xf32> -> vector<16x128xf32>
    %70 = arith.addf %65, %69 : vector<16x128xf32>
    %71 = arith.truncf %56 : vector<16x8xf32> to vector<16x8xbf16>
    %c2_51 = arith.constant 2 : index
    %c0_52 = arith.constant 0 : index
    %c0_53 = arith.constant 0 : index
    %72 = vector.load %arg2[%c2_51, %c0_52, %c0_53] : memref<5x8x128xbf16, #tpu.memory_space<vmem>>, vector<1x8x128xbf16>
    %73 = vector.shape_cast %72 : vector<1x8x128xbf16> to vector<8x128xbf16>
    %cst_54 = arith.constant dense<0.000000e+00> : vector<16x128xf32>
    %74 = tpu.matmul %71, %73, %cst_54 {dimension_numbers = #tpu.dot_dimension_numbers<[1], [0], [0], [1], [0, 0, 1, 1], [], []>} : vector<16x8xbf16>, vector<8x128xbf16>, vector<16x128xf32> -> vector<16x128xf32>
    %75 = arith.addf %70, %74 : vector<16x128xf32>
    %76 = arith.truncf %59 : vector<16x8xf32> to vector<16x8xbf16>
    %c3_55 = arith.constant 3 : index
    %c0_56 = arith.constant 0 : index
    %c0_57 = arith.constant 0 : index
    %77 = vector.load %arg2[%c3_55, %c0_56, %c0_57] : memref<5x8x128xbf16, #tpu.memory_space<vmem>>, vector<1x8x128xbf16>
    %78 = vector.shape_cast %77 : vector<1x8x128xbf16> to vector<8x128xbf16>
    %cst_58 = arith.constant dense<0.000000e+00> : vector<16x128xf32>
    %79 = tpu.matmul %76, %78, %cst_58 {dimension_numbers = #tpu.dot_dimension_numbers<[1], [0], [0], [1], [0, 0, 1, 1], [], []>} : vector<16x8xbf16>, vector<8x128xbf16>, vector<16x128xf32> -> vector<16x128xf32>
    %80 = arith.addf %75, %79 : vector<16x128xf32>
    %81 = arith.truncf %62 : vector<16x8xf32> to vector<16x8xbf16>
    %c4_59 = arith.constant 4 : index
    %c0_60 = arith.constant 0 : index
    %c0_61 = arith.constant 0 : index
    %82 = vector.load %arg2[%c4_59, %c0_60, %c0_61] : memref<5x8x128xbf16, #tpu.memory_space<vmem>>, vector<1x8x128xbf16>
    %83 = vector.shape_cast %82 : vector<1x8x128xbf16> to vector<8x128xbf16>
    %cst_62 = arith.constant dense<0.000000e+00> : vector<16x128xf32>
    %84 = tpu.matmul %81, %83, %cst_62 {dimension_numbers = #tpu.dot_dimension_numbers<[1], [0], [0], [1], [0, 0, 1, 1], [], []>} : vector<16x8xbf16>, vector<8x128xbf16>, vector<16x128xf32> -> vector<16x128xf32>
    %85 = arith.addf %80, %84 : vector<16x128xf32>
    %cst_63 = arith.constant dense<0.000000e+00> : vector<16x8xf32>
    %86 = tpu.matmul %10, %17, %cst_63 {dimension_numbers = #tpu.dot_dimension_numbers<[1], [0], [0], [1], [0, 0, 1, 1], [], []>} : vector<16x16xbf16>, vector<16x8xbf16>, vector<16x8xf32> -> vector<16x8xf32>
    %87 = arith.truncf %86 : vector<16x8xf32> to vector<16x8xbf16>
    %cst_64 = arith.constant dense<0.000000e+00> : vector<16x8xf32>
    %88 = tpu.matmul %15, %87, %cst_64 {dimension_numbers = #tpu.dot_dimension_numbers<[1], [0], [0], [1], [0, 0, 1, 1], [], []>} : vector<16x16xbf16>, vector<16x8xbf16>, vector<16x8xf32> -> vector<16x8xf32>
    %89 = arith.extf %17 : vector<16x8xbf16> to vector<16x8xf32>
    %90 = arith.subf %88, %89 : vector<16x8xf32>
    %91 = arith.truncf %90 : vector<16x8xf32> to vector<16x8xbf16>
    %cst_65 = arith.constant dense<0.000000e+00> : vector<16x8xf32>
    %92 = tpu.matmul %15, %91, %cst_65 {dimension_numbers = #tpu.dot_dimension_numbers<[1], [0], [0], [1], [0, 0, 1, 1], [], []>} : vector<16x16xbf16>, vector<16x8xbf16>, vector<16x8xf32> -> vector<16x8xf32>
    %93 = arith.subf %92, %86 : vector<16x8xf32>
    %94 = arith.truncf %93 : vector<16x8xf32> to vector<16x8xbf16>
    %cst_66 = arith.constant dense<0.000000e+00> : vector<16x8xf32>
    %95 = tpu.matmul %15, %94, %cst_66 {dimension_numbers = #tpu.dot_dimension_numbers<[1], [0], [0], [1], [0, 0, 1, 1], [], []>} : vector<16x16xbf16>, vector<16x8xbf16>, vector<16x8xf32> -> vector<16x8xf32>
    %96 = arith.subf %95, %90 : vector<16x8xf32>
    %c0_67 = arith.constant 0 : index
    %c0_68 = arith.constant 0 : index
    %c0_69 = arith.constant 0 : index
    %97 = vector.load %arg2[%c0_67, %c0_68, %c0_69] : memref<5x8x128xbf16, #tpu.memory_space<vmem>>, vector<1x8x128xbf16>
    %98 = vector.shape_cast %97 : vector<1x8x128xbf16> to vector<8x128xbf16>
    %cst_70 = arith.constant dense<0.000000e+00> : vector<16x128xf32>
    %99 = tpu.matmul %17, %98, %cst_70 {dimension_numbers = #tpu.dot_dimension_numbers<[1], [0], [0], [1], [0, 0, 1, 1], [], []>} : vector<16x8xbf16>, vector<8x128xbf16>, vector<16x128xf32> -> vector<16x128xf32>
    %100 = arith.truncf %86 : vector<16x8xf32> to vector<16x8xbf16>
    %c1_71 = arith.constant 1 : index
    %c0_72 = arith.constant 0 : index
    %c0_73 = arith.constant 0 : index
    %101 = vector.load %arg2[%c1_71, %c0_72, %c0_73] : memref<5x8x128xbf16, #tpu.memory_space<vmem>>, vector<1x8x128xbf16>
    %102 = vector.shape_cast %101 : vector<1x8x128xbf16> to vector<8x128xbf16>
    %cst_74 = arith.constant dense<0.000000e+00> : vector<16x128xf32>
    %103 = tpu.matmul %100, %102, %cst_74 {dimension_numbers = #tpu.dot_dimension_numbers<[1], [0], [0], [1], [0, 0, 1, 1], [], []>} : vector<16x8xbf16>, vector<8x128xbf16>, vector<16x128xf32> -> vector<16x128xf32>
    %104 = arith.addf %99, %103 : vector<16x128xf32>
    %105 = arith.truncf %90 : vector<16x8xf32> to vector<16x8xbf16>
    %c2_75 = arith.constant 2 : index
    %c0_76 = arith.constant 0 : index
    %c0_77 = arith.constant 0 : index
    %106 = vector.load %arg2[%c2_75, %c0_76, %c0_77] : memref<5x8x128xbf16, #tpu.memory_space<vmem>>, vector<1x8x128xbf16>
    %107 = vector.shape_cast %106 : vector<1x8x128xbf16> to vector<8x128xbf16>
    %cst_78 = arith.constant dense<0.000000e+00> : vector<16x128xf32>
    %108 = tpu.matmul %105, %107, %cst_78 {dimension_numbers = #tpu.dot_dimension_numbers<[1], [0], [0], [1], [0, 0, 1, 1], [], []>} : vector<16x8xbf16>, vector<8x128xbf16>, vector<16x128xf32> -> vector<16x128xf32>
    %109 = arith.addf %104, %108 : vector<16x128xf32>
    %110 = arith.truncf %93 : vector<16x8xf32> to vector<16x8xbf16>
    %c3_79 = arith.constant 3 : index
    %c0_80 = arith.constant 0 : index
    %c0_81 = arith.constant 0 : index
    %111 = vector.load %arg2[%c3_79, %c0_80, %c0_81] : memref<5x8x128xbf16, #tpu.memory_space<vmem>>, vector<1x8x128xbf16>
    %112 = vector.shape_cast %111 : vector<1x8x128xbf16> to vector<8x128xbf16>
    %cst_82 = arith.constant dense<0.000000e+00> : vector<16x128xf32>
    %113 = tpu.matmul %110, %112, %cst_82 {dimension_numbers = #tpu.dot_dimension_numbers<[1], [0], [0], [1], [0, 0, 1, 1], [], []>} : vector<16x8xbf16>, vector<8x128xbf16>, vector<16x128xf32> -> vector<16x128xf32>
    %114 = arith.addf %109, %113 : vector<16x128xf32>
    %115 = arith.truncf %96 : vector<16x8xf32> to vector<16x8xbf16>
    %c4_83 = arith.constant 4 : index
    %c0_84 = arith.constant 0 : index
    %c0_85 = arith.constant 0 : index
    %116 = vector.load %arg2[%c4_83, %c0_84, %c0_85] : memref<5x8x128xbf16, #tpu.memory_space<vmem>>, vector<1x8x128xbf16>
    %117 = vector.shape_cast %116 : vector<1x8x128xbf16> to vector<8x128xbf16>
    %cst_86 = arith.constant dense<0.000000e+00> : vector<16x128xf32>
    %118 = tpu.matmul %115, %117, %cst_86 {dimension_numbers = #tpu.dot_dimension_numbers<[1], [0], [0], [1], [0, 0, 1, 1], [], []>} : vector<16x8xbf16>, vector<8x128xbf16>, vector<16x128xf32> -> vector<16x128xf32>
    %119 = arith.addf %114, %118 : vector<16x128xf32>
    %cst_87 = arith.constant dense<0.000000e+00> : vector<16x8xf32>
    %120 = tpu.matmul %12, %17, %cst_87 {dimension_numbers = #tpu.dot_dimension_numbers<[1], [0], [0], [1], [0, 0, 1, 1], [], []>} : vector<16x16xbf16>, vector<16x8xbf16>, vector<16x8xf32> -> vector<16x8xf32>
    %121 = arith.truncf %120 : vector<16x8xf32> to vector<16x8xbf16>
    %cst_88 = arith.constant dense<0.000000e+00> : vector<16x8xf32>
    %122 = tpu.matmul %16, %121, %cst_88 {dimension_numbers = #tpu.dot_dimension_numbers<[1], [0], [0], [1], [0, 0, 1, 1], [], []>} : vector<16x16xbf16>, vector<16x8xbf16>, vector<16x8xf32> -> vector<16x8xf32>
    %123 = arith.extf %17 : vector<16x8xbf16> to vector<16x8xf32>
    %124 = arith.subf %122, %123 : vector<16x8xf32>
    %125 = arith.truncf %124 : vector<16x8xf32> to vector<16x8xbf16>
    %cst_89 = arith.constant dense<0.000000e+00> : vector<16x8xf32>
    %126 = tpu.matmul %16, %125, %cst_89 {dimension_numbers = #tpu.dot_dimension_numbers<[1], [0], [0], [1], [0, 0, 1, 1], [], []>} : vector<16x16xbf16>, vector<16x8xbf16>, vector<16x8xf32> -> vector<16x8xf32>
    %127 = arith.subf %126, %120 : vector<16x8xf32>
    %128 = arith.truncf %127 : vector<16x8xf32> to vector<16x8xbf16>
    %cst_90 = arith.constant dense<0.000000e+00> : vector<16x8xf32>
    %129 = tpu.matmul %16, %128, %cst_90 {dimension_numbers = #tpu.dot_dimension_numbers<[1], [0], [0], [1], [0, 0, 1, 1], [], []>} : vector<16x16xbf16>, vector<16x8xbf16>, vector<16x8xf32> -> vector<16x8xf32>
    %130 = arith.subf %129, %124 : vector<16x8xf32>
    %c0_91 = arith.constant 0 : index
    %c0_92 = arith.constant 0 : index
    %c0_93 = arith.constant 0 : index
    %131 = vector.load %arg2[%c0_91, %c0_92, %c0_93] : memref<5x8x128xbf16, #tpu.memory_space<vmem>>, vector<1x8x128xbf16>
    %132 = vector.shape_cast %131 : vector<1x8x128xbf16> to vector<8x128xbf16>
    %cst_94 = arith.constant dense<0.000000e+00> : vector<16x128xf32>
    %133 = tpu.matmul %17, %132, %cst_94 {dimension_numbers = #tpu.dot_dimension_numbers<[1], [0], [0], [1], [0, 0, 1, 1], [], []>} : vector<16x8xbf16>, vector<8x128xbf16>, vector<16x128xf32> -> vector<16x128xf32>
    %134 = arith.truncf %120 : vector<16x8xf32> to vector<16x8xbf16>
    %c1_95 = arith.constant 1 : index
    %c0_96 = arith.constant 0 : index
    %c0_97 = arith.constant 0 : index
    %135 = vector.load %arg2[%c1_95, %c0_96, %c0_97] : memref<5x8x128xbf16, #tpu.memory_space<vmem>>, vector<1x8x128xbf16>
    %136 = vector.shape_cast %135 : vector<1x8x128xbf16> to vector<8x128xbf16>
    %cst_98 = arith.constant dense<0.000000e+00> : vector<16x128xf32>
    %137 = tpu.matmul %134, %136, %cst_98 {dimension_numbers = #tpu.dot_dimension_numbers<[1], [0], [0], [1], [0, 0, 1, 1], [], []>} : vector<16x8xbf16>, vector<8x128xbf16>, vector<16x128xf32> -> vector<16x128xf32>
    %138 = arith.addf %133, %137 : vector<16x128xf32>
    %139 = arith.truncf %124 : vector<16x8xf32> to vector<16x8xbf16>
    %c2_99 = arith.constant 2 : index
    %c0_100 = arith.constant 0 : index
    %c0_101 = arith.constant 0 : index
    %140 = vector.load %arg2[%c2_99, %c0_100, %c0_101] : memref<5x8x128xbf16, #tpu.memory_space<vmem>>, vector<1x8x128xbf16>
    %141 = vector.shape_cast %140 : vector<1x8x128xbf16> to vector<8x128xbf16>
    %cst_102 = arith.constant dense<0.000000e+00> : vector<16x128xf32>
    %142 = tpu.matmul %139, %141, %cst_102 {dimension_numbers = #tpu.dot_dimension_numbers<[1], [0], [0], [1], [0, 0, 1, 1], [], []>} : vector<16x8xbf16>, vector<8x128xbf16>, vector<16x128xf32> -> vector<16x128xf32>
    %143 = arith.addf %138, %142 : vector<16x128xf32>
    %144 = arith.truncf %127 : vector<16x8xf32> to vector<16x8xbf16>
    %c3_103 = arith.constant 3 : index
    %c0_104 = arith.constant 0 : index
    %c0_105 = arith.constant 0 : index
    %145 = vector.load %arg2[%c3_103, %c0_104, %c0_105] : memref<5x8x128xbf16, #tpu.memory_space<vmem>>, vector<1x8x128xbf16>
    %146 = vector.shape_cast %145 : vector<1x8x128xbf16> to vector<8x128xbf16>
    %cst_106 = arith.constant dense<0.000000e+00> : vector<16x128xf32>
    %147 = tpu.matmul %144, %146, %cst_106 {dimension_numbers = #tpu.dot_dimension_numbers<[1], [0], [0], [1], [0, 0, 1, 1], [], []>} : vector<16x8xbf16>, vector<8x128xbf16>, vector<16x128xf32> -> vector<16x128xf32>
    %148 = arith.addf %143, %147 : vector<16x128xf32>
    %149 = arith.truncf %130 : vector<16x8xf32> to vector<16x8xbf16>
    %c4_107 = arith.constant 4 : index
    %c0_108 = arith.constant 0 : index
    %c0_109 = arith.constant 0 : index
    %150 = vector.load %arg2[%c4_107, %c0_108, %c0_109] : memref<5x8x128xbf16, #tpu.memory_space<vmem>>, vector<1x8x128xbf16>
    %151 = vector.shape_cast %150 : vector<1x8x128xbf16> to vector<8x128xbf16>
    %cst_110 = arith.constant dense<0.000000e+00> : vector<16x128xf32>
    %152 = tpu.matmul %149, %151, %cst_110 {dimension_numbers = #tpu.dot_dimension_numbers<[1], [0], [0], [1], [0, 0, 1, 1], [], []>} : vector<16x8xbf16>, vector<8x128xbf16>, vector<16x128xf32> -> vector<16x128xf32>
    %153 = arith.addf %148, %152 : vector<16x128xf32>
    %cst_111 = arith.constant 1.000000e+00 : f32
    %154 = vector.broadcast %cst_111 : f32 to vector<16x32xf32>
    %cst_112 = arith.constant 1.000000e+00 : f32
    %155 = vector.broadcast %cst_112 : f32 to vector<16x32xf32>
    %cst_113 = arith.constant 1.000000e+00 : f32
    %156 = vector.broadcast %cst_113 : f32 to vector<16x32xf32>
    %cst_114 = arith.constant 1.000000e+00 : f32
    %157 = vector.broadcast %cst_114 : f32 to vector<16x32xf32>
    %158 = arith.truncf %154 : vector<16x32xf32> to vector<16x32xbf16>
    %cst_115 = arith.constant dense<0.000000e+00> : vector<16x32xf32>
    %159 = tpu.matmul %6, %158, %cst_115 {dimension_numbers = #tpu.dot_dimension_numbers<[1], [0], [0], [1], [0, 0, 1, 1], [], []>} : vector<16x16xbf16>, vector<16x32xbf16>, vector<16x32xf32> -> vector<16x32xf32>
    %160 = arith.truncf %159 : vector<16x32xf32> to vector<16x32xbf16>
    %cst_116 = arith.constant dense<0.000000e+00> : vector<16x32xf32>
    %161 = tpu.matmul %13, %160, %cst_116 {dimension_numbers = #tpu.dot_dimension_numbers<[1], [0], [0], [1], [0, 0, 1, 1], [], []>} : vector<16x16xbf16>, vector<16x32xbf16>, vector<16x32xf32> -> vector<16x32xf32>
    %162 = arith.extf %158 : vector<16x32xbf16> to vector<16x32xf32>
    %163 = arith.subf %161, %162 : vector<16x32xf32>
    %164 = arith.truncf %163 : vector<16x32xf32> to vector<16x32xbf16>
    %cst_117 = arith.constant dense<0.000000e+00> : vector<16x32xf32>
    %165 = tpu.matmul %13, %164, %cst_117 {dimension_numbers = #tpu.dot_dimension_numbers<[1], [0], [0], [1], [0, 0, 1, 1], [], []>} : vector<16x16xbf16>, vector<16x32xbf16>, vector<16x32xf32> -> vector<16x32xf32>
    %166 = arith.subf %165, %159 : vector<16x32xf32>
    %167 = arith.truncf %166 : vector<16x32xf32> to vector<16x32xbf16>
    %cst_118 = arith.constant dense<0.000000e+00> : vector<16x32xf32>
    %168 = tpu.matmul %13, %167, %cst_118 {dimension_numbers = #tpu.dot_dimension_numbers<[1], [0], [0], [1], [0, 0, 1, 1], [], []>} : vector<16x16xbf16>, vector<16x32xbf16>, vector<16x32xf32> -> vector<16x32xf32>
    %169 = arith.subf %168, %163 : vector<16x32xf32>
    %c0_119 = arith.constant 0 : index
    %c0_120 = arith.constant 0 : index
    %c0_121 = arith.constant 0 : index
    %170 = vector.load %arg3[%c0_119, %c0_120, %c0_121] : memref<5x32x128xbf16, #tpu.memory_space<vmem>>, vector<1x32x128xbf16>
    %171 = vector.shape_cast %170 : vector<1x32x128xbf16> to vector<32x128xbf16>
    %cst_122 = arith.constant dense<0.000000e+00> : vector<16x128xf32>
    %172 = tpu.matmul %158, %171, %cst_122 {dimension_numbers = #tpu.dot_dimension_numbers<[1], [0], [0], [1], [0, 0, 1, 1], [], []>} : vector<16x32xbf16>, vector<32x128xbf16>, vector<16x128xf32> -> vector<16x128xf32>
    %173 = arith.addf %51, %172 : vector<16x128xf32>
    %174 = arith.truncf %159 : vector<16x32xf32> to vector<16x32xbf16>
    %c1_123 = arith.constant 1 : index
    %c0_124 = arith.constant 0 : index
    %c0_125 = arith.constant 0 : index
    %175 = vector.load %arg3[%c1_123, %c0_124, %c0_125] : memref<5x32x128xbf16, #tpu.memory_space<vmem>>, vector<1x32x128xbf16>
    %176 = vector.shape_cast %175 : vector<1x32x128xbf16> to vector<32x128xbf16>
    %cst_126 = arith.constant dense<0.000000e+00> : vector<16x128xf32>
    %177 = tpu.matmul %174, %176, %cst_126 {dimension_numbers = #tpu.dot_dimension_numbers<[1], [0], [0], [1], [0, 0, 1, 1], [], []>} : vector<16x32xbf16>, vector<32x128xbf16>, vector<16x128xf32> -> vector<16x128xf32>
    %178 = arith.addf %173, %177 : vector<16x128xf32>
    %179 = arith.truncf %163 : vector<16x32xf32> to vector<16x32xbf16>
    %c2_127 = arith.constant 2 : index
    %c0_128 = arith.constant 0 : index
    %c0_129 = arith.constant 0 : index
    %180 = vector.load %arg3[%c2_127, %c0_128, %c0_129] : memref<5x32x128xbf16, #tpu.memory_space<vmem>>, vector<1x32x128xbf16>
    %181 = vector.shape_cast %180 : vector<1x32x128xbf16> to vector<32x128xbf16>
    %cst_130 = arith.constant dense<0.000000e+00> : vector<16x128xf32>
    %182 = tpu.matmul %179, %181, %cst_130 {dimension_numbers = #tpu.dot_dimension_numbers<[1], [0], [0], [1], [0, 0, 1, 1], [], []>} : vector<16x32xbf16>, vector<32x128xbf16>, vector<16x128xf32> -> vector<16x128xf32>
    %183 = arith.addf %178, %182 : vector<16x128xf32>
    %184 = arith.truncf %166 : vector<16x32xf32> to vector<16x32xbf16>
    %c3_131 = arith.constant 3 : index
    %c0_132 = arith.constant 0 : index
    %c0_133 = arith.constant 0 : index
    %185 = vector.load %arg3[%c3_131, %c0_132, %c0_133] : memref<5x32x128xbf16, #tpu.memory_space<vmem>>, vector<1x32x128xbf16>
    %186 = vector.shape_cast %185 : vector<1x32x128xbf16> to vector<32x128xbf16>
    %cst_134 = arith.constant dense<0.000000e+00> : vector<16x128xf32>
    %187 = tpu.matmul %184, %186, %cst_134 {dimension_numbers = #tpu.dot_dimension_numbers<[1], [0], [0], [1], [0, 0, 1, 1], [], []>} : vector<16x32xbf16>, vector<32x128xbf16>, vector<16x128xf32> -> vector<16x128xf32>
    %188 = arith.addf %183, %187 : vector<16x128xf32>
    %189 = arith.truncf %169 : vector<16x32xf32> to vector<16x32xbf16>
    %c4_135 = arith.constant 4 : index
    %c0_136 = arith.constant 0 : index
    %c0_137 = arith.constant 0 : index
    %190 = vector.load %arg3[%c4_135, %c0_136, %c0_137] : memref<5x32x128xbf16, #tpu.memory_space<vmem>>, vector<1x32x128xbf16>
    %191 = vector.shape_cast %190 : vector<1x32x128xbf16> to vector<32x128xbf16>
    %cst_138 = arith.constant dense<0.000000e+00> : vector<16x128xf32>
    %192 = tpu.matmul %189, %191, %cst_138 {dimension_numbers = #tpu.dot_dimension_numbers<[1], [0], [0], [1], [0, 0, 1, 1], [], []>} : vector<16x32xbf16>, vector<32x128xbf16>, vector<16x128xf32> -> vector<16x128xf32>
    %193 = arith.addf %188, %192 : vector<16x128xf32>
    %194 = vector.broadcast %0 : vector<1x128xf32> to vector<16x128xf32>
    %195 = arith.addf %193, %194 : vector<16x128xf32>
    %196 = vector.extract_strided_slice %195 {offsets = [0, 0], sizes = [16, 32], strides = [1, 1]} : vector<16x128xf32> to vector<16x32xf32>
    %197 = vector.extract_strided_slice %2 {offsets = [0, 0], sizes = [1, 32], strides = [1, 1]} : vector<4x32xf32> to vector<1x32xf32>
    %198 = vector.broadcast %197 : vector<1x32xf32> to vector<16x32xf32>
    %199 = arith.mulf %198, %156 : vector<16x32xf32>
    %200 = arith.addf %196, %199 : vector<16x32xf32>
    %201 = arith.negf %200 : vector<16x32xf32>
    %202 = math.exp %201 : vector<16x32xf32>
    %cst_139 = arith.constant 1.000000e+00 : f32
    %203 = vector.broadcast %cst_139 : f32 to vector<16x32xf32>
    %204 = arith.addf %203, %202 : vector<16x32xf32>
    %205 = arith.divf %203, %204 : vector<16x32xf32>
    %206 = vector.extract_strided_slice %195 {offsets = [0, 32], sizes = [16, 32], strides = [1, 1]} : vector<16x128xf32> to vector<16x32xf32>
    %207 = vector.extract_strided_slice %2 {offsets = [1, 0], sizes = [1, 32], strides = [1, 1]} : vector<4x32xf32> to vector<1x32xf32>
    %208 = vector.broadcast %207 : vector<1x32xf32> to vector<16x32xf32>
    %209 = arith.mulf %208, %156 : vector<16x32xf32>
    %210 = arith.addf %206, %209 : vector<16x32xf32>
    %211 = arith.negf %210 : vector<16x32xf32>
    %212 = math.exp %211 : vector<16x32xf32>
    %cst_140 = arith.constant 1.000000e+00 : f32
    %213 = vector.broadcast %cst_140 : f32 to vector<16x32xf32>
    %214 = arith.addf %213, %212 : vector<16x32xf32>
    %215 = arith.divf %213, %214 : vector<16x32xf32>
    %216 = arith.mulf %215, %156 : vector<16x32xf32>
    %217 = vector.extract_strided_slice %195 {offsets = [0, 64], sizes = [16, 32], strides = [1, 1]} : vector<16x128xf32> to vector<16x32xf32>
    %218 = math.tanh %217 : vector<16x32xf32>
    %219 = arith.mulf %205, %218 : vector<16x32xf32>
    %220 = arith.addf %216, %219 : vector<16x32xf32>
    %221 = vector.extract_strided_slice %195 {offsets = [0, 96], sizes = [16, 32], strides = [1, 1]} : vector<16x128xf32> to vector<16x32xf32>
    %222 = vector.extract_strided_slice %2 {offsets = [3, 0], sizes = [1, 32], strides = [1, 1]} : vector<4x32xf32> to vector<1x32xf32>
    %223 = vector.broadcast %222 : vector<1x32xf32> to vector<16x32xf32>
    %224 = arith.mulf %223, %220 : vector<16x32xf32>
    %225 = arith.addf %221, %224 : vector<16x32xf32>
    %226 = arith.negf %225 : vector<16x32xf32>
    %227 = math.exp %226 : vector<16x32xf32>
    %cst_141 = arith.constant 1.000000e+00 : f32
    %228 = vector.broadcast %cst_141 : f32 to vector<16x32xf32>
    %229 = arith.addf %228, %227 : vector<16x32xf32>
    %230 = arith.divf %228, %229 : vector<16x32xf32>
    %231 = math.tanh %220 : vector<16x32xf32>
    %232 = arith.mulf %230, %231 : vector<16x32xf32>
    %cst_142 = arith.constant 0.000000e+00 : f32
    %233 = vector.broadcast %cst_142 : f32 to vector<16x32xf32>
    %234 = arith.maximumf %232, %233 : vector<16x32xf32>
    %235 = tpu.concatenate %234, %155 in 1 : vector<16x32xf32>, vector<16x32xf32> -> vector<16x64xf32>
    %236 = arith.truncf %235 : vector<16x64xf32> to vector<16x64xbf16>
    %cst_143 = arith.constant dense<0.000000e+00> : vector<16x64xf32>
    %237 = tpu.matmul %6, %236, %cst_143 {dimension_numbers = #tpu.dot_dimension_numbers<[1], [0], [0], [1], [0, 0, 1, 1], [], []>} : vector<16x16xbf16>, vector<16x64xbf16>, vector<16x64xf32> -> vector<16x64xf32>
    %238 = arith.truncf %237 : vector<16x64xf32> to vector<16x64xbf16>
    %cst_144 = arith.constant dense<0.000000e+00> : vector<16x64xf32>
    %239 = tpu.matmul %13, %238, %cst_144 {dimension_numbers = #tpu.dot_dimension_numbers<[1], [0], [0], [1], [0, 0, 1, 1], [], []>} : vector<16x16xbf16>, vector<16x64xbf16>, vector<16x64xf32> -> vector<16x64xf32>
    %240 = arith.extf %236 : vector<16x64xbf16> to vector<16x64xf32>
    %241 = arith.subf %239, %240 : vector<16x64xf32>
    %242 = arith.truncf %241 : vector<16x64xf32> to vector<16x64xbf16>
    %cst_145 = arith.constant dense<0.000000e+00> : vector<16x64xf32>
    %243 = tpu.matmul %13, %242, %cst_145 {dimension_numbers = #tpu.dot_dimension_numbers<[1], [0], [0], [1], [0, 0, 1, 1], [], []>} : vector<16x16xbf16>, vector<16x64xbf16>, vector<16x64xf32> -> vector<16x64xf32>
    %244 = arith.subf %243, %237 : vector<16x64xf32>
    %245 = arith.truncf %244 : vector<16x64xf32> to vector<16x64xbf16>
    %cst_146 = arith.constant dense<0.000000e+00> : vector<16x64xf32>
    %246 = tpu.matmul %13, %245, %cst_146 {dimension_numbers = #tpu.dot_dimension_numbers<[1], [0], [0], [1], [0, 0, 1, 1], [], []>} : vector<16x16xbf16>, vector<16x64xbf16>, vector<16x64xf32> -> vector<16x64xf32>
    %247 = arith.subf %246, %241 : vector<16x64xf32>
    %c0_147 = arith.constant 0 : index
    %c0_148 = arith.constant 0 : index
    %c0_149 = arith.constant 0 : index
    %248 = vector.load %arg4[%c0_147, %c0_148, %c0_149] : memref<5x64x128xbf16, #tpu.memory_space<vmem>>, vector<1x64x128xbf16>
    %249 = vector.shape_cast %248 : vector<1x64x128xbf16> to vector<64x128xbf16>
    %cst_150 = arith.constant dense<0.000000e+00> : vector<16x128xf32>
    %250 = tpu.matmul %236, %249, %cst_150 {dimension_numbers = #tpu.dot_dimension_numbers<[1], [0], [0], [1], [0, 0, 1, 1], [], []>} : vector<16x64xbf16>, vector<64x128xbf16>, vector<16x128xf32> -> vector<16x128xf32>
    %251 = arith.truncf %237 : vector<16x64xf32> to vector<16x64xbf16>
    %c1_151 = arith.constant 1 : index
    %c0_152 = arith.constant 0 : index
    %c0_153 = arith.constant 0 : index
    %252 = vector.load %arg4[%c1_151, %c0_152, %c0_153] : memref<5x64x128xbf16, #tpu.memory_space<vmem>>, vector<1x64x128xbf16>
    %253 = vector.shape_cast %252 : vector<1x64x128xbf16> to vector<64x128xbf16>
    %cst_154 = arith.constant dense<0.000000e+00> : vector<16x128xf32>
    %254 = tpu.matmul %251, %253, %cst_154 {dimension_numbers = #tpu.dot_dimension_numbers<[1], [0], [0], [1], [0, 0, 1, 1], [], []>} : vector<16x64xbf16>, vector<64x128xbf16>, vector<16x128xf32> -> vector<16x128xf32>
    %255 = arith.addf %250, %254 : vector<16x128xf32>
    %256 = arith.truncf %241 : vector<16x64xf32> to vector<16x64xbf16>
    %c2_155 = arith.constant 2 : index
    %c0_156 = arith.constant 0 : index
    %c0_157 = arith.constant 0 : index
    %257 = vector.load %arg4[%c2_155, %c0_156, %c0_157] : memref<5x64x128xbf16, #tpu.memory_space<vmem>>, vector<1x64x128xbf16>
    %258 = vector.shape_cast %257 : vector<1x64x128xbf16> to vector<64x128xbf16>
    %cst_158 = arith.constant dense<0.000000e+00> : vector<16x128xf32>
    %259 = tpu.matmul %256, %258, %cst_158 {dimension_numbers = #tpu.dot_dimension_numbers<[1], [0], [0], [1], [0, 0, 1, 1], [], []>} : vector<16x64xbf16>, vector<64x128xbf16>, vector<16x128xf32> -> vector<16x128xf32>
    %260 = arith.addf %255, %259 : vector<16x128xf32>
    %261 = arith.truncf %244 : vector<16x64xf32> to vector<16x64xbf16>
    %c3_159 = arith.constant 3 : index
    %c0_160 = arith.constant 0 : index
    %c0_161 = arith.constant 0 : index
    %262 = vector.load %arg4[%c3_159, %c0_160, %c0_161] : memref<5x64x128xbf16, #tpu.memory_space<vmem>>, vector<1x64x128xbf16>
    %263 = vector.shape_cast %262 : vector<1x64x128xbf16> to vector<64x128xbf16>
    %cst_162 = arith.constant dense<0.000000e+00> : vector<16x128xf32>
    %264 = tpu.matmul %261, %263, %cst_162 {dimension_numbers = #tpu.dot_dimension_numbers<[1], [0], [0], [1], [0, 0, 1, 1], [], []>} : vector<16x64xbf16>, vector<64x128xbf16>, vector<16x128xf32> -> vector<16x128xf32>
    %265 = arith.addf %260, %264 : vector<16x128xf32>
    %266 = arith.truncf %247 : vector<16x64xf32> to vector<16x64xbf16>
    %c4_163 = arith.constant 4 : index
    %c0_164 = arith.constant 0 : index
    %c0_165 = arith.constant 0 : index
    %267 = vector.load %arg4[%c4_163, %c0_164, %c0_165] : memref<5x64x128xbf16, #tpu.memory_space<vmem>>, vector<1x64x128xbf16>
    %268 = vector.shape_cast %267 : vector<1x64x128xbf16> to vector<64x128xbf16>
    %cst_166 = arith.constant dense<0.000000e+00> : vector<16x128xf32>
    %269 = tpu.matmul %266, %268, %cst_166 {dimension_numbers = #tpu.dot_dimension_numbers<[1], [0], [0], [1], [0, 0, 1, 1], [], []>} : vector<16x64xbf16>, vector<64x128xbf16>, vector<16x128xf32> -> vector<16x128xf32>
    %270 = arith.addf %265, %269 : vector<16x128xf32>
    %271 = vector.broadcast %1 : vector<1x128xf32> to vector<16x128xf32>
    %272 = arith.addf %270, %271 : vector<16x128xf32>
    %273 = vector.extract_strided_slice %272 {offsets = [0, 0], sizes = [16, 32], strides = [1, 1]} : vector<16x128xf32> to vector<16x32xf32>
    %274 = vector.extract_strided_slice %3 {offsets = [0, 0], sizes = [1, 32], strides = [1, 1]} : vector<4x32xf32> to vector<1x32xf32>
    %275 = vector.broadcast %274 : vector<1x32xf32> to vector<16x32xf32>
    %276 = arith.mulf %275, %157 : vector<16x32xf32>
    %277 = arith.addf %273, %276 : vector<16x32xf32>
    %278 = arith.negf %277 : vector<16x32xf32>
    %279 = math.exp %278 : vector<16x32xf32>
    %cst_167 = arith.constant 1.000000e+00 : f32
    %280 = vector.broadcast %cst_167 : f32 to vector<16x32xf32>
    %281 = arith.addf %280, %279 : vector<16x32xf32>
    %282 = arith.divf %280, %281 : vector<16x32xf32>
    %283 = vector.extract_strided_slice %272 {offsets = [0, 32], sizes = [16, 32], strides = [1, 1]} : vector<16x128xf32> to vector<16x32xf32>
    %284 = vector.extract_strided_slice %3 {offsets = [1, 0], sizes = [1, 32], strides = [1, 1]} : vector<4x32xf32> to vector<1x32xf32>
    %285 = vector.broadcast %284 : vector<1x32xf32> to vector<16x32xf32>
    %286 = arith.mulf %285, %157 : vector<16x32xf32>
    %287 = arith.addf %283, %286 : vector<16x32xf32>
    %288 = arith.negf %287 : vector<16x32xf32>
    %289 = math.exp %288 : vector<16x32xf32>
    %cst_168 = arith.constant 1.000000e+00 : f32
    %290 = vector.broadcast %cst_168 : f32 to vector<16x32xf32>
    %291 = arith.addf %290, %289 : vector<16x32xf32>
    %292 = arith.divf %290, %291 : vector<16x32xf32>
    %293 = arith.mulf %292, %157 : vector<16x32xf32>
    %294 = vector.extract_strided_slice %272 {offsets = [0, 64], sizes = [16, 32], strides = [1, 1]} : vector<16x128xf32> to vector<16x32xf32>
    %295 = math.tanh %294 : vector<16x32xf32>
    %296 = arith.mulf %282, %295 : vector<16x32xf32>
    %297 = arith.addf %293, %296 : vector<16x32xf32>
    %298 = vector.extract_strided_slice %272 {offsets = [0, 96], sizes = [16, 32], strides = [1, 1]} : vector<16x128xf32> to vector<16x32xf32>
    %299 = vector.extract_strided_slice %3 {offsets = [3, 0], sizes = [1, 32], strides = [1, 1]} : vector<4x32xf32> to vector<1x32xf32>
    %300 = vector.broadcast %299 : vector<1x32xf32> to vector<16x32xf32>
    %301 = arith.mulf %300, %297 : vector<16x32xf32>
    %302 = arith.addf %298, %301 : vector<16x32xf32>
    %303 = arith.negf %302 : vector<16x32xf32>
    %304 = math.exp %303 : vector<16x32xf32>
    %cst_169 = arith.constant 1.000000e+00 : f32
    %305 = vector.broadcast %cst_169 : f32 to vector<16x32xf32>
    %306 = arith.addf %305, %304 : vector<16x32xf32>
    %307 = arith.divf %305, %306 : vector<16x32xf32>
    %308 = math.tanh %297 : vector<16x32xf32>
    %309 = arith.mulf %307, %308 : vector<16x32xf32>
    %cst_170 = arith.constant 0.000000e+00 : f32
    %310 = vector.broadcast %cst_170 : f32 to vector<16x32xf32>
    %311 = arith.maximumf %309, %310 : vector<16x32xf32>
    %312 = arith.truncf %234 : vector<16x32xf32> to vector<16x32xbf16>
    %cst_171 = arith.constant dense<0.000000e+00> : vector<16x32xf32>
    %313 = tpu.matmul %8, %312, %cst_171 {dimension_numbers = #tpu.dot_dimension_numbers<[1], [0], [0], [1], [0, 0, 1, 1], [], []>} : vector<16x16xbf16>, vector<16x32xbf16>, vector<16x32xf32> -> vector<16x32xf32>
    %314 = arith.truncf %313 : vector<16x32xf32> to vector<16x32xbf16>
    %cst_172 = arith.constant dense<0.000000e+00> : vector<16x32xf32>
    %315 = tpu.matmul %14, %314, %cst_172 {dimension_numbers = #tpu.dot_dimension_numbers<[1], [0], [0], [1], [0, 0, 1, 1], [], []>} : vector<16x16xbf16>, vector<16x32xbf16>, vector<16x32xf32> -> vector<16x32xf32>
    %316 = arith.extf %312 : vector<16x32xbf16> to vector<16x32xf32>
    %317 = arith.subf %315, %316 : vector<16x32xf32>
    %318 = arith.truncf %317 : vector<16x32xf32> to vector<16x32xbf16>
    %cst_173 = arith.constant dense<0.000000e+00> : vector<16x32xf32>
    %319 = tpu.matmul %14, %318, %cst_173 {dimension_numbers = #tpu.dot_dimension_numbers<[1], [0], [0], [1], [0, 0, 1, 1], [], []>} : vector<16x16xbf16>, vector<16x32xbf16>, vector<16x32xf32> -> vector<16x32xf32>
    %320 = arith.subf %319, %313 : vector<16x32xf32>
    %321 = arith.truncf %320 : vector<16x32xf32> to vector<16x32xbf16>
    %cst_174 = arith.constant dense<0.000000e+00> : vector<16x32xf32>
    %322 = tpu.matmul %14, %321, %cst_174 {dimension_numbers = #tpu.dot_dimension_numbers<[1], [0], [0], [1], [0, 0, 1, 1], [], []>} : vector<16x16xbf16>, vector<16x32xbf16>, vector<16x32xf32> -> vector<16x32xf32>
    %323 = arith.subf %322, %317 : vector<16x32xf32>
    %c0_175 = arith.constant 0 : index
    %c0_176 = arith.constant 0 : index
    %c0_177 = arith.constant 0 : index
    %324 = vector.load %arg3[%c0_175, %c0_176, %c0_177] : memref<5x32x128xbf16, #tpu.memory_space<vmem>>, vector<1x32x128xbf16>
    %325 = vector.shape_cast %324 : vector<1x32x128xbf16> to vector<32x128xbf16>
    %cst_178 = arith.constant dense<0.000000e+00> : vector<16x128xf32>
    %326 = tpu.matmul %312, %325, %cst_178 {dimension_numbers = #tpu.dot_dimension_numbers<[1], [0], [0], [1], [0, 0, 1, 1], [], []>} : vector<16x32xbf16>, vector<32x128xbf16>, vector<16x128xf32> -> vector<16x128xf32>
    %327 = arith.addf %85, %326 : vector<16x128xf32>
    %328 = arith.truncf %313 : vector<16x32xf32> to vector<16x32xbf16>
    %c1_179 = arith.constant 1 : index
    %c0_180 = arith.constant 0 : index
    %c0_181 = arith.constant 0 : index
    %329 = vector.load %arg3[%c1_179, %c0_180, %c0_181] : memref<5x32x128xbf16, #tpu.memory_space<vmem>>, vector<1x32x128xbf16>
    %330 = vector.shape_cast %329 : vector<1x32x128xbf16> to vector<32x128xbf16>
    %cst_182 = arith.constant dense<0.000000e+00> : vector<16x128xf32>
    %331 = tpu.matmul %328, %330, %cst_182 {dimension_numbers = #tpu.dot_dimension_numbers<[1], [0], [0], [1], [0, 0, 1, 1], [], []>} : vector<16x32xbf16>, vector<32x128xbf16>, vector<16x128xf32> -> vector<16x128xf32>
    %332 = arith.addf %327, %331 : vector<16x128xf32>
    %333 = arith.truncf %317 : vector<16x32xf32> to vector<16x32xbf16>
    %c2_183 = arith.constant 2 : index
    %c0_184 = arith.constant 0 : index
    %c0_185 = arith.constant 0 : index
    %334 = vector.load %arg3[%c2_183, %c0_184, %c0_185] : memref<5x32x128xbf16, #tpu.memory_space<vmem>>, vector<1x32x128xbf16>
    %335 = vector.shape_cast %334 : vector<1x32x128xbf16> to vector<32x128xbf16>
    %cst_186 = arith.constant dense<0.000000e+00> : vector<16x128xf32>
    %336 = tpu.matmul %333, %335, %cst_186 {dimension_numbers = #tpu.dot_dimension_numbers<[1], [0], [0], [1], [0, 0, 1, 1], [], []>} : vector<16x32xbf16>, vector<32x128xbf16>, vector<16x128xf32> -> vector<16x128xf32>
    %337 = arith.addf %332, %336 : vector<16x128xf32>
    %338 = arith.truncf %320 : vector<16x32xf32> to vector<16x32xbf16>
    %c3_187 = arith.constant 3 : index
    %c0_188 = arith.constant 0 : index
    %c0_189 = arith.constant 0 : index
    %339 = vector.load %arg3[%c3_187, %c0_188, %c0_189] : memref<5x32x128xbf16, #tpu.memory_space<vmem>>, vector<1x32x128xbf16>
    %340 = vector.shape_cast %339 : vector<1x32x128xbf16> to vector<32x128xbf16>
    %cst_190 = arith.constant dense<0.000000e+00> : vector<16x128xf32>
    %341 = tpu.matmul %338, %340, %cst_190 {dimension_numbers = #tpu.dot_dimension_numbers<[1], [0], [0], [1], [0, 0, 1, 1], [], []>} : vector<16x32xbf16>, vector<32x128xbf16>, vector<16x128xf32> -> vector<16x128xf32>
    %342 = arith.addf %337, %341 : vector<16x128xf32>
    %343 = arith.truncf %323 : vector<16x32xf32> to vector<16x32xbf16>
    %c4_191 = arith.constant 4 : index
    %c0_192 = arith.constant 0 : index
    %c0_193 = arith.constant 0 : index
    %344 = vector.load %arg3[%c4_191, %c0_192, %c0_193] : memref<5x32x128xbf16, #tpu.memory_space<vmem>>, vector<1x32x128xbf16>
    %345 = vector.shape_cast %344 : vector<1x32x128xbf16> to vector<32x128xbf16>
    %cst_194 = arith.constant dense<0.000000e+00> : vector<16x128xf32>
    %346 = tpu.matmul %343, %345, %cst_194 {dimension_numbers = #tpu.dot_dimension_numbers<[1], [0], [0], [1], [0, 0, 1, 1], [], []>} : vector<16x32xbf16>, vector<32x128xbf16>, vector<16x128xf32> -> vector<16x128xf32>
    %347 = arith.addf %342, %346 : vector<16x128xf32>
    %348 = vector.broadcast %0 : vector<1x128xf32> to vector<16x128xf32>
    %349 = arith.addf %347, %348 : vector<16x128xf32>
    %350 = vector.extract_strided_slice %349 {offsets = [0, 0], sizes = [16, 32], strides = [1, 1]} : vector<16x128xf32> to vector<16x32xf32>
    %351 = vector.extract_strided_slice %2 {offsets = [0, 0], sizes = [1, 32], strides = [1, 1]} : vector<4x32xf32> to vector<1x32xf32>
    %352 = vector.broadcast %351 : vector<1x32xf32> to vector<16x32xf32>
    %353 = arith.mulf %352, %220 : vector<16x32xf32>
    %354 = arith.addf %350, %353 : vector<16x32xf32>
    %355 = arith.negf %354 : vector<16x32xf32>
    %356 = math.exp %355 : vector<16x32xf32>
    %cst_195 = arith.constant 1.000000e+00 : f32
    %357 = vector.broadcast %cst_195 : f32 to vector<16x32xf32>
    %358 = arith.addf %357, %356 : vector<16x32xf32>
    %359 = arith.divf %357, %358 : vector<16x32xf32>
    %360 = vector.extract_strided_slice %349 {offsets = [0, 32], sizes = [16, 32], strides = [1, 1]} : vector<16x128xf32> to vector<16x32xf32>
    %361 = vector.extract_strided_slice %2 {offsets = [1, 0], sizes = [1, 32], strides = [1, 1]} : vector<4x32xf32> to vector<1x32xf32>
    %362 = vector.broadcast %361 : vector<1x32xf32> to vector<16x32xf32>
    %363 = arith.mulf %362, %220 : vector<16x32xf32>
    %364 = arith.addf %360, %363 : vector<16x32xf32>
    %365 = arith.negf %364 : vector<16x32xf32>
    %366 = math.exp %365 : vector<16x32xf32>
    %cst_196 = arith.constant 1.000000e+00 : f32
    %367 = vector.broadcast %cst_196 : f32 to vector<16x32xf32>
    %368 = arith.addf %367, %366 : vector<16x32xf32>
    %369 = arith.divf %367, %368 : vector<16x32xf32>
    %370 = arith.mulf %369, %220 : vector<16x32xf32>
    %371 = vector.extract_strided_slice %349 {offsets = [0, 64], sizes = [16, 32], strides = [1, 1]} : vector<16x128xf32> to vector<16x32xf32>
    %372 = math.tanh %371 : vector<16x32xf32>
    %373 = arith.mulf %359, %372 : vector<16x32xf32>
    %374 = arith.addf %370, %373 : vector<16x32xf32>
    %375 = vector.extract_strided_slice %349 {offsets = [0, 96], sizes = [16, 32], strides = [1, 1]} : vector<16x128xf32> to vector<16x32xf32>
    %376 = vector.extract_strided_slice %2 {offsets = [3, 0], sizes = [1, 32], strides = [1, 1]} : vector<4x32xf32> to vector<1x32xf32>
    %377 = vector.broadcast %376 : vector<1x32xf32> to vector<16x32xf32>
    %378 = arith.mulf %377, %374 : vector<16x32xf32>
    %379 = arith.addf %375, %378 : vector<16x32xf32>
    %380 = arith.negf %379 : vector<16x32xf32>
    %381 = math.exp %380 : vector<16x32xf32>
    %cst_197 = arith.constant 1.000000e+00 : f32
    %382 = vector.broadcast %cst_197 : f32 to vector<16x32xf32>
    %383 = arith.addf %382, %381 : vector<16x32xf32>
    %384 = arith.divf %382, %383 : vector<16x32xf32>
    %385 = math.tanh %374 : vector<16x32xf32>
    %386 = arith.mulf %384, %385 : vector<16x32xf32>
    %cst_198 = arith.constant 0.000000e+00 : f32
    %387 = vector.broadcast %cst_198 : f32 to vector<16x32xf32>
    %388 = arith.maximumf %386, %387 : vector<16x32xf32>
    %389 = tpu.concatenate %388, %311 in 1 : vector<16x32xf32>, vector<16x32xf32> -> vector<16x64xf32>
    %390 = arith.truncf %389 : vector<16x64xf32> to vector<16x64xbf16>
    %cst_199 = arith.constant dense<0.000000e+00> : vector<16x64xf32>
    %391 = tpu.matmul %8, %390, %cst_199 {dimension_numbers = #tpu.dot_dimension_numbers<[1], [0], [0], [1], [0, 0, 1, 1], [], []>} : vector<16x16xbf16>, vector<16x64xbf16>, vector<16x64xf32> -> vector<16x64xf32>
    %392 = arith.truncf %391 : vector<16x64xf32> to vector<16x64xbf16>
    %cst_200 = arith.constant dense<0.000000e+00> : vector<16x64xf32>
    %393 = tpu.matmul %14, %392, %cst_200 {dimension_numbers = #tpu.dot_dimension_numbers<[1], [0], [0], [1], [0, 0, 1, 1], [], []>} : vector<16x16xbf16>, vector<16x64xbf16>, vector<16x64xf32> -> vector<16x64xf32>
    %394 = arith.extf %390 : vector<16x64xbf16> to vector<16x64xf32>
    %395 = arith.subf %393, %394 : vector<16x64xf32>
    %396 = arith.truncf %395 : vector<16x64xf32> to vector<16x64xbf16>
    %cst_201 = arith.constant dense<0.000000e+00> : vector<16x64xf32>
    %397 = tpu.matmul %14, %396, %cst_201 {dimension_numbers = #tpu.dot_dimension_numbers<[1], [0], [0], [1], [0, 0, 1, 1], [], []>} : vector<16x16xbf16>, vector<16x64xbf16>, vector<16x64xf32> -> vector<16x64xf32>
    %398 = arith.subf %397, %391 : vector<16x64xf32>
    %399 = arith.truncf %398 : vector<16x64xf32> to vector<16x64xbf16>
    %cst_202 = arith.constant dense<0.000000e+00> : vector<16x64xf32>
    %400 = tpu.matmul %14, %399, %cst_202 {dimension_numbers = #tpu.dot_dimension_numbers<[1], [0], [0], [1], [0, 0, 1, 1], [], []>} : vector<16x16xbf16>, vector<16x64xbf16>, vector<16x64xf32> -> vector<16x64xf32>
    %401 = arith.subf %400, %395 : vector<16x64xf32>
    %c0_203 = arith.constant 0 : index
    %c0_204 = arith.constant 0 : index
    %c0_205 = arith.constant 0 : index
    %402 = vector.load %arg4[%c0_203, %c0_204, %c0_205] : memref<5x64x128xbf16, #tpu.memory_space<vmem>>, vector<1x64x128xbf16>
    %403 = vector.shape_cast %402 : vector<1x64x128xbf16> to vector<64x128xbf16>
    %cst_206 = arith.constant dense<0.000000e+00> : vector<16x128xf32>
    %404 = tpu.matmul %390, %403, %cst_206 {dimension_numbers = #tpu.dot_dimension_numbers<[1], [0], [0], [1], [0, 0, 1, 1], [], []>} : vector<16x64xbf16>, vector<64x128xbf16>, vector<16x128xf32> -> vector<16x128xf32>
    %405 = arith.truncf %391 : vector<16x64xf32> to vector<16x64xbf16>
    %c1_207 = arith.constant 1 : index
    %c0_208 = arith.constant 0 : index
    %c0_209 = arith.constant 0 : index
    %406 = vector.load %arg4[%c1_207, %c0_208, %c0_209] : memref<5x64x128xbf16, #tpu.memory_space<vmem>>, vector<1x64x128xbf16>
    %407 = vector.shape_cast %406 : vector<1x64x128xbf16> to vector<64x128xbf16>
    %cst_210 = arith.constant dense<0.000000e+00> : vector<16x128xf32>
    %408 = tpu.matmul %405, %407, %cst_210 {dimension_numbers = #tpu.dot_dimension_numbers<[1], [0], [0], [1], [0, 0, 1, 1], [], []>} : vector<16x64xbf16>, vector<64x128xbf16>, vector<16x128xf32> -> vector<16x128xf32>
    %409 = arith.addf %404, %408 : vector<16x128xf32>
    %410 = arith.truncf %395 : vector<16x64xf32> to vector<16x64xbf16>
    %c2_211 = arith.constant 2 : index
    %c0_212 = arith.constant 0 : index
    %c0_213 = arith.constant 0 : index
    %411 = vector.load %arg4[%c2_211, %c0_212, %c0_213] : memref<5x64x128xbf16, #tpu.memory_space<vmem>>, vector<1x64x128xbf16>
    %412 = vector.shape_cast %411 : vector<1x64x128xbf16> to vector<64x128xbf16>
    %cst_214 = arith.constant dense<0.000000e+00> : vector<16x128xf32>
    %413 = tpu.matmul %410, %412, %cst_214 {dimension_numbers = #tpu.dot_dimension_numbers<[1], [0], [0], [1], [0, 0, 1, 1], [], []>} : vector<16x64xbf16>, vector<64x128xbf16>, vector<16x128xf32> -> vector<16x128xf32>
    %414 = arith.addf %409, %413 : vector<16x128xf32>
    %415 = arith.truncf %398 : vector<16x64xf32> to vector<16x64xbf16>
    %c3_215 = arith.constant 3 : index
    %c0_216 = arith.constant 0 : index
    %c0_217 = arith.constant 0 : index
    %416 = vector.load %arg4[%c3_215, %c0_216, %c0_217] : memref<5x64x128xbf16, #tpu.memory_space<vmem>>, vector<1x64x128xbf16>
    %417 = vector.shape_cast %416 : vector<1x64x128xbf16> to vector<64x128xbf16>
    %cst_218 = arith.constant dense<0.000000e+00> : vector<16x128xf32>
    %418 = tpu.matmul %415, %417, %cst_218 {dimension_numbers = #tpu.dot_dimension_numbers<[1], [0], [0], [1], [0, 0, 1, 1], [], []>} : vector<16x64xbf16>, vector<64x128xbf16>, vector<16x128xf32> -> vector<16x128xf32>
    %419 = arith.addf %414, %418 : vector<16x128xf32>
    %420 = arith.truncf %401 : vector<16x64xf32> to vector<16x64xbf16>
    %c4_219 = arith.constant 4 : index
    %c0_220 = arith.constant 0 : index
    %c0_221 = arith.constant 0 : index
    %421 = vector.load %arg4[%c4_219, %c0_220, %c0_221] : memref<5x64x128xbf16, #tpu.memory_space<vmem>>, vector<1x64x128xbf16>
    %422 = vector.shape_cast %421 : vector<1x64x128xbf16> to vector<64x128xbf16>
    %cst_222 = arith.constant dense<0.000000e+00> : vector<16x128xf32>
    %423 = tpu.matmul %420, %422, %cst_222 {dimension_numbers = #tpu.dot_dimension_numbers<[1], [0], [0], [1], [0, 0, 1, 1], [], []>} : vector<16x64xbf16>, vector<64x128xbf16>, vector<16x128xf32> -> vector<16x128xf32>
    %424 = arith.addf %419, %423 : vector<16x128xf32>
    %425 = vector.broadcast %1 : vector<1x128xf32> to vector<16x128xf32>
    %426 = arith.addf %424, %425 : vector<16x128xf32>
    %427 = vector.extract_strided_slice %426 {offsets = [0, 0], sizes = [16, 32], strides = [1, 1]} : vector<16x128xf32> to vector<16x32xf32>
    %428 = vector.extract_strided_slice %3 {offsets = [0, 0], sizes = [1, 32], strides = [1, 1]} : vector<4x32xf32> to vector<1x32xf32>
    %429 = vector.broadcast %428 : vector<1x32xf32> to vector<16x32xf32>
    %430 = arith.mulf %429, %297 : vector<16x32xf32>
    %431 = arith.addf %427, %430 : vector<16x32xf32>
    %432 = arith.negf %431 : vector<16x32xf32>
    %433 = math.exp %432 : vector<16x32xf32>
    %cst_223 = arith.constant 1.000000e+00 : f32
    %434 = vector.broadcast %cst_223 : f32 to vector<16x32xf32>
    %435 = arith.addf %434, %433 : vector<16x32xf32>
    %436 = arith.divf %434, %435 : vector<16x32xf32>
    %437 = vector.extract_strided_slice %426 {offsets = [0, 32], sizes = [16, 32], strides = [1, 1]} : vector<16x128xf32> to vector<16x32xf32>
    %438 = vector.extract_strided_slice %3 {offsets = [1, 0], sizes = [1, 32], strides = [1, 1]} : vector<4x32xf32> to vector<1x32xf32>
    %439 = vector.broadcast %438 : vector<1x32xf32> to vector<16x32xf32>
    %440 = arith.mulf %439, %297 : vector<16x32xf32>
    %441 = arith.addf %437, %440 : vector<16x32xf32>
    %442 = arith.negf %441 : vector<16x32xf32>
    %443 = math.exp %442 : vector<16x32xf32>
    %cst_224 = arith.constant 1.000000e+00 : f32
    %444 = vector.broadcast %cst_224 : f32 to vector<16x32xf32>
    %445 = arith.addf %444, %443 : vector<16x32xf32>
    %446 = arith.divf %444, %445 : vector<16x32xf32>
    %447 = arith.mulf %446, %297 : vector<16x32xf32>
    %448 = vector.extract_strided_slice %426 {offsets = [0, 64], sizes = [16, 32], strides = [1, 1]} : vector<16x128xf32> to vector<16x32xf32>
    %449 = math.tanh %448 : vector<16x32xf32>
    %450 = arith.mulf %436, %449 : vector<16x32xf32>
    %451 = arith.addf %447, %450 : vector<16x32xf32>
    %452 = vector.extract_strided_slice %426 {offsets = [0, 96], sizes = [16, 32], strides = [1, 1]} : vector<16x128xf32> to vector<16x32xf32>
    %453 = vector.extract_strided_slice %3 {offsets = [3, 0], sizes = [1, 32], strides = [1, 1]} : vector<4x32xf32> to vector<1x32xf32>
    %454 = vector.broadcast %453 : vector<1x32xf32> to vector<16x32xf32>
    %455 = arith.mulf %454, %451 : vector<16x32xf32>
    %456 = arith.addf %452, %455 : vector<16x32xf32>
    %457 = arith.negf %456 : vector<16x32xf32>
    %458 = math.exp %457 : vector<16x32xf32>
    %cst_225 = arith.constant 1.000000e+00 : f32
    %459 = vector.broadcast %cst_225 : f32 to vector<16x32xf32>
    %460 = arith.addf %459, %458 : vector<16x32xf32>
    %461 = arith.divf %459, %460 : vector<16x32xf32>
    %462 = math.tanh %451 : vector<16x32xf32>
    %463 = arith.mulf %461, %462 : vector<16x32xf32>
    %cst_226 = arith.constant 0.000000e+00 : f32
    %464 = vector.broadcast %cst_226 : f32 to vector<16x32xf32>
    %465 = arith.maximumf %463, %464 : vector<16x32xf32>
    %466 = arith.truncf %388 : vector<16x32xf32> to vector<16x32xbf16>
    %cst_227 = arith.constant dense<0.000000e+00> : vector<16x32xf32>
    %467 = tpu.matmul %10, %466, %cst_227 {dimension_numbers = #tpu.dot_dimension_numbers<[1], [0], [0], [1], [0, 0, 1, 1], [], []>} : vector<16x16xbf16>, vector<16x32xbf16>, vector<16x32xf32> -> vector<16x32xf32>
    %468 = arith.truncf %467 : vector<16x32xf32> to vector<16x32xbf16>
    %cst_228 = arith.constant dense<0.000000e+00> : vector<16x32xf32>
    %469 = tpu.matmul %15, %468, %cst_228 {dimension_numbers = #tpu.dot_dimension_numbers<[1], [0], [0], [1], [0, 0, 1, 1], [], []>} : vector<16x16xbf16>, vector<16x32xbf16>, vector<16x32xf32> -> vector<16x32xf32>
    %470 = arith.extf %466 : vector<16x32xbf16> to vector<16x32xf32>
    %471 = arith.subf %469, %470 : vector<16x32xf32>
    %472 = arith.truncf %471 : vector<16x32xf32> to vector<16x32xbf16>
    %cst_229 = arith.constant dense<0.000000e+00> : vector<16x32xf32>
    %473 = tpu.matmul %15, %472, %cst_229 {dimension_numbers = #tpu.dot_dimension_numbers<[1], [0], [0], [1], [0, 0, 1, 1], [], []>} : vector<16x16xbf16>, vector<16x32xbf16>, vector<16x32xf32> -> vector<16x32xf32>
    %474 = arith.subf %473, %467 : vector<16x32xf32>
    %475 = arith.truncf %474 : vector<16x32xf32> to vector<16x32xbf16>
    %cst_230 = arith.constant dense<0.000000e+00> : vector<16x32xf32>
    %476 = tpu.matmul %15, %475, %cst_230 {dimension_numbers = #tpu.dot_dimension_numbers<[1], [0], [0], [1], [0, 0, 1, 1], [], []>} : vector<16x16xbf16>, vector<16x32xbf16>, vector<16x32xf32> -> vector<16x32xf32>
    %477 = arith.subf %476, %471 : vector<16x32xf32>
    %c0_231 = arith.constant 0 : index
    %c0_232 = arith.constant 0 : index
    %c0_233 = arith.constant 0 : index
    %478 = vector.load %arg3[%c0_231, %c0_232, %c0_233] : memref<5x32x128xbf16, #tpu.memory_space<vmem>>, vector<1x32x128xbf16>
    %479 = vector.shape_cast %478 : vector<1x32x128xbf16> to vector<32x128xbf16>
    %cst_234 = arith.constant dense<0.000000e+00> : vector<16x128xf32>
    %480 = tpu.matmul %466, %479, %cst_234 {dimension_numbers = #tpu.dot_dimension_numbers<[1], [0], [0], [1], [0, 0, 1, 1], [], []>} : vector<16x32xbf16>, vector<32x128xbf16>, vector<16x128xf32> -> vector<16x128xf32>
    %481 = arith.addf %119, %480 : vector<16x128xf32>
    %482 = arith.truncf %467 : vector<16x32xf32> to vector<16x32xbf16>
    %c1_235 = arith.constant 1 : index
    %c0_236 = arith.constant 0 : index
    %c0_237 = arith.constant 0 : index
    %483 = vector.load %arg3[%c1_235, %c0_236, %c0_237] : memref<5x32x128xbf16, #tpu.memory_space<vmem>>, vector<1x32x128xbf16>
    %484 = vector.shape_cast %483 : vector<1x32x128xbf16> to vector<32x128xbf16>
    %cst_238 = arith.constant dense<0.000000e+00> : vector<16x128xf32>
    %485 = tpu.matmul %482, %484, %cst_238 {dimension_numbers = #tpu.dot_dimension_numbers<[1], [0], [0], [1], [0, 0, 1, 1], [], []>} : vector<16x32xbf16>, vector<32x128xbf16>, vector<16x128xf32> -> vector<16x128xf32>
    %486 = arith.addf %481, %485 : vector<16x128xf32>
    %487 = arith.truncf %471 : vector<16x32xf32> to vector<16x32xbf16>
    %c2_239 = arith.constant 2 : index
    %c0_240 = arith.constant 0 : index
    %c0_241 = arith.constant 0 : index
    %488 = vector.load %arg3[%c2_239, %c0_240, %c0_241] : memref<5x32x128xbf16, #tpu.memory_space<vmem>>, vector<1x32x128xbf16>
    %489 = vector.shape_cast %488 : vector<1x32x128xbf16> to vector<32x128xbf16>
    %cst_242 = arith.constant dense<0.000000e+00> : vector<16x128xf32>
    %490 = tpu.matmul %487, %489, %cst_242 {dimension_numbers = #tpu.dot_dimension_numbers<[1], [0], [0], [1], [0, 0, 1, 1], [], []>} : vector<16x32xbf16>, vector<32x128xbf16>, vector<16x128xf32> -> vector<16x128xf32>
    %491 = arith.addf %486, %490 : vector<16x128xf32>
    %492 = arith.truncf %474 : vector<16x32xf32> to vector<16x32xbf16>
    %c3_243 = arith.constant 3 : index
    %c0_244 = arith.constant 0 : index
    %c0_245 = arith.constant 0 : index
    %493 = vector.load %arg3[%c3_243, %c0_244, %c0_245] : memref<5x32x128xbf16, #tpu.memory_space<vmem>>, vector<1x32x128xbf16>
    %494 = vector.shape_cast %493 : vector<1x32x128xbf16> to vector<32x128xbf16>
    %cst_246 = arith.constant dense<0.000000e+00> : vector<16x128xf32>
    %495 = tpu.matmul %492, %494, %cst_246 {dimension_numbers = #tpu.dot_dimension_numbers<[1], [0], [0], [1], [0, 0, 1, 1], [], []>} : vector<16x32xbf16>, vector<32x128xbf16>, vector<16x128xf32> -> vector<16x128xf32>
    %496 = arith.addf %491, %495 : vector<16x128xf32>
    %497 = arith.truncf %477 : vector<16x32xf32> to vector<16x32xbf16>
    %c4_247 = arith.constant 4 : index
    %c0_248 = arith.constant 0 : index
    %c0_249 = arith.constant 0 : index
    %498 = vector.load %arg3[%c4_247, %c0_248, %c0_249] : memref<5x32x128xbf16, #tpu.memory_space<vmem>>, vector<1x32x128xbf16>
    %499 = vector.shape_cast %498 : vector<1x32x128xbf16> to vector<32x128xbf16>
    %cst_250 = arith.constant dense<0.000000e+00> : vector<16x128xf32>
    %500 = tpu.matmul %497, %499, %cst_250 {dimension_numbers = #tpu.dot_dimension_numbers<[1], [0], [0], [1], [0, 0, 1, 1], [], []>} : vector<16x32xbf16>, vector<32x128xbf16>, vector<16x128xf32> -> vector<16x128xf32>
    %501 = arith.addf %496, %500 : vector<16x128xf32>
    %502 = vector.broadcast %0 : vector<1x128xf32> to vector<16x128xf32>
    %503 = arith.addf %501, %502 : vector<16x128xf32>
    %504 = vector.extract_strided_slice %503 {offsets = [0, 0], sizes = [16, 32], strides = [1, 1]} : vector<16x128xf32> to vector<16x32xf32>
    %505 = vector.extract_strided_slice %2 {offsets = [0, 0], sizes = [1, 32], strides = [1, 1]} : vector<4x32xf32> to vector<1x32xf32>
    %506 = vector.broadcast %505 : vector<1x32xf32> to vector<16x32xf32>
    %507 = arith.mulf %506, %374 : vector<16x32xf32>
    %508 = arith.addf %504, %507 : vector<16x32xf32>
    %509 = arith.negf %508 : vector<16x32xf32>
    %510 = math.exp %509 : vector<16x32xf32>
    %cst_251 = arith.constant 1.000000e+00 : f32
    %511 = vector.broadcast %cst_251 : f32 to vector<16x32xf32>
    %512 = arith.addf %511, %510 : vector<16x32xf32>
    %513 = arith.divf %511, %512 : vector<16x32xf32>
    %514 = vector.extract_strided_slice %503 {offsets = [0, 32], sizes = [16, 32], strides = [1, 1]} : vector<16x128xf32> to vector<16x32xf32>
    %515 = vector.extract_strided_slice %2 {offsets = [1, 0], sizes = [1, 32], strides = [1, 1]} : vector<4x32xf32> to vector<1x32xf32>
    %516 = vector.broadcast %515 : vector<1x32xf32> to vector<16x32xf32>
    %517 = arith.mulf %516, %374 : vector<16x32xf32>
    %518 = arith.addf %514, %517 : vector<16x32xf32>
    %519 = arith.negf %518 : vector<16x32xf32>
    %520 = math.exp %519 : vector<16x32xf32>
    %cst_252 = arith.constant 1.000000e+00 : f32
    %521 = vector.broadcast %cst_252 : f32 to vector<16x32xf32>
    %522 = arith.addf %521, %520 : vector<16x32xf32>
    %523 = arith.divf %521, %522 : vector<16x32xf32>
    %524 = arith.mulf %523, %374 : vector<16x32xf32>
    %525 = vector.extract_strided_slice %503 {offsets = [0, 64], sizes = [16, 32], strides = [1, 1]} : vector<16x128xf32> to vector<16x32xf32>
    %526 = math.tanh %525 : vector<16x32xf32>
    %527 = arith.mulf %513, %526 : vector<16x32xf32>
    %528 = arith.addf %524, %527 : vector<16x32xf32>
    %529 = vector.extract_strided_slice %503 {offsets = [0, 96], sizes = [16, 32], strides = [1, 1]} : vector<16x128xf32> to vector<16x32xf32>
    %530 = vector.extract_strided_slice %2 {offsets = [3, 0], sizes = [1, 32], strides = [1, 1]} : vector<4x32xf32> to vector<1x32xf32>
    %531 = vector.broadcast %530 : vector<1x32xf32> to vector<16x32xf32>
    %532 = arith.mulf %531, %528 : vector<16x32xf32>
    %533 = arith.addf %529, %532 : vector<16x32xf32>
    %534 = arith.negf %533 : vector<16x32xf32>
    %535 = math.exp %534 : vector<16x32xf32>
    %cst_253 = arith.constant 1.000000e+00 : f32
    %536 = vector.broadcast %cst_253 : f32 to vector<16x32xf32>
    %537 = arith.addf %536, %535 : vector<16x32xf32>
    %538 = arith.divf %536, %537 : vector<16x32xf32>
    %539 = math.tanh %528 : vector<16x32xf32>
    %540 = arith.mulf %538, %539 : vector<16x32xf32>
    %cst_254 = arith.constant 0.000000e+00 : f32
    %541 = vector.broadcast %cst_254 : f32 to vector<16x32xf32>
    %542 = arith.maximumf %540, %541 : vector<16x32xf32>
    %543 = tpu.concatenate %542, %465 in 1 : vector<16x32xf32>, vector<16x32xf32> -> vector<16x64xf32>
    %544 = arith.truncf %543 : vector<16x64xf32> to vector<16x64xbf16>
    %cst_255 = arith.constant dense<0.000000e+00> : vector<16x64xf32>
    %545 = tpu.matmul %10, %544, %cst_255 {dimension_numbers = #tpu.dot_dimension_numbers<[1], [0], [0], [1], [0, 0, 1, 1], [], []>} : vector<16x16xbf16>, vector<16x64xbf16>, vector<16x64xf32> -> vector<16x64xf32>
    %546 = arith.truncf %545 : vector<16x64xf32> to vector<16x64xbf16>
    %cst_256 = arith.constant dense<0.000000e+00> : vector<16x64xf32>
    %547 = tpu.matmul %15, %546, %cst_256 {dimension_numbers = #tpu.dot_dimension_numbers<[1], [0], [0], [1], [0, 0, 1, 1], [], []>} : vector<16x16xbf16>, vector<16x64xbf16>, vector<16x64xf32> -> vector<16x64xf32>
    %548 = arith.extf %544 : vector<16x64xbf16> to vector<16x64xf32>
    %549 = arith.subf %547, %548 : vector<16x64xf32>
    %550 = arith.truncf %549 : vector<16x64xf32> to vector<16x64xbf16>
    %cst_257 = arith.constant dense<0.000000e+00> : vector<16x64xf32>
    %551 = tpu.matmul %15, %550, %cst_257 {dimension_numbers = #tpu.dot_dimension_numbers<[1], [0], [0], [1], [0, 0, 1, 1], [], []>} : vector<16x16xbf16>, vector<16x64xbf16>, vector<16x64xf32> -> vector<16x64xf32>
    %552 = arith.subf %551, %545 : vector<16x64xf32>
    %553 = arith.truncf %552 : vector<16x64xf32> to vector<16x64xbf16>
    %cst_258 = arith.constant dense<0.000000e+00> : vector<16x64xf32>
    %554 = tpu.matmul %15, %553, %cst_258 {dimension_numbers = #tpu.dot_dimension_numbers<[1], [0], [0], [1], [0, 0, 1, 1], [], []>} : vector<16x16xbf16>, vector<16x64xbf16>, vector<16x64xf32> -> vector<16x64xf32>
    %555 = arith.subf %554, %549 : vector<16x64xf32>
    %c0_259 = arith.constant 0 : index
    %c0_260 = arith.constant 0 : index
    %c0_261 = arith.constant 0 : index
    %556 = vector.load %arg4[%c0_259, %c0_260, %c0_261] : memref<5x64x128xbf16, #tpu.memory_space<vmem>>, vector<1x64x128xbf16>
    %557 = vector.shape_cast %556 : vector<1x64x128xbf16> to vector<64x128xbf16>
    %cst_262 = arith.constant dense<0.000000e+00> : vector<16x128xf32>
    %558 = tpu.matmul %544, %557, %cst_262 {dimension_numbers = #tpu.dot_dimension_numbers<[1], [0], [0], [1], [0, 0, 1, 1], [], []>} : vector<16x64xbf16>, vector<64x128xbf16>, vector<16x128xf32> -> vector<16x128xf32>
    %559 = arith.truncf %545 : vector<16x64xf32> to vector<16x64xbf16>
    %c1_263 = arith.constant 1 : index
    %c0_264 = arith.constant 0 : index
    %c0_265 = arith.constant 0 : index
    %560 = vector.load %arg4[%c1_263, %c0_264, %c0_265] : memref<5x64x128xbf16, #tpu.memory_space<vmem>>, vector<1x64x128xbf16>
    %561 = vector.shape_cast %560 : vector<1x64x128xbf16> to vector<64x128xbf16>
    %cst_266 = arith.constant dense<0.000000e+00> : vector<16x128xf32>
    %562 = tpu.matmul %559, %561, %cst_266 {dimension_numbers = #tpu.dot_dimension_numbers<[1], [0], [0], [1], [0, 0, 1, 1], [], []>} : vector<16x64xbf16>, vector<64x128xbf16>, vector<16x128xf32> -> vector<16x128xf32>
    %563 = arith.addf %558, %562 : vector<16x128xf32>
    %564 = arith.truncf %549 : vector<16x64xf32> to vector<16x64xbf16>
    %c2_267 = arith.constant 2 : index
    %c0_268 = arith.constant 0 : index
    %c0_269 = arith.constant 0 : index
    %565 = vector.load %arg4[%c2_267, %c0_268, %c0_269] : memref<5x64x128xbf16, #tpu.memory_space<vmem>>, vector<1x64x128xbf16>
    %566 = vector.shape_cast %565 : vector<1x64x128xbf16> to vector<64x128xbf16>
    %cst_270 = arith.constant dense<0.000000e+00> : vector<16x128xf32>
    %567 = tpu.matmul %564, %566, %cst_270 {dimension_numbers = #tpu.dot_dimension_numbers<[1], [0], [0], [1], [0, 0, 1, 1], [], []>} : vector<16x64xbf16>, vector<64x128xbf16>, vector<16x128xf32> -> vector<16x128xf32>
    %568 = arith.addf %563, %567 : vector<16x128xf32>
    %569 = arith.truncf %552 : vector<16x64xf32> to vector<16x64xbf16>
    %c3_271 = arith.constant 3 : index
    %c0_272 = arith.constant 0 : index
    %c0_273 = arith.constant 0 : index
    %570 = vector.load %arg4[%c3_271, %c0_272, %c0_273] : memref<5x64x128xbf16, #tpu.memory_space<vmem>>, vector<1x64x128xbf16>
    %571 = vector.shape_cast %570 : vector<1x64x128xbf16> to vector<64x128xbf16>
    %cst_274 = arith.constant dense<0.000000e+00> : vector<16x128xf32>
    %572 = tpu.matmul %569, %571, %cst_274 {dimension_numbers = #tpu.dot_dimension_numbers<[1], [0], [0], [1], [0, 0, 1, 1], [], []>} : vector<16x64xbf16>, vector<64x128xbf16>, vector<16x128xf32> -> vector<16x128xf32>
    %573 = arith.addf %568, %572 : vector<16x128xf32>
    %574 = arith.truncf %555 : vector<16x64xf32> to vector<16x64xbf16>
    %c4_275 = arith.constant 4 : index
    %c0_276 = arith.constant 0 : index
    %c0_277 = arith.constant 0 : index
    %575 = vector.load %arg4[%c4_275, %c0_276, %c0_277] : memref<5x64x128xbf16, #tpu.memory_space<vmem>>, vector<1x64x128xbf16>
    %576 = vector.shape_cast %575 : vector<1x64x128xbf16> to vector<64x128xbf16>
    %cst_278 = arith.constant dense<0.000000e+00> : vector<16x128xf32>
    %577 = tpu.matmul %574, %576, %cst_278 {dimension_numbers = #tpu.dot_dimension_numbers<[1], [0], [0], [1], [0, 0, 1, 1], [], []>} : vector<16x64xbf16>, vector<64x128xbf16>, vector<16x128xf32> -> vector<16x128xf32>
    %578 = arith.addf %573, %577 : vector<16x128xf32>
    %579 = vector.broadcast %1 : vector<1x128xf32> to vector<16x128xf32>
    %580 = arith.addf %578, %579 : vector<16x128xf32>
    %581 = vector.extract_strided_slice %580 {offsets = [0, 0], sizes = [16, 32], strides = [1, 1]} : vector<16x128xf32> to vector<16x32xf32>
    %582 = vector.extract_strided_slice %3 {offsets = [0, 0], sizes = [1, 32], strides = [1, 1]} : vector<4x32xf32> to vector<1x32xf32>
    %583 = vector.broadcast %582 : vector<1x32xf32> to vector<16x32xf32>
    %584 = arith.mulf %583, %451 : vector<16x32xf32>
    %585 = arith.addf %581, %584 : vector<16x32xf32>
    %586 = arith.negf %585 : vector<16x32xf32>
    %587 = math.exp %586 : vector<16x32xf32>
    %cst_279 = arith.constant 1.000000e+00 : f32
    %588 = vector.broadcast %cst_279 : f32 to vector<16x32xf32>
    %589 = arith.addf %588, %587 : vector<16x32xf32>
    %590 = arith.divf %588, %589 : vector<16x32xf32>
    %591 = vector.extract_strided_slice %580 {offsets = [0, 32], sizes = [16, 32], strides = [1, 1]} : vector<16x128xf32> to vector<16x32xf32>
    %592 = vector.extract_strided_slice %3 {offsets = [1, 0], sizes = [1, 32], strides = [1, 1]} : vector<4x32xf32> to vector<1x32xf32>
    %593 = vector.broadcast %592 : vector<1x32xf32> to vector<16x32xf32>
    %594 = arith.mulf %593, %451 : vector<16x32xf32>
    %595 = arith.addf %591, %594 : vector<16x32xf32>
    %596 = arith.negf %595 : vector<16x32xf32>
    %597 = math.exp %596 : vector<16x32xf32>
    %cst_280 = arith.constant 1.000000e+00 : f32
    %598 = vector.broadcast %cst_280 : f32 to vector<16x32xf32>
    %599 = arith.addf %598, %597 : vector<16x32xf32>
    %600 = arith.divf %598, %599 : vector<16x32xf32>
    %601 = arith.mulf %600, %451 : vector<16x32xf32>
    %602 = vector.extract_strided_slice %580 {offsets = [0, 64], sizes = [16, 32], strides = [1, 1]} : vector<16x128xf32> to vector<16x32xf32>
    %603 = math.tanh %602 : vector<16x32xf32>
    %604 = arith.mulf %590, %603 : vector<16x32xf32>
    %605 = arith.addf %601, %604 : vector<16x32xf32>
    %606 = vector.extract_strided_slice %580 {offsets = [0, 96], sizes = [16, 32], strides = [1, 1]} : vector<16x128xf32> to vector<16x32xf32>
    %607 = vector.extract_strided_slice %3 {offsets = [3, 0], sizes = [1, 32], strides = [1, 1]} : vector<4x32xf32> to vector<1x32xf32>
    %608 = vector.broadcast %607 : vector<1x32xf32> to vector<16x32xf32>
    %609 = arith.mulf %608, %605 : vector<16x32xf32>
    %610 = arith.addf %606, %609 : vector<16x32xf32>
    %611 = arith.negf %610 : vector<16x32xf32>
    %612 = math.exp %611 : vector<16x32xf32>
    %cst_281 = arith.constant 1.000000e+00 : f32
    %613 = vector.broadcast %cst_281 : f32 to vector<16x32xf32>
    %614 = arith.addf %613, %612 : vector<16x32xf32>
    %615 = arith.divf %613, %614 : vector<16x32xf32>
    %616 = math.tanh %605 : vector<16x32xf32>
    %617 = arith.mulf %615, %616 : vector<16x32xf32>
    %cst_282 = arith.constant 0.000000e+00 : f32
    %618 = vector.broadcast %cst_282 : f32 to vector<16x32xf32>
    %619 = arith.maximumf %617, %618 : vector<16x32xf32>
    %620 = arith.truncf %542 : vector<16x32xf32> to vector<16x32xbf16>
    %cst_283 = arith.constant dense<0.000000e+00> : vector<16x32xf32>
    %621 = tpu.matmul %12, %620, %cst_283 {dimension_numbers = #tpu.dot_dimension_numbers<[1], [0], [0], [1], [0, 0, 1, 1], [], []>} : vector<16x16xbf16>, vector<16x32xbf16>, vector<16x32xf32> -> vector<16x32xf32>
    %622 = arith.truncf %621 : vector<16x32xf32> to vector<16x32xbf16>
    %cst_284 = arith.constant dense<0.000000e+00> : vector<16x32xf32>
    %623 = tpu.matmul %16, %622, %cst_284 {dimension_numbers = #tpu.dot_dimension_numbers<[1], [0], [0], [1], [0, 0, 1, 1], [], []>} : vector<16x16xbf16>, vector<16x32xbf16>, vector<16x32xf32> -> vector<16x32xf32>
    %624 = arith.extf %620 : vector<16x32xbf16> to vector<16x32xf32>
    %625 = arith.subf %623, %624 : vector<16x32xf32>
    %626 = arith.truncf %625 : vector<16x32xf32> to vector<16x32xbf16>
    %cst_285 = arith.constant dense<0.000000e+00> : vector<16x32xf32>
    %627 = tpu.matmul %16, %626, %cst_285 {dimension_numbers = #tpu.dot_dimension_numbers<[1], [0], [0], [1], [0, 0, 1, 1], [], []>} : vector<16x16xbf16>, vector<16x32xbf16>, vector<16x32xf32> -> vector<16x32xf32>
    %628 = arith.subf %627, %621 : vector<16x32xf32>
    %629 = arith.truncf %628 : vector<16x32xf32> to vector<16x32xbf16>
    %cst_286 = arith.constant dense<0.000000e+00> : vector<16x32xf32>
    %630 = tpu.matmul %16, %629, %cst_286 {dimension_numbers = #tpu.dot_dimension_numbers<[1], [0], [0], [1], [0, 0, 1, 1], [], []>} : vector<16x16xbf16>, vector<16x32xbf16>, vector<16x32xf32> -> vector<16x32xf32>
    %631 = arith.subf %630, %625 : vector<16x32xf32>
    %c0_287 = arith.constant 0 : index
    %c0_288 = arith.constant 0 : index
    %c0_289 = arith.constant 0 : index
    %632 = vector.load %arg3[%c0_287, %c0_288, %c0_289] : memref<5x32x128xbf16, #tpu.memory_space<vmem>>, vector<1x32x128xbf16>
    %633 = vector.shape_cast %632 : vector<1x32x128xbf16> to vector<32x128xbf16>
    %cst_290 = arith.constant dense<0.000000e+00> : vector<16x128xf32>
    %634 = tpu.matmul %620, %633, %cst_290 {dimension_numbers = #tpu.dot_dimension_numbers<[1], [0], [0], [1], [0, 0, 1, 1], [], []>} : vector<16x32xbf16>, vector<32x128xbf16>, vector<16x128xf32> -> vector<16x128xf32>
    %635 = arith.addf %153, %634 : vector<16x128xf32>
    %636 = arith.truncf %621 : vector<16x32xf32> to vector<16x32xbf16>
    %c1_291 = arith.constant 1 : index
    %c0_292 = arith.constant 0 : index
    %c0_293 = arith.constant 0 : index
    %637 = vector.load %arg3[%c1_291, %c0_292, %c0_293] : memref<5x32x128xbf16, #tpu.memory_space<vmem>>, vector<1x32x128xbf16>
    %638 = vector.shape_cast %637 : vector<1x32x128xbf16> to vector<32x128xbf16>
    %cst_294 = arith.constant dense<0.000000e+00> : vector<16x128xf32>
    %639 = tpu.matmul %636, %638, %cst_294 {dimension_numbers = #tpu.dot_dimension_numbers<[1], [0], [0], [1], [0, 0, 1, 1], [], []>} : vector<16x32xbf16>, vector<32x128xbf16>, vector<16x128xf32> -> vector<16x128xf32>
    %640 = arith.addf %635, %639 : vector<16x128xf32>
    %641 = arith.truncf %625 : vector<16x32xf32> to vector<16x32xbf16>
    %c2_295 = arith.constant 2 : index
    %c0_296 = arith.constant 0 : index
    %c0_297 = arith.constant 0 : index
    %642 = vector.load %arg3[%c2_295, %c0_296, %c0_297] : memref<5x32x128xbf16, #tpu.memory_space<vmem>>, vector<1x32x128xbf16>
    %643 = vector.shape_cast %642 : vector<1x32x128xbf16> to vector<32x128xbf16>
    %cst_298 = arith.constant dense<0.000000e+00> : vector<16x128xf32>
    %644 = tpu.matmul %641, %643, %cst_298 {dimension_numbers = #tpu.dot_dimension_numbers<[1], [0], [0], [1], [0, 0, 1, 1], [], []>} : vector<16x32xbf16>, vector<32x128xbf16>, vector<16x128xf32> -> vector<16x128xf32>
    %645 = arith.addf %640, %644 : vector<16x128xf32>
    %646 = arith.truncf %628 : vector<16x32xf32> to vector<16x32xbf16>
    %c3_299 = arith.constant 3 : index
    %c0_300 = arith.constant 0 : index
    %c0_301 = arith.constant 0 : index
    %647 = vector.load %arg3[%c3_299, %c0_300, %c0_301] : memref<5x32x128xbf16, #tpu.memory_space<vmem>>, vector<1x32x128xbf16>
    %648 = vector.shape_cast %647 : vector<1x32x128xbf16> to vector<32x128xbf16>
    %cst_302 = arith.constant dense<0.000000e+00> : vector<16x128xf32>
    %649 = tpu.matmul %646, %648, %cst_302 {dimension_numbers = #tpu.dot_dimension_numbers<[1], [0], [0], [1], [0, 0, 1, 1], [], []>} : vector<16x32xbf16>, vector<32x128xbf16>, vector<16x128xf32> -> vector<16x128xf32>
    %650 = arith.addf %645, %649 : vector<16x128xf32>
    %651 = arith.truncf %631 : vector<16x32xf32> to vector<16x32xbf16>
    %c4_303 = arith.constant 4 : index
    %c0_304 = arith.constant 0 : index
    %c0_305 = arith.constant 0 : index
    %652 = vector.load %arg3[%c4_303, %c0_304, %c0_305] : memref<5x32x128xbf16, #tpu.memory_space<vmem>>, vector<1x32x128xbf16>
    %653 = vector.shape_cast %652 : vector<1x32x128xbf16> to vector<32x128xbf16>
    %cst_306 = arith.constant dense<0.000000e+00> : vector<16x128xf32>
    %654 = tpu.matmul %651, %653, %cst_306 {dimension_numbers = #tpu.dot_dimension_numbers<[1], [0], [0], [1], [0, 0, 1, 1], [], []>} : vector<16x32xbf16>, vector<32x128xbf16>, vector<16x128xf32> -> vector<16x128xf32>
    %655 = arith.addf %650, %654 : vector<16x128xf32>
    %656 = vector.broadcast %0 : vector<1x128xf32> to vector<16x128xf32>
    %657 = arith.addf %655, %656 : vector<16x128xf32>
    %658 = vector.extract_strided_slice %657 {offsets = [0, 0], sizes = [16, 32], strides = [1, 1]} : vector<16x128xf32> to vector<16x32xf32>
    %659 = vector.extract_strided_slice %2 {offsets = [0, 0], sizes = [1, 32], strides = [1, 1]} : vector<4x32xf32> to vector<1x32xf32>
    %660 = vector.broadcast %659 : vector<1x32xf32> to vector<16x32xf32>
    %661 = arith.mulf %660, %528 : vector<16x32xf32>
    %662 = arith.addf %658, %661 : vector<16x32xf32>
    %663 = arith.negf %662 : vector<16x32xf32>
    %664 = math.exp %663 : vector<16x32xf32>
    %cst_307 = arith.constant 1.000000e+00 : f32
    %665 = vector.broadcast %cst_307 : f32 to vector<16x32xf32>
    %666 = arith.addf %665, %664 : vector<16x32xf32>
    %667 = arith.divf %665, %666 : vector<16x32xf32>
    %668 = vector.extract_strided_slice %657 {offsets = [0, 32], sizes = [16, 32], strides = [1, 1]} : vector<16x128xf32> to vector<16x32xf32>
    %669 = vector.extract_strided_slice %2 {offsets = [1, 0], sizes = [1, 32], strides = [1, 1]} : vector<4x32xf32> to vector<1x32xf32>
    %670 = vector.broadcast %669 : vector<1x32xf32> to vector<16x32xf32>
    %671 = arith.mulf %670, %528 : vector<16x32xf32>
    %672 = arith.addf %668, %671 : vector<16x32xf32>
    %673 = arith.negf %672 : vector<16x32xf32>
    %674 = math.exp %673 : vector<16x32xf32>
    %cst_308 = arith.constant 1.000000e+00 : f32
    %675 = vector.broadcast %cst_308 : f32 to vector<16x32xf32>
    %676 = arith.addf %675, %674 : vector<16x32xf32>
    %677 = arith.divf %675, %676 : vector<16x32xf32>
    %678 = arith.mulf %677, %528 : vector<16x32xf32>
    %679 = vector.extract_strided_slice %657 {offsets = [0, 64], sizes = [16, 32], strides = [1, 1]} : vector<16x128xf32> to vector<16x32xf32>
    %680 = math.tanh %679 : vector<16x32xf32>
    %681 = arith.mulf %667, %680 : vector<16x32xf32>
    %682 = arith.addf %678, %681 : vector<16x32xf32>
    %683 = vector.extract_strided_slice %657 {offsets = [0, 96], sizes = [16, 32], strides = [1, 1]} : vector<16x128xf32> to vector<16x32xf32>
    %684 = vector.extract_strided_slice %2 {offsets = [3, 0], sizes = [1, 32], strides = [1, 1]} : vector<4x32xf32> to vector<1x32xf32>
    %685 = vector.broadcast %684 : vector<1x32xf32> to vector<16x32xf32>
    %686 = arith.mulf %685, %682 : vector<16x32xf32>
    %687 = arith.addf %683, %686 : vector<16x32xf32>
    %688 = arith.negf %687 : vector<16x32xf32>
    %689 = math.exp %688 : vector<16x32xf32>
    %cst_309 = arith.constant 1.000000e+00 : f32
    %690 = vector.broadcast %cst_309 : f32 to vector<16x32xf32>
    %691 = arith.addf %690, %689 : vector<16x32xf32>
    %692 = arith.divf %690, %691 : vector<16x32xf32>
    %693 = math.tanh %682 : vector<16x32xf32>
    %694 = arith.mulf %692, %693 : vector<16x32xf32>
    %cst_310 = arith.constant 0.000000e+00 : f32
    %695 = vector.broadcast %cst_310 : f32 to vector<16x32xf32>
    %696 = arith.maximumf %694, %695 : vector<16x32xf32>
    %697 = tpu.concatenate %696, %619 in 1 : vector<16x32xf32>, vector<16x32xf32> -> vector<16x64xf32>
    %698 = arith.truncf %697 : vector<16x64xf32> to vector<16x64xbf16>
    %cst_311 = arith.constant dense<0.000000e+00> : vector<16x64xf32>
    %699 = tpu.matmul %12, %698, %cst_311 {dimension_numbers = #tpu.dot_dimension_numbers<[1], [0], [0], [1], [0, 0, 1, 1], [], []>} : vector<16x16xbf16>, vector<16x64xbf16>, vector<16x64xf32> -> vector<16x64xf32>
    %700 = arith.truncf %699 : vector<16x64xf32> to vector<16x64xbf16>
    %cst_312 = arith.constant dense<0.000000e+00> : vector<16x64xf32>
    %701 = tpu.matmul %16, %700, %cst_312 {dimension_numbers = #tpu.dot_dimension_numbers<[1], [0], [0], [1], [0, 0, 1, 1], [], []>} : vector<16x16xbf16>, vector<16x64xbf16>, vector<16x64xf32> -> vector<16x64xf32>
    %702 = arith.extf %698 : vector<16x64xbf16> to vector<16x64xf32>
    %703 = arith.subf %701, %702 : vector<16x64xf32>
    %704 = arith.truncf %703 : vector<16x64xf32> to vector<16x64xbf16>
    %cst_313 = arith.constant dense<0.000000e+00> : vector<16x64xf32>
    %705 = tpu.matmul %16, %704, %cst_313 {dimension_numbers = #tpu.dot_dimension_numbers<[1], [0], [0], [1], [0, 0, 1, 1], [], []>} : vector<16x16xbf16>, vector<16x64xbf16>, vector<16x64xf32> -> vector<16x64xf32>
    %706 = arith.subf %705, %699 : vector<16x64xf32>
    %707 = arith.truncf %706 : vector<16x64xf32> to vector<16x64xbf16>
    %cst_314 = arith.constant dense<0.000000e+00> : vector<16x64xf32>
    %708 = tpu.matmul %16, %707, %cst_314 {dimension_numbers = #tpu.dot_dimension_numbers<[1], [0], [0], [1], [0, 0, 1, 1], [], []>} : vector<16x16xbf16>, vector<16x64xbf16>, vector<16x64xf32> -> vector<16x64xf32>
    %709 = arith.subf %708, %703 : vector<16x64xf32>
    %c0_315 = arith.constant 0 : index
    %c0_316 = arith.constant 0 : index
    %c0_317 = arith.constant 0 : index
    %710 = vector.load %arg4[%c0_315, %c0_316, %c0_317] : memref<5x64x128xbf16, #tpu.memory_space<vmem>>, vector<1x64x128xbf16>
    %711 = vector.shape_cast %710 : vector<1x64x128xbf16> to vector<64x128xbf16>
    %cst_318 = arith.constant dense<0.000000e+00> : vector<16x128xf32>
    %712 = tpu.matmul %698, %711, %cst_318 {dimension_numbers = #tpu.dot_dimension_numbers<[1], [0], [0], [1], [0, 0, 1, 1], [], []>} : vector<16x64xbf16>, vector<64x128xbf16>, vector<16x128xf32> -> vector<16x128xf32>
    %713 = arith.truncf %699 : vector<16x64xf32> to vector<16x64xbf16>
    %c1_319 = arith.constant 1 : index
    %c0_320 = arith.constant 0 : index
    %c0_321 = arith.constant 0 : index
    %714 = vector.load %arg4[%c1_319, %c0_320, %c0_321] : memref<5x64x128xbf16, #tpu.memory_space<vmem>>, vector<1x64x128xbf16>
    %715 = vector.shape_cast %714 : vector<1x64x128xbf16> to vector<64x128xbf16>
    %cst_322 = arith.constant dense<0.000000e+00> : vector<16x128xf32>
    %716 = tpu.matmul %713, %715, %cst_322 {dimension_numbers = #tpu.dot_dimension_numbers<[1], [0], [0], [1], [0, 0, 1, 1], [], []>} : vector<16x64xbf16>, vector<64x128xbf16>, vector<16x128xf32> -> vector<16x128xf32>
    %717 = arith.addf %712, %716 : vector<16x128xf32>
    %718 = arith.truncf %703 : vector<16x64xf32> to vector<16x64xbf16>
    %c2_323 = arith.constant 2 : index
    %c0_324 = arith.constant 0 : index
    %c0_325 = arith.constant 0 : index
    %719 = vector.load %arg4[%c2_323, %c0_324, %c0_325] : memref<5x64x128xbf16, #tpu.memory_space<vmem>>, vector<1x64x128xbf16>
    %720 = vector.shape_cast %719 : vector<1x64x128xbf16> to vector<64x128xbf16>
    %cst_326 = arith.constant dense<0.000000e+00> : vector<16x128xf32>
    %721 = tpu.matmul %718, %720, %cst_326 {dimension_numbers = #tpu.dot_dimension_numbers<[1], [0], [0], [1], [0, 0, 1, 1], [], []>} : vector<16x64xbf16>, vector<64x128xbf16>, vector<16x128xf32> -> vector<16x128xf32>
    %722 = arith.addf %717, %721 : vector<16x128xf32>
    %723 = arith.truncf %706 : vector<16x64xf32> to vector<16x64xbf16>
    %c3_327 = arith.constant 3 : index
    %c0_328 = arith.constant 0 : index
    %c0_329 = arith.constant 0 : index
    %724 = vector.load %arg4[%c3_327, %c0_328, %c0_329] : memref<5x64x128xbf16, #tpu.memory_space<vmem>>, vector<1x64x128xbf16>
    %725 = vector.shape_cast %724 : vector<1x64x128xbf16> to vector<64x128xbf16>
    %cst_330 = arith.constant dense<0.000000e+00> : vector<16x128xf32>
    %726 = tpu.matmul %723, %725, %cst_330 {dimension_numbers = #tpu.dot_dimension_numbers<[1], [0], [0], [1], [0, 0, 1, 1], [], []>} : vector<16x64xbf16>, vector<64x128xbf16>, vector<16x128xf32> -> vector<16x128xf32>
    %727 = arith.addf %722, %726 : vector<16x128xf32>
    %728 = arith.truncf %709 : vector<16x64xf32> to vector<16x64xbf16>
    %c4_331 = arith.constant 4 : index
    %c0_332 = arith.constant 0 : index
    %c0_333 = arith.constant 0 : index
    %729 = vector.load %arg4[%c4_331, %c0_332, %c0_333] : memref<5x64x128xbf16, #tpu.memory_space<vmem>>, vector<1x64x128xbf16>
    %730 = vector.shape_cast %729 : vector<1x64x128xbf16> to vector<64x128xbf16>
    %cst_334 = arith.constant dense<0.000000e+00> : vector<16x128xf32>
    %731 = tpu.matmul %728, %730, %cst_334 {dimension_numbers = #tpu.dot_dimension_numbers<[1], [0], [0], [1], [0, 0, 1, 1], [], []>} : vector<16x64xbf16>, vector<64x128xbf16>, vector<16x128xf32> -> vector<16x128xf32>
    %732 = arith.addf %727, %731 : vector<16x128xf32>
    %733 = vector.broadcast %1 : vector<1x128xf32> to vector<16x128xf32>
    %734 = arith.addf %732, %733 : vector<16x128xf32>
    %735 = vector.extract_strided_slice %734 {offsets = [0, 0], sizes = [16, 32], strides = [1, 1]} : vector<16x128xf32> to vector<16x32xf32>
    %736 = vector.extract_strided_slice %3 {offsets = [0, 0], sizes = [1, 32], strides = [1, 1]} : vector<4x32xf32> to vector<1x32xf32>
    %737 = vector.broadcast %736 : vector<1x32xf32> to vector<16x32xf32>
    %738 = arith.mulf %737, %605 : vector<16x32xf32>
    %739 = arith.addf %735, %738 : vector<16x32xf32>
    %740 = arith.negf %739 : vector<16x32xf32>
    %741 = math.exp %740 : vector<16x32xf32>
    %cst_335 = arith.constant 1.000000e+00 : f32
    %742 = vector.broadcast %cst_335 : f32 to vector<16x32xf32>
    %743 = arith.addf %742, %741 : vector<16x32xf32>
    %744 = arith.divf %742, %743 : vector<16x32xf32>
    %745 = vector.extract_strided_slice %734 {offsets = [0, 32], sizes = [16, 32], strides = [1, 1]} : vector<16x128xf32> to vector<16x32xf32>
    %746 = vector.extract_strided_slice %3 {offsets = [1, 0], sizes = [1, 32], strides = [1, 1]} : vector<4x32xf32> to vector<1x32xf32>
    %747 = vector.broadcast %746 : vector<1x32xf32> to vector<16x32xf32>
    %748 = arith.mulf %747, %605 : vector<16x32xf32>
    %749 = arith.addf %745, %748 : vector<16x32xf32>
    %750 = arith.negf %749 : vector<16x32xf32>
    %751 = math.exp %750 : vector<16x32xf32>
    %cst_336 = arith.constant 1.000000e+00 : f32
    %752 = vector.broadcast %cst_336 : f32 to vector<16x32xf32>
    %753 = arith.addf %752, %751 : vector<16x32xf32>
    %754 = arith.divf %752, %753 : vector<16x32xf32>
    %755 = arith.mulf %754, %605 : vector<16x32xf32>
    %756 = vector.extract_strided_slice %734 {offsets = [0, 64], sizes = [16, 32], strides = [1, 1]} : vector<16x128xf32> to vector<16x32xf32>
    %757 = math.tanh %756 : vector<16x32xf32>
    %758 = arith.mulf %744, %757 : vector<16x32xf32>
    %759 = arith.addf %755, %758 : vector<16x32xf32>
    %760 = vector.extract_strided_slice %734 {offsets = [0, 96], sizes = [16, 32], strides = [1, 1]} : vector<16x128xf32> to vector<16x32xf32>
    %761 = vector.extract_strided_slice %3 {offsets = [3, 0], sizes = [1, 32], strides = [1, 1]} : vector<4x32xf32> to vector<1x32xf32>
    %762 = vector.broadcast %761 : vector<1x32xf32> to vector<16x32xf32>
    %763 = arith.mulf %762, %759 : vector<16x32xf32>
    %764 = arith.addf %760, %763 : vector<16x32xf32>
    %765 = arith.negf %764 : vector<16x32xf32>
    %766 = math.exp %765 : vector<16x32xf32>
    %cst_337 = arith.constant 1.000000e+00 : f32
    %767 = vector.broadcast %cst_337 : f32 to vector<16x32xf32>
    %768 = arith.addf %767, %766 : vector<16x32xf32>
    %769 = arith.divf %767, %768 : vector<16x32xf32>
    %770 = math.tanh %759 : vector<16x32xf32>
    %771 = arith.mulf %769, %770 : vector<16x32xf32>
    %cst_338 = arith.constant 0.000000e+00 : f32
    %772 = vector.broadcast %cst_338 : f32 to vector<16x32xf32>
    %773 = arith.maximumf %771, %772 : vector<16x32xf32>
    %774 = arith.truncf %773 : vector<16x32xf32> to vector<16x32xbf16>
    %c0_339 = arith.constant 0 : index
    %c0_340 = arith.constant 0 : index
    %775 = vector.load %arg5[%c0_339, %c0_340] : memref<32x8xbf16, #tpu.memory_space<vmem>>, vector<32x8xbf16>
    %cst_341 = arith.constant dense<0.000000e+00> : vector<16x8xf32>
    %776 = tpu.matmul %774, %775, %cst_341 {dimension_numbers = #tpu.dot_dimension_numbers<[1], [0], [0], [1], [0, 0, 1, 1], [], []>} : vector<16x32xbf16>, vector<32x8xbf16>, vector<16x8xf32> -> vector<16x8xf32>
    %777 = vector.broadcast %4 : vector<1x8xf32> to vector<16x8xf32>
    %778 = arith.addf %776, %777 : vector<16x8xf32>
    %cst_342 = arith.constant dense<0xFF800000> : vector<16xf32>
    %779 = vector.multi_reduction <maximumf>, %778, %cst_342 [1] : vector<16x8xf32> to vector<16xf32>
    %780 = vector.shape_cast %779 : vector<16xf32> to vector<16x1xf32>
    %781 = vector.broadcast %780 : vector<16x1xf32> to vector<16x8xf32>
    %782 = arith.subf %778, %781 : vector<16x8xf32>
    %783 = math.exp %782 : vector<16x8xf32>
    %cst_343 = arith.constant dense<0.000000e+00> : vector<16xf32>
    %784 = vector.multi_reduction <add>, %783, %cst_343 [1] : vector<16x8xf32> to vector<16xf32>
    %785 = vector.shape_cast %784 : vector<16xf32> to vector<16x1xf32>
    %786 = math.log %785 : vector<16x1xf32>
    %787 = vector.broadcast %786 : vector<16x1xf32> to vector<16x8xf32>
    %788 = arith.subf %782, %787 : vector<16x8xf32>
    %cst_344 = arith.constant 0.000000e+00 : f32
    %789 = vector.broadcast %cst_344 : f32 to vector<16x120xf32>
    %790 = tpu.concatenate %788, %696, %682, %773, %759, %789 in 1 : vector<16x8xf32>, vector<16x32xf32>, vector<16x32xf32>, vector<16x32xf32>, vector<16x32xf32>, vector<16x120xf32> -> vector<16x256xf32>
    %c0_345 = arith.constant 0 : index
    %c0_346 = arith.constant 0 : index
    %791 = vector.load %arg7[%c0_345, %c0_346] : memref<16x256xf32, #tpu.memory_space<vmem>>, vector<16x256xf32>
    tpu.vector_store %arg7[%c0_345, %c0_346], %790 {strides = array<i32>} : memref<16x256xf32, #tpu.memory_space<vmem>>, vector<16x256xf32>,
    return
  }
}

</mosaic_0001>

<bundles_post_ra>
// kernel: forward.1
= control target key start
LH: loop header
LB: loop body
LE: loop exit
PB: predicated region body
PF: predicated region fallthrough
CT: control target
= control target key end

     0   :  { %v10018_v0 = vmov 0.0   ;;  %vm8149_vm0 = vmmov 0   ;;  %vm65_vm1 = vcmask 130048   ;;  %vm259_vm2 = vcmask 1043456   ;;  %s8151_s23 = smov 32   ;;  %s8152_s26 = smov 64   ;;  %s9996_s1 = inlined_call_operand.vmem [shape: bf16[16,8], index: 1, kind: input, shape index: {}]   ;;  %s9997_s0 = inlined_call_operand.vmem [shape: bf16[4,16,16], index: 0, kind: input, shape index: {}]   ;;  %s9998_s2 = inlined_call_operand.vmem [shape: bf16[5,8,128], index: 2, kind: input, shape index: {}]   ;;  %s9999_s3 = inlined_call_operand.vmem [shape: bf16[5,32,128], index: 3, kind: input, shape index: {}]   ;;  %s10000_s6 = inlined_call_operand.vmem [shape: f32[24,128], index: 6, kind: input, shape index: {}]   ;;  %s10001_s4 = inlined_call_operand.vmem [shape: bf16[5,64,128], index: 4, kind: input, shape index: {}]   ;;  %s10002_s5 = inlined_call_operand.vmem [shape: bf16[32,8], index: 5, kind: input, shape index: {}]   ;;  %s10003_s7 = inlined_call_operand.vmem [shape: f32[16,256], index: 7, kind: output, shape index: {}]  }
   0x1   :  { %6938 = vmatprep.subr.bf16.mxu0 %v10018_v0  ;;  %v8202_v1 = vld [vmem:[%s9996_s1] sm:$0xff]   ;;  %6940 = vmatprep.mubr.msk.bf16.mxu0 %vm8149_vm0, %v10018_v0  ;;  %v6394_v24 = vld [vmem:[%s9998_s2 + $0x8] sm:$0xf]  ;;  %vm255_vm3 = vcmask 64512   ;;  %v6379_v27 = vld [vmem:[%s9997_s0 + $0xc] sm:$0xf] }
   0x2   :  { %v33_v2 = vld [vmem:[%s9997_s0] sm:$0xf]  ;;  %v34_v3 = vld [vmem:[%s9997_s0 + $0x4] sm:$0xf]  ;;  %6944 = vmatprep.subr.bf16.mxu1 %v10018_v0  ;;  %6946 = vmatprep.mubr.msk.bf16.mxu1 %vm8149_vm0, %v10018_v0  ;;  %v8231_v14 = vunpack.c.l.bf16 %v8202_v1  ;;  %v8234_v15 = vunpack.c.h.bf16 %v8202_v1  ;;  %v8261_v25 = vsel %vm259_vm2, %v6394_v24, 0  ;;  %v47_v29 = vadd.bf16 %v6379_v27, %v6379_v27 }
   0x3   :  { %v44_v4 = vadd.bf16 %v33_v2, %v33_v2  ;;  %v45_v5 = vadd.bf16 %v34_v3, %v34_v3  ;;  %v8215_v6 = vcombine.low %v33_v2, %v34_v3  ;;  %6939 = vmatpush3.bf16.msra.mxu0 %v8202_v1  ;;  %v6391_v22 = vld [vmem:[%s9998_s2 + $0x4] sm:$0xf]  ;;  %v6378_v26 = vld [vmem:[%s9997_s0 + $0x8] sm:$0xf]  ;;  %v252_v38 = vld [vmem:[%s9998_s2] sm:$0xf] }
   0x4   :  { %6950 = vmatprep.subr.bf16.mxu0 %v10018_v0  ;;  %v8249_v23 = vsel %vm259_vm2, %v6391_v22, 0  ;;  %v46_v28 = vadd.bf16 %v6378_v26, %v6378_v26  ;;  %v8284_v41 = vsel %vm259_vm2, %v252_v38, 0  ;;  %v6396_v44 = vld [vmem:[%s9998_s2 + $0xc] sm:$0xf]  ;;  %v8309_v50 = vcombine.low %v6378_v26, %v6379_v27  ;;  %v6398_v51 = vld [vmem:[%s9998_s2 + $0x10] sm:$0xf] }
   0x5   :  { %v8218_v7 = vcombine.low %v44_v4, %v45_v5  ;;  %v8296_v47 = vsel %vm259_vm2, %v6396_v44, 0  ;;  %v8319_v52 = vsel %vm259_vm2, %v6398_v51, 0  ;;  %v6381_v38 = vld [vmem:[%s9997_s0 + $0x14] sm:$0xf]  ;;  %vm1933_vm4 = vcmask 261120   ;;  %s8157_s2 = smov 72  }
   0x6   :  { %6941 = vmatmul.mubr.msk.bf16.vlgmr.msra.gmra.mxu0 %vm65_vm1, %v8215_v6  ;;  %v8277_v30 = vcombine.low %v46_v28, %v47_v29  ;;  %vm2578_vm5 = vcmask 523264   ;;  %vm6359_vm6 = vcmask 326656   ;;  %vm6362_vm7 = vcmask 588800  }
   0x7   :  { %6952 = vmatprep.mubr.msk.bf16.mxu0 %vm8149_vm0, %v10018_v0  ;;  %vm6365_vm8 = vcmask 850944  }
  0xc6   :  { %v103_v8 = vpop.f32.mrf.mxu0 }
  0xc8   :  { %v6942_v9 = vpop.f32.mrf.mxu0 }
  0xca   :  { %v106_v10 = vpop.f32.mrf.mxu0 }
  0xcb   :  { %v110_v11 = vpack.c.bf16 %v106_v10, %v103_v8 }
  0xcc   :  { %v6943_v12 = vpop.f32.mrf.mxu0 }
  0xcd   :  { %6945 = vmatpush3.bf16.msra.mxu1 %v110_v11 }
  0xce   :  { %6956 = vmatprep.subr.bf16.mxu1 %v10018_v0 }
  0xd0   :  { %6947 = vmatmul.mubr.msk.bf16.vlgmr.msra.gmra.mxu1 %vm65_vm1, %v8218_v7 }
  0xd1   :  { %6958 = vmatprep.mubr.msk.bf16.mxu1 %vm8149_vm0, %v10018_v0 }
 0x190   :  { %v153_v13 = vpop.f32.mrf.mxu1 }
 0x191   :  { %v8237_v18 = vsub.f32 %v153_v13, %v8231_v14 }
 0x192   :  { %v6948_v16 = vpop.f32.mrf.mxu1 }
 0x194   :  { %v156_v17 = vpop.f32.mrf.mxu1 }
 0x195   :  { %v8240_v19 = vsub.f32 %v156_v17, %v8234_v15 }
 0x196   :  { %v6949_v20 = vpop.f32.mrf.mxu1 }
 0x197   :  { %v164_v21 = vpack.c.bf16 %v8240_v19, %v8237_v18 }
 0x199   :  { %6951 = vmatpush3.bf16.msra.mxu0 %v164_v21 }
 0x19a   :  { %6962 = vmatprep.subr.bf16.mxu0 %v10018_v0 }
 0x19c   :  { %6953 = vmatmul.mubr.msk.bf16.vlgmr.msra.gmra.mxu0 %vm65_vm1, %v8218_v7 }
 0x19d   :  { %6963 = vmatpush3.bf16.msra.mxu0 %v8249_v23  ;;  %6964 = vmatprep.mubr.msk.bf16.mxu0 %vm8149_vm0, %v10018_v0 }
 0x19e   :  { %6974 = vmatprep.subr.bf16.mxu0 %v10018_v0 }
 0x1a4   :  { %6965 = vmatmul.mubr.msk.bf16.vlgmr.msra.gmra.mxu0 %vm255_vm3, %v110_v11 }
 0x1a5   :  { %6975 = vmatpush3.bf16.msra.mxu0 %v8261_v25  ;;  %6976 = vmatprep.mubr.msk.bf16.mxu0 %vm8149_vm0, %v10018_v0 }
 0x1a6   :  { %6986 = vmatprep.subr.bf16.mxu0 %v10018_v0 }
 0x1ac   :  { %6977 = vmatmul.mubr.msk.bf16.vlgmr.msra.gmra.mxu0 %vm255_vm3, %v164_v21 }
 0x1ad   :  { %6988 = vmatprep.mubr.msk.bf16.mxu0 %vm8149_vm0, %v10018_v0  ;;  %6987 = vmatpush3.bf16.msra.mxu0 %v8319_v52 }
 0x1ae   :  { %6998 = vmatprep.subr.bf16.mxu0 %v10018_v0 }
 0x25c   :  { %v199_v31 = vpop.f32.mrf.mxu0 }
 0x25d   :  { %v206_v34 = vsub.f32 %v199_v31, %v103_v8 }
 0x25e   :  { %v6954_v32 = vpop.f32.mrf.mxu0 }
 0x260   :  { %v202_v33 = vpop.f32.mrf.mxu0 }
 0x261   :  { %v207_v35 = vsub.f32 %v202_v33, %v106_v10 }
 0x262   :  { %v6955_v36 = vpop.f32.mrf.mxu0 }
 0x263   :  { %v208_v37 = vpack.c.bf16 %v207_v35, %v206_v34 }
 0x264   :  { %v297_v39 = vpop.f32.mrf.mxu0 }
 0x265   :  { %6957 = vmatpush3.bf16.msra.mxu1 %v208_v37 }
 0x266   :  { %v6966_v40 = vpop.f32.mrf.mxu0  ;;  %6968 = vmatprep.subr.bf16.mxu1 %v10018_v0 }
 0x267   :  { %v49_v40 = vadd.bf16 %v6381_v38, %v6381_v38 }
 0x268   :  { %6959 = vmatmul.mubr.msk.bf16.vlgmr.msra.gmra.mxu1 %vm65_vm1, %v8218_v7  ;;  %v300_v42 = vpop.f32.mrf.mxu0 }
 0x269   :  { %6969 = vmatpush3.bf16.msra.mxu1 %v8284_v41  ;;  %6970 = vmatprep.mubr.msk.bf16.mxu1 %vm8149_vm0, %v10018_v0 }
 0x26a   :  { %v6967_v43 = vpop.f32.mrf.mxu0  ;;  %6980 = vmatprep.subr.bf16.mxu1 %v10018_v0 }
 0x26c   :  { %v393_v45 = vpop.f32.mrf.mxu0 }
 0x26e   :  { %v6978_v46 = vpop.f32.mrf.mxu0 }
 0x270   :  { %6971 = vmatmul.mubr.msk.bf16.vlgmr.msra.gmra.mxu1 %vm255_vm3, %v8202_v1  ;;  %v396_v48 = vpop.f32.mrf.mxu0 }
 0x271   :  { %6981 = vmatpush3.bf16.msra.mxu1 %v8296_v47  ;;  %6982 = vmatprep.mubr.msk.bf16.mxu1 %vm8149_vm0, %v10018_v0 }
 0x272   :  { %v6979_v49 = vpop.f32.mrf.mxu0  ;;  %6992 = vmatprep.subr.bf16.mxu1 %v10018_v0 }
 0x278   :  { %6983 = vmatmul.mubr.msk.bf16.vlgmr.msra.gmra.mxu1 %vm255_vm3, %v208_v37  ;;  %v6380_v37 = vld [vmem:[%s9997_s0 + $0x10] sm:$0xf] }
 0x279   :  { %6993 = vmatpush3.bf16.msra.mxu1 %v8202_v1  ;;  %6994 = vmatprep.mubr.msk.bf16.mxu1 %vm8149_vm0, %v10018_v0 }
 0x27a   :  { %7004 = vmatprep.subr.bf16.mxu1 %v10018_v0 }
 0x280   :  { %6995 = vmatmul.mubr.msk.bf16.vlgmr.msra.gmra.mxu1 %vm65_vm1, %v8309_v50 }
 0x281   :  { %7006 = vmatprep.mubr.msk.bf16.mxu1 %vm8149_vm0, %v10018_v0 }
 0x328   :  { %v243_v53 = vpop.f32.mrf.mxu1 }
 0x329   :  { %v250_v56 = vsub.f32 %v243_v53, %v8237_v18 }
 0x32a   :  { %v6960_v54 = vpop.f32.mrf.mxu1 }
 0x32c   :  { %v246_v55 = vpop.f32.mrf.mxu1 }
 0x32d   :  { %v251_v57 = vsub.f32 %v246_v55, %v8240_v19 }
 0x32e   :  { %v6961_v58 = vpop.f32.mrf.mxu1 }
 0x32f   :  { %v453_v59 = vpack.c.bf16 %v251_v57, %v250_v56 }
 0x330   :  { %v344_v60 = vpop.f32.mrf.mxu1 }
 0x331   :  { %6989 = vmatmul.mubr.msk.bf16.vlgmr.msra.gmra.mxu0 %vm255_vm3, %v453_v59  ;;  %v345_v62 = vadd.f32 %v344_v60, %v297_v39  ;;  %v48_v39 = vadd.bf16 %v6380_v37, %v6380_v37 }
 0x332   :  { %v6972_v61 = vpop.f32.mrf.mxu1  ;;  %7000 = vmatprep.mubr.msk.bf16.mxu0 %vm8149_vm0, %v10018_v0 }
 0x333   :  { %v400_v4 = vadd.f32 %v393_v45, %v345_v62  ;;  %v8382_v61 = vcombine.low %v6380_v37, %v6381_v38 }
 0x334   :  { %v347_v63 = vpop.f32.mrf.mxu1 }
 0x335   :  { %v348_v3 = vadd.f32 %v347_v63, %v300_v42  ;;  %v8362_v42 = vcombine.low %v48_v39, %v49_v40  ;;  %10028 = vst [vmem:[#allocation3_spill] sm:$0xff] %v8382_v61 }
 0x336   :  { %v6973_v2 = vpop.f32.mrf.mxu1 }
 0x337   :  { %v401_v10 = vadd.f32 %v396_v48, %v348_v3  ;;  %10027 = vst [vmem:[#allocation2_spill] sm:$0xff] %v8362_v42 }
 0x338   :  { %v444_v5 = vpop.f32.mrf.mxu1 }
 0x339   :  { %v451_v8 = vadd.f32 %v444_v5, %v400_v4 }
 0x33a   :  { %v6984_v9 = vpop.f32.mrf.mxu1 }
 0x33c   :  { %v447_v11 = vpop.f32.mrf.mxu1 }
 0x33d   :  { %v452_v12 = vadd.f32 %v447_v11, %v401_v10 }
 0x33e   :  { %v6985_v13 = vpop.f32.mrf.mxu1 }
 0x340   :  { %v547_v16 = vpop.f32.mrf.mxu1 }
 0x342   :  { %v6996_v17 = vpop.f32.mrf.mxu1 }
 0x344   :  { %v550_v18 = vpop.f32.mrf.mxu1 }
 0x345   :  { %v554_v19 = vpack.c.bf16 %v550_v18, %v547_v16 }
 0x346   :  { %v6997_v20 = vpop.f32.mrf.mxu1 }
 0x347   :  { %6999 = vmatpush3.bf16.msra.mxu0 %v554_v19 }
 0x348   :  { %7010 = vmatprep.subr.bf16.mxu0 %v10018_v0 }
 0x34a   :  { %7001 = vmatmul.mubr.msk.bf16.vlgmr.msra.gmra.mxu0 %vm65_vm1, %v8277_v30 }
 0x34b   :  { %7012 = vmatprep.mubr.msk.bf16.mxu0 %vm8149_vm0, %v10018_v0 }
 0x3f1   :  { %v496_v21 = vpop.f32.mrf.mxu0 }
 0x3f2   :  { %v8333_v22 = vadd.f32 %v496_v21, %v451_v8 }
 0x3f3   :  { %v6990_v24 = vpop.f32.mrf.mxu0 }
 0x3f5   :  { %v499_v26 = vpop.f32.mrf.mxu0 }
 0x3f6   :  { %v8335_v27 = vadd.f32 %v499_v26, %v452_v12 }
 0x3f7   :  { %v6991_v28 = vpop.f32.mrf.mxu0 }
 0x40a   :  { %v597_v29 = vpop.f32.mrf.mxu0 }
 0x40b   :  { %v604_v33 = vsub.f32 %v597_v29, %v8231_v14 }
 0x40c   :  { %v7002_v31 = vpop.f32.mrf.mxu0 }
 0x40e   :  { %v600_v32 = vpop.f32.mrf.mxu0 }
 0x40f   :  { %v605_v34 = vsub.f32 %v600_v32, %v8234_v15 }
 0x410   :  { %v7003_v35 = vpop.f32.mrf.mxu0 }
 0x411   :  { %v606_v36 = vpack.c.bf16 %v605_v34, %v604_v33 }
 0x413   :  { %7005 = vmatpush3.bf16.msra.mxu1 %v606_v36 }
 0x414   :  { %7016 = vmatprep.subr.bf16.mxu1 %v10018_v0 }
 0x416   :  { %7007 = vmatmul.mubr.msk.bf16.vlgmr.msra.gmra.mxu1 %vm65_vm1, %v8277_v30 }
 0x417   :  { %7017 = vmatpush3.bf16.msra.mxu1 %v8249_v23  ;;  %7018 = vmatprep.mubr.msk.bf16.mxu1 %vm8149_vm0, %v10018_v0 }
 0x418   :  { %7028 = vmatprep.subr.bf16.mxu1 %v10018_v0 }
 0x41e   :  { %7019 = vmatmul.mubr.msk.bf16.vlgmr.msra.gmra.mxu1 %vm255_vm3, %v554_v19 }
 0x41f   :  { %7029 = vmatpush3.bf16.msra.mxu1 %v8261_v25  ;;  %7030 = vmatprep.mubr.msk.bf16.mxu1 %vm8149_vm0, %v10018_v0 }
 0x420   :  { %7040 = vmatprep.subr.bf16.mxu1 %v10018_v0 }
 0x426   :  { %7031 = vmatmul.mubr.msk.bf16.vlgmr.msra.gmra.mxu1 %vm255_vm3, %v606_v36 }
 0x427   :  { %7041 = vmatpush3.bf16.msra.mxu1 %v8319_v52  ;;  %7042 = vmatprep.mubr.msk.bf16.mxu1 %vm8149_vm0, %v10018_v0 }
 0x428   :  { %7052 = vmatprep.subr.bf16.mxu1 %v10018_v0 }
 0x4d6   :  { %v641_v43 = vpop.f32.mrf.mxu1 }
 0x4d7   :  { %v648_v46 = vsub.f32 %v641_v43, %v547_v16 }
 0x4d8   :  { %v7008_v44 = vpop.f32.mrf.mxu1 }
 0x4da   :  { %v644_v45 = vpop.f32.mrf.mxu1 }
 0x4db   :  { %v649_v48 = vsub.f32 %v644_v45, %v550_v18 }
 0x4dc   :  { %v7009_v49 = vpop.f32.mrf.mxu1 }
 0x4dd   :  { %v650_v51 = vpack.c.bf16 %v649_v48, %v648_v46 }
 0x4de   :  { %v731_v53 = vpop.f32.mrf.mxu1 }
 0x4df   :  { %7011 = vmatpush3.bf16.msra.mxu0 %v650_v51 }
 0x4e0   :  { %v7020_v54 = vpop.f32.mrf.mxu1  ;;  %7022 = vmatprep.subr.bf16.mxu0 %v10018_v0 }
 0x4e1   :  { %v6383_v54 = vld [vmem:[%s9997_s0 + $0x1c] sm:$0xf] }
 0x4e2   :  { %7013 = vmatmul.mubr.msk.bf16.vlgmr.msra.gmra.mxu0 %vm65_vm1, %v8277_v30  ;;  %v734_v55 = vpop.f32.mrf.mxu1 }
 0x4e3   :  { %7023 = vmatpush3.bf16.msra.mxu0 %v8284_v41  ;;  %7024 = vmatprep.mubr.msk.bf16.mxu0 %vm8149_vm0, %v10018_v0 }
 0x4e4   :  { %v7021_v56 = vpop.f32.mrf.mxu1  ;;  %7034 = vmatprep.subr.bf16.mxu0 %v10018_v0 }
 0x4e5   :  { %v51_v56 = vadd.bf16 %v6383_v54, %v6383_v54 }
 0x4e6   :  { %v816_v57 = vpop.f32.mrf.mxu1 }
 0x4e8   :  { %v7032_v58 = vpop.f32.mrf.mxu1 }
 0x4ea   :  { %7025 = vmatmul.mubr.msk.bf16.vlgmr.msra.gmra.mxu0 %vm255_vm3, %v8202_v1  ;;  %v819_v59 = vpop.f32.mrf.mxu1 }
 0x4eb   :  { %7035 = vmatpush3.bf16.msra.mxu0 %v8296_v47  ;;  %7036 = vmatprep.mubr.msk.bf16.mxu0 %vm8149_vm0, %v10018_v0 }
 0x4ec   :  { %v7033_v60 = vpop.f32.mrf.mxu1  ;;  %7046 = vmatprep.subr.bf16.mxu0 %v10018_v0 }
 0x4f2   :  { %7037 = vmatmul.mubr.msk.bf16.vlgmr.msra.gmra.mxu0 %vm255_vm3, %v650_v51 }
 0x4f3   :  { %7047 = vmatpush3.bf16.msra.mxu0 %v8202_v1  ;;  %7048 = vmatprep.mubr.msk.bf16.mxu0 %vm8149_vm0, %v10018_v0 }
 0x4f4   :  { %7058 = vmatprep.subr.bf16.mxu0 %v10018_v0 }
 0x4fa   :  { %7049 = vmatmul.mubr.msk.bf16.vlgmr.msra.gmra.mxu0 %vm65_vm1, %v8382_v61 }
 0x4fb   :  { %7060 = vmatprep.mubr.msk.bf16.mxu0 %vm8149_vm0, %v10018_v0 }
 0x5a2   :  { %v685_v62 = vpop.f32.mrf.mxu0 }
 0x5a3   :  { %v692_v3 = vsub.f32 %v685_v62, %v604_v33 }
 0x5a4   :  { %v7014_v63 = vpop.f32.mrf.mxu0 }
 0x5a6   :  { %v688_v2 = vpop.f32.mrf.mxu0 }
 0x5a7   :  { %v693_v4 = vsub.f32 %v688_v2, %v605_v34 }
 0x5a8   :  { %v7015_v5 = vpop.f32.mrf.mxu0 }
 0x5a9   :  { %v871_v8 = vpack.c.bf16 %v693_v4, %v692_v3 }
 0x5aa   :  { %v772_v9 = vpop.f32.mrf.mxu0 }
 0x5ab   :  { %7043 = vmatmul.mubr.msk.bf16.vlgmr.msra.gmra.mxu1 %vm255_vm3, %v871_v8  ;;  %v773_v11 = vadd.f32 %v772_v9, %v731_v53  ;;  %v6382_v53 = vld [vmem:[%s9997_s0 + $0x18] sm:$0xf]  ;;  %s8153_s0 = smov 96  }
 0x5ac   :  { %v7026_v10 = vpop.f32.mrf.mxu0  ;;  %7054 = vmatprep.mubr.msk.bf16.mxu1 %vm8149_vm0, %v10018_v0 }
 0x5ad   :  { %v823_v17 = vadd.f32 %v816_v57, %v773_v11 }
 0x5ae   :  { %v775_v12 = vpop.f32.mrf.mxu0 }
 0x5af   :  { %v776_v16 = vadd.f32 %v775_v12, %v734_v55  ;;  %v50_v55 = vadd.bf16 %v6382_v53, %v6382_v53 }
 0x5b0   :  { %v7027_v13 = vpop.f32.mrf.mxu0 }
 0x5b1   :  { %v824_v21 = vadd.f32 %v819_v59, %v776_v16  ;;  %v8425_v57 = vcombine.low %v50_v55, %v51_v56  ;;  %v8445_v16 = vcombine.low %v6382_v53, %v6383_v54 }
 0x5b2   :  { %v862_v18 = vpop.f32.mrf.mxu0 }
 0x5b3   :  { %v869_v19 = vadd.f32 %v862_v18, %v823_v17  ;;  %10029 = vst [vmem:[#allocation4_spill] sm:$0xff] %v8425_v57  ;;  %10030 = vst [vmem:[#allocation5_spill] sm:$0xff] %v8445_v16 }
 0x5b4   :  { %v7038_v20 = vpop.f32.mrf.mxu0 }
 0x5b6   :  { %v865_v24 = vpop.f32.mrf.mxu0 }
 0x5b7   :  { %v870_v26 = vadd.f32 %v865_v24, %v824_v21 }
 0x5b8   :  { %v7039_v28 = vpop.f32.mrf.mxu0 }
 0x5ba   :  { %v960_v29 = vpop.f32.mrf.mxu0 }
 0x5bc   :  { %v7050_v31 = vpop.f32.mrf.mxu0 }
 0x5be   :  { %v963_v32 = vpop.f32.mrf.mxu0 }
 0x5bf   :  { %v967_v33 = vpack.c.bf16 %v963_v32, %v960_v29 }
 0x5c0   :  { %v7051_v34 = vpop.f32.mrf.mxu0 }
 0x5c1   :  { %7053 = vmatpush3.bf16.msra.mxu1 %v967_v33 }
 0x5c2   :  { %7064 = vmatprep.subr.bf16.mxu1 %v10018_v0 }
 0x5c4   :  { %7055 = vmatmul.mubr.msk.bf16.vlgmr.msra.gmra.mxu1 %vm65_vm1, %v8362_v42 }
 0x5c5   :  { %7066 = vmatprep.mubr.msk.bf16.mxu1 %vm8149_vm0, %v10018_v0 }
 0x66b   :  { %v909_v35 = vpop.f32.mrf.mxu1 }
 0x66c   :  { %v8396_v36 = vadd.f32 %v909_v35, %v869_v19 }
 0x66d   :  { %v7044_v37 = vpop.f32.mrf.mxu1 }
 0x66f   :  { %v912_v38 = vpop.f32.mrf.mxu1 }
 0x670   :  { %v8398_v39 = vadd.f32 %v912_v38, %v870_v26 }
 0x671   :  { %v7045_v40 = vpop.f32.mrf.mxu1 }
 0x684   :  { %v1010_v43 = vpop.f32.mrf.mxu1 }
 0x685   :  { %v1017_v46 = vsub.f32 %v1010_v43, %v8231_v14 }
 0x686   :  { %v7056_v44 = vpop.f32.mrf.mxu1 }
 0x688   :  { %v1013_v45 = vpop.f32.mrf.mxu1 }
 0x689   :  { %v1018_v48 = vsub.f32 %v1013_v45, %v8234_v15 }
 0x68a   :  { %v7057_v49 = vpop.f32.mrf.mxu1 }
 0x68b   :  { %v1019_v51 = vpack.c.bf16 %v1018_v48, %v1017_v46 }
 0x68d   :  { %7059 = vmatpush3.bf16.msra.mxu0 %v1019_v51 }
 0x68e   :  { %7070 = vmatprep.subr.bf16.mxu0 %v10018_v0 }
 0x690   :  { %7061 = vmatmul.mubr.msk.bf16.vlgmr.msra.gmra.mxu0 %vm65_vm1, %v8362_v42 }
 0x691   :  { %7071 = vmatpush3.bf16.msra.mxu0 %v8249_v23  ;;  %7072 = vmatprep.mubr.msk.bf16.mxu0 %vm8149_vm0, %v10018_v0 }
 0x692   :  { %7082 = vmatprep.subr.bf16.mxu0 %v10018_v0 }
 0x698   :  { %7073 = vmatmul.mubr.msk.bf16.vlgmr.msra.gmra.mxu0 %vm255_vm3, %v967_v33 }
 0x699   :  { %7083 = vmatpush3.bf16.msra.mxu0 %v8261_v25  ;;  %7084 = vmatprep.mubr.msk.bf16.mxu0 %vm8149_vm0, %v10018_v0 }
 0x69a   :  { %7094 = vmatprep.subr.bf16.mxu0 %v10018_v0 }
 0x6a0   :  { %7085 = vmatmul.mubr.msk.bf16.vlgmr.msra.gmra.mxu0 %vm255_vm3, %v1019_v51 }
 0x6a1   :  { %7095 = vmatpush3.bf16.msra.mxu0 %v8319_v52  ;;  %7096 = vmatprep.mubr.msk.bf16.mxu0 %vm8149_vm0, %v10018_v0 }
 0x6a2   :  { %7106 = vmatprep.subr.bf16.mxu0 %v10018_v0 }
 0x750   :  { %v1054_v58 = vpop.f32.mrf.mxu0 }
 0x751   :  { %v1061_v62 = vsub.f32 %v1054_v58, %v960_v29 }
 0x752   :  { %v7062_v59 = vpop.f32.mrf.mxu0 }
 0x754   :  { %v1057_v60 = vpop.f32.mrf.mxu0 }
 0x755   :  { %v1062_v63 = vsub.f32 %v1057_v60, %v963_v32 }
 0x756   :  { %v7063_v2 = vpop.f32.mrf.mxu0 }
 0x757   :  { %v1063_v3 = vpack.c.bf16 %v1062_v63, %v1061_v62 }
 0x758   :  { %v1144_v4 = vpop.f32.mrf.mxu0 }
 0x759   :  { %7065 = vmatpush3.bf16.msra.mxu1 %v1063_v3 }
 0x75a   :  { %v7074_v5 = vpop.f32.mrf.mxu0  ;;  %7076 = vmatprep.subr.bf16.mxu1 %v10018_v0 }
 0x75c   :  { %7067 = vmatmul.mubr.msk.bf16.vlgmr.msra.gmra.mxu1 %vm65_vm1, %v8362_v42  ;;  %v1147_v8 = vpop.f32.mrf.mxu0 }
 0x75d   :  { %7077 = vmatpush3.bf16.msra.mxu1 %v8284_v41  ;;  %7078 = vmatprep.mubr.msk.bf16.mxu1 %vm8149_vm0, %v10018_v0 }
 0x75e   :  { %v7075_v9 = vpop.f32.mrf.mxu0  ;;  %7088 = vmatprep.subr.bf16.mxu1 %v10018_v0 }
 0x760   :  { %v1229_v10 = vpop.f32.mrf.mxu0 }
 0x762   :  { %v7086_v11 = vpop.f32.mrf.mxu0 }
 0x764   :  { %7079 = vmatmul.mubr.msk.bf16.vlgmr.msra.gmra.mxu1 %vm255_vm3, %v8202_v1  ;;  %v1232_v12 = vpop.f32.mrf.mxu0 }
 0x765   :  { %7089 = vmatpush3.bf16.msra.mxu1 %v8296_v47  ;;  %7090 = vmatprep.mubr.msk.bf16.mxu1 %vm8149_vm0, %v10018_v0 }
 0x766   :  { %v7087_v13 = vpop.f32.mrf.mxu0  ;;  %7100 = vmatprep.subr.bf16.mxu1 %v10018_v0 }
 0x76c   :  { %7091 = vmatmul.mubr.msk.bf16.vlgmr.msra.gmra.mxu1 %vm255_vm3, %v1063_v3 }
 0x76d   :  { %7101 = vmatpush3.bf16.msra.mxu1 %v8202_v1  ;;  %7102 = vmatprep.mubr.msk.bf16.mxu1 %vm8149_vm0, %v10018_v0 }
 0x76e   :  { %7112 = vmatprep.subr.bf16.mxu1 %v10018_v0 }
 0x774   :  { %7103 = vmatmul.mubr.msk.bf16.vlgmr.msra.gmra.mxu1 %vm65_vm1, %v8445_v16 }
 0x775   :  { %7114 = vmatprep.mubr.msk.bf16.mxu1 %vm8149_vm0, %v10018_v0 }
 0x81c   :  { %v1098_v17 = vpop.f32.mrf.mxu1 }
 0x81d   :  { %v1105_v20 = vsub.f32 %v1098_v17, %v1017_v46 }
 0x81e   :  { %v7068_v18 = vpop.f32.mrf.mxu1 }
 0x820   :  { %v1101_v19 = vpop.f32.mrf.mxu1 }
 0x821   :  { %v1106_v21 = vsub.f32 %v1101_v19, %v1018_v48 }
 0x822   :  { %v7069_v24 = vpop.f32.mrf.mxu1 }
 0x823   :  { %v1284_v26 = vpack.c.bf16 %v1106_v21, %v1105_v20 }
 0x824   :  { %v1185_v28 = vpop.f32.mrf.mxu1 }
 0x825   :  { %7097 = vmatmul.mubr.msk.bf16.vlgmr.msra.gmra.mxu0 %vm255_vm3, %v1284_v26  ;;  %v1186_v31 = vadd.f32 %v1185_v28, %v1144_v4 }
 0x826   :  { %v7080_v29 = vpop.f32.mrf.mxu1  ;;  %7108 = vmatprep.mubr.msk.bf16.mxu0 %vm8149_vm0, %v10018_v0 }
 0x827   :  { %v1236_v35 = vadd.f32 %v1229_v10, %v1186_v31 }
 0x828   :  { %v1188_v32 = vpop.f32.mrf.mxu1 }
 0x829   :  { %v1189_v34 = vadd.f32 %v1188_v32, %v1147_v8 }
 0x82a   :  { %v7081_v33 = vpop.f32.mrf.mxu1 }
 0x82b   :  { %v1237_v43 = vadd.f32 %v1232_v12, %v1189_v34 }
 0x82c   :  { %v1275_v37 = vpop.f32.mrf.mxu1 }
 0x82d   :  { %v1282_v38 = vadd.f32 %v1275_v37, %v1236_v35 }
 0x82e   :  { %v7092_v40 = vpop.f32.mrf.mxu1 }
 0x830   :  { %v1278_v44 = vpop.f32.mrf.mxu1 }
 0x831   :  { %v1283_v45 = vadd.f32 %v1278_v44, %v1237_v43 }
 0x832   :  { %v7093_v46 = vpop.f32.mrf.mxu1 }
 0x834   :  { %v1373_v48 = vpop.f32.mrf.mxu1 }
 0x836   :  { %v7104_v49 = vpop.f32.mrf.mxu1 }
 0x838   :  { %v1376_v51 = vpop.f32.mrf.mxu1 }
 0x839   :  { %v1380_v53 = vpack.c.bf16 %v1376_v51, %v1373_v48 }
 0x83a   :  { %v7105_v54 = vpop.f32.mrf.mxu1 }
 0x83b   :  { %7107 = vmatpush3.bf16.msra.mxu0 %v1380_v53 }
 0x83c   :  { %7118 = vmatprep.subr.bf16.mxu0 %v10018_v0 }
 0x83e   :  { %7109 = vmatmul.mubr.msk.bf16.vlgmr.msra.gmra.mxu0 %vm65_vm1, %v8425_v57 }
 0x83f   :  { %7120 = vmatprep.mubr.msk.bf16.mxu0 %vm8149_vm0, %v10018_v0 }
 0x8e5   :  { %v1322_v55 = vpop.f32.mrf.mxu0 }
 0x8e6   :  { %v8459_v56 = vadd.f32 %v1322_v55, %v1282_v38 }
 0x8e7   :  { %v7098_v58 = vpop.f32.mrf.mxu0 }
 0x8e8   :  { %10031 = vst [vmem:[#allocation6_spill] sm:$0xff] %v8459_v56 }
 0x8e9   :  { %v1325_v59 = vpop.f32.mrf.mxu0 }
 0x8ea   :  { %v8461_v60 = vadd.f32 %v1325_v59, %v1283_v45 }
 0x8eb   :  { %v7099_v62 = vpop.f32.mrf.mxu0 }
 0x8ec   :  { %10032 = vst [vmem:[#allocation7_spill] sm:$0xff] %v8461_v60 }
 0x8fe   :  { %v1423_v63 = vpop.f32.mrf.mxu0 }
 0x8ff   :  { %v1430_v4 = vsub.f32 %v1423_v63, %v8231_v14 }
 0x900   :  { %v7110_v2 = vpop.f32.mrf.mxu0 }
 0x902   :  { %v1426_v3 = vpop.f32.mrf.mxu0 }
 0x903   :  { %v1431_v5 = vsub.f32 %v1426_v3, %v8234_v15 }
 0x904   :  { %v7111_v8 = vpop.f32.mrf.mxu0 }
 0x905   :  { %v1432_v9 = vpack.c.bf16 %v1431_v5, %v1430_v4 }
 0x907   :  { %7113 = vmatpush3.bf16.msra.mxu1 %v1432_v9 }
 0x908   :  { %7124 = vmatprep.subr.bf16.mxu1 %v10018_v0 }
 0x90a   :  { %7115 = vmatmul.mubr.msk.bf16.vlgmr.msra.gmra.mxu1 %vm65_vm1, %v8425_v57 }
 0x90b   :  { %7125 = vmatpush3.bf16.msra.mxu1 %v8249_v23  ;;  %7126 = vmatprep.mubr.msk.bf16.mxu1 %vm8149_vm0, %v10018_v0 }
 0x90c   :  { %7136 = vmatprep.subr.bf16.mxu1 %v10018_v0 }
 0x912   :  { %7127 = vmatmul.mubr.msk.bf16.vlgmr.msra.gmra.mxu1 %vm255_vm3, %v1380_v53 }
 0x913   :  { %7137 = vmatpush3.bf16.msra.mxu1 %v8261_v25  ;;  %7138 = vmatprep.mubr.msk.bf16.mxu1 %vm8149_vm0, %v10018_v0 }
 0x914   :  { %7148 = vmatprep.subr.bf16.mxu1 %v10018_v0 }
 0x91a   :  { %7139 = vmatmul.mubr.msk.bf16.vlgmr.msra.gmra.mxu1 %vm255_vm3, %v1432_v9 }
 0x91b   :  { %7149 = vmatpush3.bf16.msra.mxu1 %v8319_v52  ;;  %7150 = vmatprep.mubr.msk.bf16.mxu1 %vm8149_vm0, %v10018_v0 }
 0x91c   :  { %7160 = vmatprep.subr.bf16.mxu1 %v10018_v0 }
 0x9ca   :  { %v1467_v14 = vpop.f32.mrf.mxu1 }
 0x9cb   :  { %v1474_v10 = vsub.f32 %v1467_v14, %v1373_v48 }
 0x9cc   :  { %v7116_v15 = vpop.f32.mrf.mxu1 }
 0x9ce   :  { %v1470_v23 = vpop.f32.mrf.mxu1 }
 0x9cf   :  { %v1475_v11 = vsub.f32 %v1470_v23, %v1376_v51 }
 0x9d0   :  { %v7117_v25 = vpop.f32.mrf.mxu1 }
 0x9d1   :  { %v1476_v12 = vpack.c.bf16 %v1475_v11, %v1474_v10 }
 0x9d2   :  { %v1557_v13 = vpop.f32.mrf.mxu1 }
 0x9d3   :  { %7119 = vmatpush3.bf16.msra.mxu0 %v1476_v12 }
 0x9d4   :  { %v7128_v17 = vpop.f32.mrf.mxu1  ;;  %7130 = vmatprep.subr.bf16.mxu0 %v10018_v0 }
 0x9d5   :  { %v8546_v17 = vld [vmem:[%s9999_s3 + $0x28] sm:$0xff]  }
 0x9d6   :  { %7121 = vmatmul.mubr.msk.bf16.vlgmr.msra.gmra.mxu0 %vm65_vm1, %v8425_v57  ;;  %v1560_v52 = vpop.f32.mrf.mxu1 }
 0x9d7   :  { %7131 = vmatpush3.bf16.msra.mxu0 %v8284_v41  ;;  %7132 = vmatprep.mubr.msk.bf16.mxu0 %vm8149_vm0, %v10018_v0  ;;  %v8150_v41 = vmov 1065369472  }
 0x9d8   :  { %v7129_v18 = vpop.f32.mrf.mxu1  ;;  %7142 = vmatprep.subr.bf16.mxu0 %v10018_v0 }
 0x9da   :  { %v1642_v19 = vpop.f32.mrf.mxu1 }
 0x9dc   :  { %v7140_v20 = vpop.f32.mrf.mxu1 }
 0x9de   :  { %7133 = vmatmul.mubr.msk.bf16.vlgmr.msra.gmra.mxu0 %vm255_vm3, %v8202_v1  ;;  %v1645_v21 = vpop.f32.mrf.mxu1 }
 0x9df   :  { %7143 = vmatpush3.bf16.msra.mxu0 %v8296_v47  ;;  %7144 = vmatprep.mubr.msk.bf16.mxu0 %vm8149_vm0, %v10018_v0 }
 0x9e0   :  { %v7141_v24 = vpop.f32.mrf.mxu1  ;;  %7154 = vmatprep.subr.bf16.mxu0 %v10018_v0 }
 0x9e6   :  { %7145 = vmatmul.mubr.msk.bf16.vlgmr.msra.gmra.mxu0 %vm255_vm3, %v1476_v12  ;;  %v8528_v12 = vld [vmem:[%s9999_s3 + $0x8] sm:$0xff]  }
 0x9e7   :  { %7155 = vmatpush3.bf16.msra.mxu0 %v8150_v41  ;;  %7156 = vmatprep.mubr.msk.bf16.mxu0 %vm8149_vm0, %v10018_v0 }
 0x9e8   :  { %7166 = vmatprep.subr.bf16.mxu0 %v10018_v0 }
 0x9ee   :  { %7157 = vmatmul.mubr.msk.bf16.vlgmr.msra.gmra.mxu0 %vm65_vm1, %v8215_v6 }
 0x9ef   :  { %7168 = vmatprep.mubr.msk.bf16.mxu0 %vm8149_vm0, %v10018_v0 }
 0xa96   :  { %v1511_v1 = vpop.f32.mrf.mxu0 }
 0xa97   :  { %v1518_v28 = vsub.f32 %v1511_v1, %v1430_v4 }
 0xa98   :  { %v7122_v47 = vpop.f32.mrf.mxu0 }
 0xa9a   :  { %v1514_v26 = vpop.f32.mrf.mxu0 }
 0xa9b   :  { %v1519_v29 = vsub.f32 %v1514_v26, %v1431_v5 }
 0xa9c   :  { %v7123_v31 = vpop.f32.mrf.mxu0 }
 0xa9d   :  { %v1697_v32 = vpack.c.bf16 %v1519_v29, %v1518_v28  ;;  %v8569_v28 = vld [vmem:[%s9999_s3 + $0x18] sm:$0xff]  }
 0xa9e   :  { %v1598_v33 = vpop.f32.mrf.mxu0 }
 0xa9f   :  { %7151 = vmatmul.mubr.msk.bf16.vlgmr.msra.gmra.mxu1 %vm255_vm3, %v1697_v32  ;;  %v1599_v35 = vadd.f32 %v1598_v33, %v1557_v13  ;;  %v8537_v13 = vld [vmem:[%s9999_s3] sm:$0xff]  }
 0xaa0   :  { %v7134_v34 = vpop.f32.mrf.mxu0  ;;  %7162 = vmatprep.mubr.msk.bf16.mxu1 %vm8149_vm0, %v10018_v0 }
 0xaa1   :  { %v1649_v43 = vadd.f32 %v1642_v19, %v1599_v35 }
 0xaa2   :  { %v1601_v37 = vpop.f32.mrf.mxu0 }
 0xaa3   :  { %v1602_v40 = vadd.f32 %v1601_v37, %v1560_v52  ;;  %v8555_v52 = vld [vmem:[%s9999_s3 + $0x20] sm:$0xff]  }
 0xaa4   :  { %v7135_v38 = vpop.f32.mrf.mxu0 }
 0xaa5   :  { %v1650_v48 = vadd.f32 %v1645_v21, %v1602_v40  ;;  %v8597_v38 = vld [vmem:[%s9999_s3 + $0x30] sm:$0xff]  }
 0xaa6   :  { %v1688_v44 = vpop.f32.mrf.mxu0 }
 0xaa7   :  { %v1695_v45 = vadd.f32 %v1688_v44, %v1649_v43  ;;  %v8610_v43 = vld [vmem:[%s9999_s3 + $0x48] sm:$0xff]   ;;  %v8617_v44 = vld [vmem:[%s9999_s3 + $0x40] sm:$0xff]  }
 0xaa8   :  { %v7146_v46 = vpop.f32.mrf.mxu0 }
 0xaaa   :  { %v1691_v49 = vpop.f32.mrf.mxu0 }
 0xaab   :  { %v1696_v51 = vadd.f32 %v1691_v49, %v1650_v48  ;;  %v8626_v48 = vld [vmem:[%s10000_s6 + $0x1] sm:$0xf] }
 0xaac   :  { %v7147_v53 = vpop.f32.mrf.mxu0 }
 0xaae   :  { %v1778_v54 = vpop.f32.mrf.mxu0 }
 0xab0   :  { %v7158_v55 = vpop.f32.mrf.mxu0 }
 0xab2   :  { %v1781_v58 = vpop.f32.mrf.mxu0 }
 0xab3   :  { %v8507_v59 = vpack.c.bf16 %v1781_v58, %v1778_v54 }
 0xab4   :  { %v7159_v62 = vpop.f32.mrf.mxu0 }
 0xab5   :  { %7161 = vmatpush3.bf16.msra.mxu1 %v8507_v59 }
 0xab6   :  { %7172 = vmatprep.subr.bf16.mxu1 %v10018_v0 }
 0xab8   :  { %7163 = vmatmul.mubr.msk.bf16.vlgmr.msra.gmra.mxu1 %vm65_vm1, %v8218_v7 }
 0xab9   :  { %7174 = vmatprep.mubr.msk.bf16.mxu1 %vm8149_vm0, %v10018_v0 }
 0xb5f   :  { %v1735_v63 = vpop.f32.mrf.mxu1 }
 0xb60   :  { %v8515_v2 = vadd.f32 %v1735_v63, %v1695_v45  ;;  %v2239_v45 = vlaneseq }
 0xb61   :  { %v7152_v3 = vpop.f32.mrf.mxu1 }
 0xb62   :  { %10033 = vst [vmem:[#allocation8_spill] sm:$0xff] %v8515_v2  ;;  %v8621_v46 = vshrl.u32 %v2239_v45, 7 }
 0xb63   :  { %v1738_v4 = vpop.f32.mrf.mxu1 }
 0xb64   :  { %v8517_v5 = vadd.f32 %v1738_v4, %v1696_v51  ;;  %v10005_v49 = vsub.s32 1, %v8621_v46 }
 0xb65   :  { %v7153_v8 = vpop.f32.mrf.mxu1 }
 0xb66   :  { %10034 = vst [vmem:[#allocation9_spill] sm:$0xff] %v8517_v5  ;;  %v8632_v51 = vrot.slane %v8626_v48, %v10005_v49 }
 0xb68   :  { %2262 = vrot.lane.b32.xlu1 %v8632_v51, %s8151_s23 }
 0xb78   :  { %v1820_v9 = vpop.f32.mrf.mxu1 }
 0xb79   :  { %v8519_v23 = vadd.f32 -1.0, %v1820_v9 }
 0xb7a   :  { %v7164_v14 = vpop.f32.mrf.mxu1 }
 0xb7c   :  { %v1823_v15 = vpop.f32.mrf.mxu1 }
 0xb7d   :  { %v8521_v10 = vadd.f32 -1.0, %v1823_v15 }
 0xb7e   :  { %v7165_v11 = vpop.f32.mrf.mxu1 }
 0xb7f   :  { %v1829_v25 = vpack.c.bf16 %v8521_v10, %v8519_v23 }
 0xb81   :  { %7167 = vmatpush3.bf16.msra.mxu0 %v1829_v25 }
 0xb82   :  { %7178 = vmatprep.subr.bf16.mxu0 %v10018_v0 }
 0xb84   :  { %7169 = vmatmul.mubr.msk.bf16.vlgmr.msra.gmra.mxu0 %vm65_vm1, %v8218_v7 }
 0xb85   :  { %7179 = vmatpush3.bf16.msra.mxu0 %v8528_v12  ;;  %7182 = vmatprep.mubr.msk.bf16.mxu0 %vm8149_vm0, %v10018_v0 }
 0xb86   :  { %7180 = vmatprep.subr.bf16.mxu0 %v10018_v0 }
 0xb89   :  { %7181 = vmatpush3.bf16.msra.mxu0 %v8537_v13 }
 0xb8a   :  { %7194 = vmatprep.subr.bf16.mxu0 %v10018_v0 }
 0xb8c   :  { %7183 = vmatmul.mubr.msk.bf16.vlgmr.msra.gmra.mxu0 %vm1933_vm4, %v8150_v41 }
 0xb8d   :  { %7195 = vmatpush3.bf16.msra.mxu0 %v8546_v17  ;;  %7198 = vmatprep.mubr.msk.bf16.mxu0 %vm8149_vm0, %v10018_v0 }
 0xb8e   :  { %7196 = vmatprep.subr.bf16.mxu0 %v10018_v0 }
 0xb91   :  { %7197 = vmatpush3.bf16.msra.mxu0 %v8555_v52 }
 0xb92   :  { %7210 = vmatprep.subr.bf16.mxu0 %v10018_v0 }
 0xb94   :  { %7199 = vmatmul.mubr.msk.bf16.vlgmr.msra.gmra.mxu0 %vm1933_vm4, %v1829_v25 }
 0xb95   :  { %7214 = vmatprep.mubr.msk.bf16.mxu0 %vm8149_vm0, %v10018_v0  ;;  %7211 = vmatpush3.bf16.msra.mxu0 %v8610_v43 }
 0xb96   :  { %7212 = vmatprep.subr.bf16.mxu0 %v10018_v0 }
 0xb99   :  { %7213 = vmatpush3.bf16.msra.mxu0 %v8617_v44 }
 0xb9a   :  { %7224 = vmatprep.subr.bf16.mxu0 %v10018_v0 }
 0xc44   :  { %v1864_v18 = vpop.f32.mrf.mxu0 }
 0xc45   :  { %v1871_v21 = vsub.f32 %v1864_v18, %v1778_v54 }
 0xc46   :  { %v7170_v19 = vpop.f32.mrf.mxu0 }
 0xc48   :  { %v1867_v20 = vpop.f32.mrf.mxu0 }
 0xc49   :  { %v1872_v24 = vsub.f32 %v1867_v20, %v1781_v58 }
 0xc4a   :  { %v7171_v41 = vpop.f32.mrf.mxu0 }
 0xc4b   :  { %v1873_v1 = vpack.c.bf16 %v1872_v24, %v1871_v21  ;;  %v8644_v24 = vld [vmem:[%s10000_s6] ss:$0 sm:$0xff] }
 0xc4c   :  { %v1971_v47 = vpop.f32.mrf.mxu0 }
 0xc4d   :  { %v1978_v26 = vadd.f32 %v1971_v47, %v8333_v22  ;;  %7173 = vmatpush3.bf16.msra.mxu1 %v1873_v1  ;;  %v8579_v22 = vld [vmem:[%s9999_s3 + $0x10] sm:$0xff]  }
 0xc4e   :  { %v7184_v29 = vpop.f32.mrf.mxu0  ;;  %7186 = vmatprep.subr.bf16.mxu1 %v10018_v0 }
 0xc50   :  { %7175 = vmatmul.mubr.msk.bf16.vlgmr.msra.gmra.mxu1 %vm65_vm1, %v8218_v7  ;;  %v1974_v31 = vpop.f32.mrf.mxu0 }
 0xc51   :  { %v1979_v32 = vadd.f32 %v1974_v31, %v8335_v27  ;;  %7187 = vmatpush3.bf16.msra.mxu1 %v8569_v28  ;;  %7190 = vmatprep.mubr.msk.bf16.mxu1 %vm8149_vm0, %v10018_v0  ;;  %v8588_v27 = vld [vmem:[%s9999_s3 + $0x38] sm:$0xff]  }
 0xc52   :  { %v7185_v33 = vpop.f32.mrf.mxu0  ;;  %7188 = vmatprep.subr.bf16.mxu1 %v10018_v0 }
 0xc54   :  { %v2097_v34 = vpop.f32.mrf.mxu0 }
 0xc55   :  { %7189 = vmatpush3.bf16.msra.mxu1 %v8579_v22 }
 0xc56   :  { %v7200_v35 = vpop.f32.mrf.mxu0  ;;  %7202 = vmatprep.subr.bf16.mxu1 %v10018_v0 }
 0xc58   :  { %7191 = vmatmul.mubr.msk.bf16.vlgmr.msra.gmra.mxu1 %vm1933_vm4, %v8507_v59  ;;  %v2100_v37 = vpop.f32.mrf.mxu0 }
 0xc59   :  { %7203 = vmatpush3.bf16.msra.mxu1 %v8588_v27  ;;  %7206 = vmatprep.mubr.msk.bf16.mxu1 %vm8149_vm0, %v10018_v0 }
 0xc5a   :  { %v7201_v40 = vpop.f32.mrf.mxu0  ;;  %7204 = vmatprep.subr.bf16.mxu1 %v10018_v0 }
 0xc5d   :  { %7205 = vmatpush3.bf16.msra.mxu1 %v8597_v38 }
 0xc5e   :  { %7218 = vmatprep.subr.bf16.mxu1 %v10018_v0 }
 0xc60   :  { %7207 = vmatmul.mubr.msk.bf16.vlgmr.msra.gmra.mxu1 %vm1933_vm4, %v1873_v1 }
 0xc61   :  { %7220 = vmatprep.mubr.msk.bf16.mxu1 %vm8149_vm0, %v10018_v0 }
 0xd10   :  { %v1908_v53 = vpop.f32.mrf.mxu1 }
 0xd11   :  { %v1915_v58 = vsub.f32 %v1908_v53, %v8519_v23 }
 0xd12   :  { %v7176_v54 = vpop.f32.mrf.mxu1 }
 0xd14   :  { %v1911_v55 = vpop.f32.mrf.mxu1 }
 0xd15   :  { %v1916_v59 = vsub.f32 %v1911_v55, %v8521_v10 }
 0xd16   :  { %v7177_v62 = vpop.f32.mrf.mxu1 }
 0xd17   :  { %v2169_v63 = vpack.c.bf16 %v1916_v59, %v1915_v58 }
 0xd18   :  { %v2034_v3 = vpop.f32.mrf.mxu1 }
 0xd19   :  { %v2041_v4 = vadd.f32 %v2034_v3, %v1978_v26  ;;  %7215 = vmatmul.mubr.msk.bf16.vlgmr.msra.gmra.mxu0 %vm1933_vm4, %v2169_v63 }
 0xd1a   :  { %v7192_v8 = vpop.f32.mrf.mxu1  ;;  %7226 = vmatprep.mubr.msk.bf16.mxu0 %vm8149_vm0, %v10018_v0 }
 0xd1b   :  { %v2104_v11 = vadd.f32 %v2097_v34, %v2041_v4 }
 0xd1c   :  { %v2037_v9 = vpop.f32.mrf.mxu1 }
 0xd1d   :  { %v2042_v14 = vadd.f32 %v2037_v9, %v1979_v32 }
 0xd1e   :  { %v7193_v15 = vpop.f32.mrf.mxu1 }
 0xd1f   :  { %v2105_v23 = vadd.f32 %v2100_v37, %v2042_v14  ;;  %v10006_v37 = vsub.s32 0, %v8621_v46 }
 0xd20   :  { %v2160_v25 = vpop.f32.mrf.mxu1 }
 0xd21   :  { %v2167_v18 = vadd.f32 %v2160_v25, %v2104_v11  ;;  %v8660_v40 = vrot.slane %v8626_v48, %v10006_v37  ;;  %v2263_v11 = vpop.permute.xlu1 %2262 }
 0xd22   :  { %v7208_v19 = vpop.f32.mrf.mxu1 }
 0xd24   :  { %v2163_v20 = vpop.f32.mrf.mxu1 }
 0xd25   :  { %v2168_v10 = vadd.f32 %v2163_v20, %v2105_v23 }
 0xd26   :  { %v7209_v21 = vpop.f32.mrf.mxu1 }
 0xdd9   :  { %v2224_v41 = vpop.f32.mrf.mxu0 }
 0xdda   :  { %v2231_v1 = vadd.f32 %v2224_v41, %v2167_v18 }
 0xddb   :  { %v7216_v47 = vpop.f32.mrf.mxu0 }
 0xddc   :  { %v8647_v26 = vadd.f32 %v8644_v24, %v2231_v1 }
 0xddd   :  { %v2227_v29 = vpop.f32.mrf.mxu0 }
 0xdde   :  { %7852 = vtanh.f32 %v8647_v26  ;;  %v2232_v31 = vadd.f32 %v2227_v29, %v2168_v10  ;;  %v2243_v45 = vadd.f32 %v8660_v40, %v8647_v26  ;;  %v2265_v25 = vadd.f32 %v2263_v11, %v8647_v26 }
 0xddf   :  { %v7217_v32 = vpop.f32.mrf.mxu0 }
 0xde0   :  { %v8651_v33 = vadd.f32 %v8644_v24, %v2232_v31  ;;  %v6471_v53 = vmul.f32 -1.442695, %v2243_v45  ;;  %v6473_v18 = vmul.f32 -1.442695, %v2265_v25 }
 0xde2   :  { %7854 = vtanh.f32 %v8651_v33  ;;  %v2244_v54 = vadd.f32 %v8660_v40, %v8651_v33  ;;  %v2266_v19 = vadd.f32 %v2263_v11, %v8651_v33 }
 0xde3   :  { %7856 = vpow2.f32 %v6471_v53 }
 0xde4   :  { %v6472_v55 = vmul.f32 -1.442695, %v2244_v54  ;;  %v6474_v23 = vmul.f32 -1.442695, %v2266_v19 }
 0xde6   :  { %7858 = vpow2.f32 %v6472_v55 }
 0xdeb   :  { %v7853_v34 = vpop.eup %7852 }
 0xdec   :  { %2283 = vrot.lane.b32.xlu0 %v7853_v34, %s8152_s26 }
 0xdef   :  { %v7855_v35 = vpop.eup %7854 }
 0xdf0   :  { %2285 = vrot.lane.b32.xlu0 %v7855_v35, %s8152_s26  ;;  %v7857_v58 = vpop.eup %7856  ;;  %v10004_v35 = vsub.s32 3, %v8621_v46 }
 0xdf1   :  { %v2251_v59 = vadd.f32 1.0, %v7857_v58 }
 0xdf2   :  { %v8683_v45 = vrot.slane %v8626_v48, %v10004_v35 }
 0xdf3   :  { %v7859_v62 = vpop.eup %7858  ;;  %7860 = vrcp.f32 %v2251_v59 }
 0xdf4   :  { %v2252_v63 = vadd.f32 1.0, %v7859_v62 }
 0xdf6   :  { %7862 = vrcp.f32 %v2252_v63 }
 0xdf7   :  { %7864 = vpow2.f32 %v6473_v18 }
 0xdf8   :  { %7866 = vpow2.f32 %v6474_v23 }
 0xe00   :  { %v7861_v3 = vpop.eup %7860 }
 0xe03   :  { %v7863_v9 = vpop.eup %7862 }
 0xe04   :  { %v7865_v20 = vpop.eup %7864 }
 0xe05   :  { %v2273_v10 = vadd.f32 1.0, %v7865_v20  ;;  %v7867_v21 = vpop.eup %7866 }
 0xe06   :  { %v2274_v41 = vadd.f32 1.0, %v7867_v21 }
 0xe07   :  { %7868 = vrcp.f32 %v2273_v10 }
 0xe08   :  { %7870 = vrcp.f32 %v2274_v41 }
 0xe14   :  { %v7869_v1 = vpop.eup %7868 }
 0xe15   :  { %v7871_v31 = vpop.eup %7870 }
 0xe5e   :  { %v2284_v4 = vpop.permute.xlu0 %2283 }
 0xe5f   :  { %v2289_v8 = vmul.f32 %v7861_v3, %v2284_v4 }
 0xe61   :  { %2293 = vrot.lane.b32.xlu1 %v2289_v8, %s8151_s23 }
 0xe62   :  { %v2286_v14 = vpop.permute.xlu0 %2285 }
 0xe63   :  { %v2290_v15 = vmul.f32 %v7863_v9, %v2286_v14 }
 0xe65   :  { %2295 = vrot.lane.b32.xlu0 %v2290_v15, %s8151_s23 }
 0xed3   :  { %v2294_v47 = vpop.permute.xlu1 %2293 }
 0xed4   :  { %v8670_v29 = vadd.f32 %v7869_v1, %v2294_v47 }
 0xed6   :  { %2307 = vrot.lane.b32.xlu1 %v8670_v29, %s8153_s0  ;;  %7872 = vtanh.f32 %v8670_v29 }
 0xed7   :  { %v2296_v32 = vpop.permute.xlu0 %2295 }
 0xed8   :  { %v8674_v34 = vadd.f32 %v7871_v31, %v2296_v32 }
 0xeda   :  { %2309 = vrot.lane.b32.xlu0 %v8674_v34, %s8153_s0  ;;  %7874 = vtanh.f32 %v8674_v34 }
 0xee3   :  { %v7873_v55 = vpop.eup %7872 }
 0xee7   :  { %v7875_v48 = vpop.eup %7874 }
 0xf48   :  { %v8686_v53 = vpop.permute.xlu1 %2307 }
 0xf49   :  { %v2313_v54 = vmul.f32 %v8686_v53, %v8683_v45 }
 0xf4b   :  { %2317 = vrot.lane.b32.xlu1 %v2313_v54, %s8153_s0 }
 0xf4c   :  { %v8691_v58 = vpop.permute.xlu0 %2309 }
 0xf4d   :  { %v2314_v59 = vmul.f32 %v8691_v58, %v8683_v45 }
 0xf4f   :  { %2341 = vrot.lane.b32.xlu1 %v7873_v55, %s8152_s26  ;;  %2319 = vrot.lane.b32.xlu0 %v2314_v59, %s8153_s0 }
 0xf53   :  { %2343 = vrot.lane.b32.xlu0 %v7875_v48, %s8152_s26 }
 0xfbd   :  { %v2318_v62 = vpop.permute.xlu1 %2317 }
 0xfbe   :  { %v2323_v63 = vadd.f32 %v2318_v62, %v8647_v26 }
 0xfc0   :  { %v6475_v3 = vmul.f32 -1.442695, %v2323_v63 }
 0xfc1   :  { %v2320_v4 = vpop.permute.xlu0 %2319  ;;  %v2342_v19 = vpop.permute.xlu1 %2341 }
 0xfc2   :  { %7876 = vpow2.f32 %v6475_v3  ;;  %v2324_v8 = vadd.f32 %v2320_v4, %v8651_v33 }
 0xfc4   :  { %v6476_v9 = vmul.f32 -1.442695, %v2324_v8 }
 0xfc5   :  { %v2344_v10 = vpop.permute.xlu0 %2343 }
 0xfc6   :  { %7878 = vpow2.f32 %v6476_v9 }
 0xfcf   :  { %v7877_v14 = vpop.eup %7876 }
 0xfd0   :  { %v2331_v15 = vadd.f32 1.0, %v7877_v14 }
 0xfd2   :  { %7880 = vrcp.f32 %v2331_v15 }
 0xfd3   :  { %v7879_v11 = vpop.eup %7878 }
 0xfd4   :  { %v2332_v25 = vadd.f32 1.0, %v7879_v11 }
 0xfd6   :  { %7882 = vrcp.f32 %v2332_v25 }
 0xfdf   :  { %v7881_v18 = vpop.eup %7880 }
 0xfe0   :  { %v2347_v23 = vmul.f32 %v7881_v18, %v2342_v19 }
 0xfe2   :  { %v2349_v26 = vmax.f32 %v2347_v23, 0.0  ;;  %v8735_v23 = vld [vmem:[%s10001_s4 + $0x38] sm:$0xff]  }
 0xfe3   :  { %v7883_v20 = vpop.eup %7882 }
 0xfe4   :  { %v2348_v21 = vmul.f32 %v7883_v20, %v2344_v10  ;;  %v8744_v20 = vld [vmem:[%s10001_s4 + $0x30] sm:$0xff]   ;;  %v8753_v10 = vld [vmem:[%s10001_s4 + $0x28] sm:$0xff]  }
 0xfe6   :  { %v2350_v41 = vmax.f32 %v2348_v21, 0.0  ;;  %v8760_v21 = vld [vmem:[%s10001_s4 + $0x20] sm:$0xff]  }
 0xfe8   :  { %v7764_v1 = vpack.i.bf16 %v2350_v41, %v2349_v26  ;;  %v3047_v47 = vpack.c.bf16 %v2350_v41, %v2349_v26  ;;  %v8767_v26 = vld [vmem:[%s10001_s4 + $0x58] sm:$0xff]   ;;  %v8775_v41 = vld [vmem:[%s10001_s4 + $0x50] sm:$0xff]  }
 0xfea   :  { %7765 = vrot.lane.b32.xlu1 %v7764_v1, %s8151_s23  ;;  %3049 = vrot.lane.b32.xlu0 %v3047_v47, %s8151_s23  ;;  %v8791_v47 = vld [vmem:[%s10001_s4 + $0x40] sm:$0xff]  }
 0xfee   :  { %7770 = vrot.lane.b32.xlu1 %v7764_v1, %s8151_s23  ;;  %v8784_v1 = vld [vmem:[%s10001_s4 + $0x48] sm:$0xff]  }
0x105c   :  { %v7766_v33 = vpop.permute.xlu1 %7765 }
0x105d   :  { %v7768_v31 = vunpack.i.h.bf16 %v7766_v33  ;;  %v7767_v32 = vunpack.i.l.bf16 %v7766_v33  ;;  %v8802_v33 = vld [vmem:[%s10001_s4 + $0x98] sm:$0xff]  }
0x105f   :  { %v2360_v54 = vsel %vm1933_vm4, %v7768_v31, 1.0  ;;  %v2359_v55 = vsel %vm1933_vm4, %v7767_v32, 1.0  ;;  %v8808_v31 = vld [vmem:[%s10001_s4 + $0x90] sm:$0xff]  }
0x1060   :  { %v8705_v59 = vpack.c.bf16 %v2360_v54, %v2359_v55 }
0x1062   :  { %7219 = vmatpush3.bf16.msra.mxu1 %v8705_v59  ;;  %v2445_v9 = vunpack.c.l.bf16 %v8705_v59  ;;  %v2446_v14 = vunpack.c.h.bf16 %v8705_v59 }
0x1063   :  { %7230 = vmatprep.subr.bf16.mxu1 %v10018_v0 }
0x1065   :  { %7221 = vmatmul.mubr.msk.bf16.vlgmr.msra.gmra.mxu1 %vm65_vm1, %v8215_v6 }
0x1066   :  { %7232 = vmatprep.mubr.msk.bf16.mxu1 %vm8149_vm0, %v10018_v0 }
0x1125   :  { %v8713_v48 = vpop.f32.mrf.mxu1 }
0x1127   :  { %v7222_v62 = vpop.f32.mrf.mxu1 }
0x1129   :  { %v8715_v63 = vpop.f32.mrf.mxu1 }
0x112a   :  { %v2403_v3 = vpack.c.bf16 %v8715_v63, %v8713_v48 }
0x112b   :  { %v7223_v4 = vpop.f32.mrf.mxu1 }
0x112c   :  { %7225 = vmatpush3.bf16.msra.mxu0 %v2403_v3 }
0x112d   :  { %7236 = vmatprep.subr.bf16.mxu0 %v10018_v0 }
0x112f   :  { %7227 = vmatmul.mubr.msk.bf16.vlgmr.msra.gmra.mxu0 %vm65_vm1, %v8218_v7 }
0x1130   :  { %7238 = vmatprep.mubr.msk.bf16.mxu0 %vm8149_vm0, %v10018_v0 }
0x11ef   :  { %v2438_v6 = vpop.f32.mrf.mxu0 }
0x11f0   :  { %v8726_v11 = vsub.f32 %v2438_v6, %v2445_v9  ;;  %v8836_v9 = vld [vmem:[%s10001_s4 + $0x8] sm:$0xff]  }
0x11f1   :  { %v7228_v8 = vpop.f32.mrf.mxu0 }
0x11f2   :  { %v8818_v8 = vld [vmem:[%s10001_s4 + $0x18] sm:$0xff]  }
0x11f3   :  { %v2441_v15 = vpop.f32.mrf.mxu0 }
0x11f4   :  { %v8728_v25 = vsub.f32 %v2441_v15, %v2446_v14  ;;  %v8843_v15 = vld [vmem:[%s10001_s4] sm:$0xff]  }
0x11f5   :  { %v7229_v18 = vpop.f32.mrf.mxu0 }
0x11f6   :  { %v2449_v19 = vpack.c.bf16 %v8728_v25, %v8726_v11 }
0x11f8   :  { %7231 = vmatpush3.bf16.msra.mxu1 %v2449_v19 }
0x11f9   :  { %7242 = vmatprep.subr.bf16.mxu1 %v10018_v0 }
0x11fb   :  { %7233 = vmatmul.mubr.msk.bf16.vlgmr.msra.gmra.mxu1 %vm65_vm1, %v8218_v7 }
0x11fc   :  { %7243 = vmatpush3.bf16.msra.mxu1 %v8735_v23  ;;  %7250 = vmatprep.mubr.msk.bf16.mxu1 %vm8149_vm0, %v10018_v0 }
0x11fd   :  { %7244 = vmatprep.subr.bf16.mxu1 %v10018_v0 }
0x1200   :  { %7245 = vmatpush3.bf16.msra.mxu1 %v8744_v20 }
0x1201   :  { %7246 = vmatprep.subr.bf16.mxu1 %v10018_v0 }
0x1204   :  { %7247 = vmatpush3.bf16.msra.mxu1 %v8753_v10 }
0x1205   :  { %7248 = vmatprep.subr.bf16.mxu1 %v10018_v0 }
0x1208   :  { %7249 = vmatpush3.bf16.msra.mxu1 %v8760_v21 }
0x1209   :  { %7266 = vmatprep.subr.bf16.mxu1 %v10018_v0 }
0x120b   :  { %7251 = vmatmul.mubr.msk.bf16.vlgmr.msra.gmra.mxu1 %vm2578_vm5, %v2403_v3 }
0x120c   :  { %7267 = vmatpush3.bf16.msra.mxu1 %v8767_v26  ;;  %7274 = vmatprep.mubr.msk.bf16.mxu1 %vm8149_vm0, %v10018_v0 }
0x120d   :  { %7268 = vmatprep.subr.bf16.mxu1 %v10018_v0 }
0x1210   :  { %7269 = vmatpush3.bf16.msra.mxu1 %v8775_v41 }
0x1211   :  { %7270 = vmatprep.subr.bf16.mxu1 %v10018_v0 }
0x1214   :  { %7271 = vmatpush3.bf16.msra.mxu1 %v8784_v1 }
0x1215   :  { %7272 = vmatprep.subr.bf16.mxu1 %v10018_v0 }
0x1218   :  { %7273 = vmatpush3.bf16.msra.mxu1 %v8791_v47 }
0x1219   :  { %7290 = vmatprep.subr.bf16.mxu1 %v10018_v0 }
0x121b   :  { %7275 = vmatmul.mubr.msk.bf16.vlgmr.msra.gmra.mxu1 %vm2578_vm5, %v2449_v19  ;;  %v8850_v19 = vld [vmem:[%s10001_s4 + $0x78] sm:$0xff]  }
0x121c   :  { %7298 = vmatprep.mubr.msk.bf16.mxu1 %vm8149_vm0, %v10018_v0  ;;  %7291 = vmatpush3.bf16.msra.mxu1 %v8802_v33 }
0x121d   :  { %7292 = vmatprep.subr.bf16.mxu1 %v10018_v0 }
0x1220   :  { %7293 = vmatpush3.bf16.msra.mxu1 %v8808_v31 }
0x1221   :  { %7294 = vmatprep.subr.bf16.mxu1 %v10018_v0 }
0x12bb   :  { %v2484_v32 = vpop.f32.mrf.mxu1 }
0x12bc   :  { %v2491_v62 = vsub.f32 %v2484_v32, %v8713_v48  ;;  %v8827_v48 = vld [vmem:[%s10001_s4 + $0x10] sm:$0xff]  }
0x12bd   :  { %v7234_v54 = vpop.f32.mrf.mxu1  ;;  %v8859_v32 = vld [vmem:[%s10001_s4 + $0x70] sm:$0xff]  }
0x12be   :  { %10035 = vst [vmem:[#allocation10_spill] sm:$0xff] %v8859_v32 }
0x12bf   :  { %v2487_v55 = vpop.f32.mrf.mxu1 }
0x12c0   :  { %v2492_v3 = vsub.f32 %v2487_v55, %v8715_v63  ;;  %v8868_v55 = vld [vmem:[%s10001_s4 + $0x68] sm:$0xff]  }
0x12c1   :  { %v7235_v4 = vpop.f32.mrf.mxu1  ;;  %10036 = vst [vmem:[#allocation11_spill] sm:$0xff] %v8868_v55 }
0x12c2   :  { %v2493_v6 = vpack.c.bf16 %v2492_v3, %v2491_v62  ;;  %v8875_v3 = vld [vmem:[%s10001_s4 + $0x60] sm:$0xff]  }
0x12c3   :  { %10037 = vst [vmem:[#allocation12_spill] sm:$0xff] %v8875_v3 }
0x12c4   :  { %7237 = vmatpush3.bf16.msra.mxu0 %v2493_v6 }
0x12c5   :  { %7254 = vmatprep.subr.bf16.mxu0 %v10018_v0 }
0x12c7   :  { %7239 = vmatmul.mubr.msk.bf16.vlgmr.msra.gmra.mxu0 %vm65_vm1, %v8218_v7 }
0x12c8   :  { %7255 = vmatpush3.bf16.msra.mxu0 %v8818_v8  ;;  %7262 = vmatprep.mubr.msk.bf16.mxu0 %vm8149_vm0, %v10018_v0 }
0x12c9   :  { %7256 = vmatprep.subr.bf16.mxu0 %v10018_v0 }
0x12cb   :  { %v2616_v63 = vpop.f32.mrf.mxu1 }
0x12cc   :  { %7257 = vmatpush3.bf16.msra.mxu0 %v8827_v48 }
0x12cd   :  { %v7252_v7 = vpop.f32.mrf.mxu1  ;;  %7258 = vmatprep.subr.bf16.mxu0 %v10018_v0 }
0x12ce   :  { %v8880_v7 = vpop.permute.xlu0 %3049 }
0x12cf   :  { %v2619_v14 = vpop.f32.mrf.mxu1 }
0x12d0   :  { %7259 = vmatpush3.bf16.msra.mxu0 %v8836_v9 }
0x12d1   :  { %v7253_v18 = vpop.f32.mrf.mxu1  ;;  %7260 = vmatprep.subr.bf16.mxu0 %v10018_v0 }
0x12d2   :  { %v8894_v18 = vld [vmem:[%s10001_s4 + $0x88] sm:$0xff]  }
0x12d3   :  { %7295 = vmatpush3.bf16.msra.mxu1 %v8894_v18 }
0x12d4   :  { %7261 = vmatpush3.bf16.msra.mxu0 %v8843_v15  ;;  %7296 = vmatprep.subr.bf16.mxu1 %v10018_v0 }
0x12d5   :  { %7278 = vmatprep.subr.bf16.mxu0 %v10018_v0 }
0x12d7   :  { %7263 = vmatmul.mubr.msk.bf16.vlgmr.msra.gmra.mxu0 %vm2578_vm5, %v8705_v59 }
0x12d8   :  { %7279 = vmatpush3.bf16.msra.mxu0 %v8850_v19  ;;  %7286 = vmatprep.mubr.msk.bf16.mxu0 %vm8149_vm0, %v10018_v0 }
0x12d9   :  { %7280 = vmatprep.subr.bf16.mxu0 %v10018_v0 }
0x12db   :  { %v2761_v54 = vpop.f32.mrf.mxu1 }
0x12dc   :  { %7281 = vmatpush3.bf16.msra.mxu0 %v8859_v32 }
0x12dd   :  { %v7276_v59 = vpop.f32.mrf.mxu1  ;;  %7282 = vmatprep.subr.bf16.mxu0 %v10018_v0 }
0x12df   :  { %v2764_v62 = vpop.f32.mrf.mxu1 }
0x12e0   :  { %7283 = vmatpush3.bf16.msra.mxu0 %v8868_v55 }
0x12e1   :  { %v7277_v4 = vpop.f32.mrf.mxu1  ;;  %7284 = vmatprep.subr.bf16.mxu0 %v10018_v0 }
0x12e4   :  { %7285 = vmatpush3.bf16.msra.mxu0 %v8875_v3 }
0x12e5   :  { %7302 = vmatprep.subr.bf16.mxu0 %v10018_v0 }
0x12e7   :  { %7287 = vmatmul.mubr.msk.bf16.vlgmr.msra.gmra.mxu0 %vm2578_vm5, %v2493_v6  ;;  %v8901_v6 = vld [vmem:[%s10001_s4 + $0x80] sm:$0xff]  }
0x12e8   :  { %7303 = vmatpush3.bf16.msra.mxu0 %v8880_v7  ;;  %7304 = vmatprep.mubr.msk.bf16.mxu0 %vm8149_vm0, %v10018_v0 }
0x12e9   :  { %7308 = vmatprep.subr.bf16.mxu0 %v10018_v0  ;;  %7297 = vmatpush3.bf16.msra.mxu1 %v8901_v6 }
0x12ea   :  { %7314 = vmatprep.subr.bf16.mxu1 %v10018_v0 }
0x12ef   :  { %7305 = vmatmul.mubr.msk.bf16.vlgmr.msra.gmra.mxu0 %vm65_vm1, %v8309_v50 }
0x12f0   :  { %7310 = vmatprep.mubr.msk.bf16.mxu0 %vm8149_vm0, %v10018_v0 }
0x1387   :  { %v2528_v59 = vpop.f32.mrf.mxu0 }
0x1388   :  { %v2535_v49 = vsub.f32 %v2528_v59, %v8726_v11 }
0x1389   :  { %v7240_v4 = vpop.f32.mrf.mxu0 }
0x138b   :  { %v2531_v35 = vpop.f32.mrf.mxu0 }
0x138c   :  { %v2536_v37 = vsub.f32 %v2531_v35, %v8728_v25 }
0x138d   :  { %v7241_v5 = vpop.f32.mrf.mxu0 }
0x138e   :  { %v2849_v2 = vpack.c.bf16 %v2536_v37, %v2535_v49 }
0x1390   :  { %7299 = vmatmul.mubr.msk.bf16.vlgmr.msra.gmra.mxu1 %vm2578_vm5, %v2849_v2 }
0x1391   :  { %7316 = vmatprep.mubr.msk.bf16.mxu1 %vm8149_vm0, %v10018_v0 }
0x1397   :  { %v2684_v57 = vpop.f32.mrf.mxu0 }
0x1398   :  { %v2685_v42 = vadd.f32 %v2684_v57, %v2616_v63 }
0x1399   :  { %v7264_v16 = vpop.f32.mrf.mxu0 }
0x139a   :  { %v2768_v3 = vadd.f32 %v2761_v54, %v2685_v42  ;;  %v10038_v16 = vmov 0.0   ;;  %v8921_v42 = vld [vmem:[%s10000_s6 + $0x8] ss:$0 sm:$0xff] }
0x139b   :  { %v2687_v60 = vpop.f32.mrf.mxu0 }
0x139c   :  { %v2688_v61 = vadd.f32 %v2687_v60, %v2619_v14 }
0x139d   :  { %v7265_v56 = vpop.f32.mrf.mxu0 }
0x139e   :  { %v2769_v11 = vadd.f32 %v2764_v62, %v2688_v61 }
0x13a7   :  { %v2840_v4 = vpop.f32.mrf.mxu0 }
0x13a8   :  { %v2847_v55 = vadd.f32 %v2840_v4, %v2768_v3 }
0x13a9   :  { %v7288_v32 = vpop.f32.mrf.mxu0 }
0x13ab   :  { %v2843_v59 = vpop.f32.mrf.mxu0 }
0x13ac   :  { %v2848_v35 = vadd.f32 %v2843_v59, %v2769_v11 }
0x13ad   :  { %v7289_v5 = vpop.f32.mrf.mxu0 }
0x13af   :  { %v3086_v49 = vpop.f32.mrf.mxu0 }
0x13b1   :  { %v7306_v37 = vpop.f32.mrf.mxu0 }
0x13b3   :  { %v3089_v2 = vpop.f32.mrf.mxu0 }
0x13b4   :  { %v8910_v25 = vpack.c.bf16 %v3089_v2, %v3086_v49 }
0x13b5   :  { %v7307_v0 = vpop.f32.mrf.mxu0 }
0x13b6   :  { %7309 = vmatpush3.bf16.msra.mxu0 %v8910_v25 }
0x13b7   :  { %7320 = vmatprep.subr.bf16.mxu0 %v10038_v16 }
0x13b9   :  { %7311 = vmatmul.mubr.msk.bf16.vlgmr.msra.gmra.mxu0 %vm65_vm1, %v8277_v30 }
0x13ba   :  { %7322 = vmatprep.mubr.msk.bf16.mxu0 %vm8149_vm0, %v10038_v16 }
0x1450   :  { %v2920_v61 = vpop.f32.mrf.mxu1 }
0x1451   :  { %v2927_v57 = vadd.f32 %v2920_v61, %v2847_v55  ;;  %v7771_v55 = vpop.permute.xlu1 %7770 }
0x1452   :  { %v7300_v56 = vpop.f32.mrf.mxu1  ;;  %v7772_v11 = vunpack.i.l.bf16 %v7771_v55  ;;  %v7773_v59 = vunpack.i.h.bf16 %v7771_v55 }
0x1453   :  { %v8924_v0 = vadd.f32 %v8921_v42, %v2927_v57 }
0x1454   :  { %v2923_v60 = vpop.f32.mrf.mxu1 }
0x1455   :  { %7884 = vtanh.f32 %v8924_v0  ;;  %v2928_v63 = vadd.f32 %v2923_v60, %v2848_v35 }
0x1456   :  { %v7301_v14 = vpop.f32.mrf.mxu1 }
0x1457   :  { %v8928_v32 = vadd.f32 %v8921_v42, %v2928_v63 }
0x1459   :  { %7886 = vtanh.f32 %v8928_v32 }
0x1462   :  { %v7885_v54 = vpop.eup %7884 }
0x1463   :  { %2979 = vrot.lane.b32.xlu0 %v7885_v54, %s8152_s26 }
0x1466   :  { %v7887_v62 = vpop.eup %7886 }
0x1467   :  { %2981 = vrot.lane.b32.xlu1 %v7887_v62, %s8152_s26 }
0x1479   :  { %v3128_v3 = vpop.f32.mrf.mxu0 }
0x147a   :  { %v8933_v37 = vsub.f32 %v3128_v3, %v7772_v11 }
0x147b   :  { %v7312_v4 = vpop.f32.mrf.mxu0 }
0x147d   :  { %v3131_v5 = vpop.f32.mrf.mxu0 }
0x147e   :  { %v8935_v35 = vsub.f32 %v3131_v5, %v7773_v59 }
0x147f   :  { %v7313_v61 = vpop.f32.mrf.mxu0 }
0x1480   :  { %v3147_v57 = vpack.c.bf16 %v8935_v35, %v8933_v37 }
0x1482   :  { %7315 = vmatpush3.bf16.msra.mxu1 %v3147_v57 }
0x1483   :  { %7326 = vmatprep.subr.bf16.mxu1 %v10038_v16 }
0x1485   :  { %7317 = vmatmul.mubr.msk.bf16.vlgmr.msra.gmra.mxu1 %vm65_vm1, %v8277_v30 }
0x1486   :  { %7327 = vmatpush3.bf16.msra.mxu1 %v8528_v12  ;;  %7330 = vmatprep.mubr.msk.bf16.mxu1 %vm8149_vm0, %v10038_v16 }
0x1487   :  { %7328 = vmatprep.subr.bf16.mxu1 %v10038_v16 }
0x148a   :  { %7329 = vmatpush3.bf16.msra.mxu1 %v8537_v13 }
0x148b   :  { %7342 = vmatprep.subr.bf16.mxu1 %v10038_v16 }
0x148d   :  { %7331 = vmatmul.mubr.msk.bf16.vlgmr.msra.gmra.mxu1 %vm1933_vm4, %v8880_v7 }
0x148e   :  { %7343 = vmatpush3.bf16.msra.mxu1 %v8546_v17  ;;  %7346 = vmatprep.mubr.msk.bf16.mxu1 %vm8149_vm0, %v10038_v16 }
0x148f   :  { %7344 = vmatprep.subr.bf16.mxu1 %v10038_v16 }
0x1492   :  { %7345 = vmatpush3.bf16.msra.mxu1 %v8555_v52 }
0x1493   :  { %7358 = vmatprep.subr.bf16.mxu1 %v10038_v16 }
0x1495   :  { %7347 = vmatmul.mubr.msk.bf16.vlgmr.msra.gmra.mxu1 %vm1933_vm4, %v3147_v57 }
0x1496   :  { %7359 = vmatpush3.bf16.msra.mxu1 %v8610_v43  ;;  %7362 = vmatprep.mubr.msk.bf16.mxu1 %vm8149_vm0, %v10038_v16 }
0x1497   :  { %7360 = vmatprep.subr.bf16.mxu1 %v10038_v16 }
0x149a   :  { %7361 = vmatpush3.bf16.msra.mxu1 %v8617_v44 }
0x149b   :  { %7372 = vmatprep.subr.bf16.mxu1 %v10038_v16 }
0x1545   :  { %v3182_v12 = vpop.f32.mrf.mxu1 }
0x1546   :  { %v3189_v7 = vsub.f32 %v3182_v12, %v3086_v49 }
0x1547   :  { %v7318_v13 = vpop.f32.mrf.mxu1 }
0x1549   :  { %v3185_v17 = vpop.f32.mrf.mxu1 }
0x154a   :  { %v3190_v52 = vsub.f32 %v3185_v17, %v3089_v2 }
0x154b   :  { %v7319_v56 = vpop.f32.mrf.mxu1 }
0x154c   :  { %v3191_v60 = vpack.c.bf16 %v3190_v52, %v3189_v7 }
0x154d   :  { %v3272_v63 = vpop.f32.mrf.mxu1 }
0x154e   :  { %v3279_v14 = vadd.f32 %v3272_v63, %v8396_v36  ;;  %7321 = vmatpush3.bf16.msra.mxu0 %v3191_v60  ;;  %v10039_v63 = vsub.s32 0, %v8621_v46 }
0x154f   :  { %v7332_v43 = vpop.f32.mrf.mxu1  ;;  %7334 = vmatprep.subr.bf16.mxu0 %v10038_v16 }
0x1551   :  { %7323 = vmatmul.mubr.msk.bf16.vlgmr.msra.gmra.mxu0 %vm65_vm1, %v8277_v30  ;;  %v3275_v44 = vpop.f32.mrf.mxu1 }
0x1552   :  { %v3280_v54 = vadd.f32 %v3275_v44, %v8398_v39  ;;  %7335 = vmatpush3.bf16.msra.mxu0 %v8569_v28  ;;  %7338 = vmatprep.mubr.msk.bf16.mxu0 %vm8149_vm0, %v10038_v16 }
0x1553   :  { %v7333_v49 = vpop.f32.mrf.mxu1  ;;  %7336 = vmatprep.subr.bf16.mxu0 %v10038_v16 }
0x1555   :  { %v3364_v2 = vpop.f32.mrf.mxu1 }
0x1556   :  { %7337 = vmatpush3.bf16.msra.mxu0 %v8579_v22 }
0x1557   :  { %v7348_v36 = vpop.f32.mrf.mxu1  ;;  %7350 = vmatprep.subr.bf16.mxu0 %v10038_v16 }
0x1559   :  { %7339 = vmatmul.mubr.msk.bf16.vlgmr.msra.gmra.mxu0 %vm1933_vm4, %v8910_v25  ;;  %v3367_v62 = vpop.f32.mrf.mxu1 }
0x155a   :  { %7351 = vmatpush3.bf16.msra.mxu0 %v8588_v27  ;;  %7354 = vmatprep.mubr.msk.bf16.mxu0 %vm8149_vm0, %v10038_v16 }
0x155b   :  { %v7349_v39 = vpop.f32.mrf.mxu1  ;;  %7352 = vmatprep.subr.bf16.mxu0 %v10038_v16 }
0x155e   :  { %7353 = vmatpush3.bf16.msra.mxu0 %v8597_v38 }
0x155f   :  { %7366 = vmatprep.subr.bf16.mxu0 %v10038_v16 }
0x1561   :  { %7355 = vmatmul.mubr.msk.bf16.vlgmr.msra.gmra.mxu0 %vm1933_vm4, %v3191_v60  ;;  %v8993_v60 = vld [vmem:[%s10000_s6 + $0x9] sm:$0xf] }
0x1562   :  { %7368 = vmatprep.mubr.msk.bf16.mxu0 %vm8149_vm0, %v10038_v16 }
0x1611   :  { %v3226_v28 = vpop.f32.mrf.mxu0 }
0x1612   :  { %v3233_v27 = vsub.f32 %v3226_v28, %v8933_v37 }
0x1613   :  { %v7324_v22 = vpop.f32.mrf.mxu0 }
0x1615   :  { %v3229_v25 = vpop.f32.mrf.mxu0 }
0x1616   :  { %v3234_v55 = vsub.f32 %v3229_v25, %v8935_v35 }
0x1617   :  { %v7325_v3 = vpop.f32.mrf.mxu0 }
0x1618   :  { %v3419_v4 = vpack.c.bf16 %v3234_v55, %v3233_v27 }
0x1619   :  { %v3318_v11 = vpop.f32.mrf.mxu0 }
0x161a   :  { %v3325_v59 = vadd.f32 %v3318_v11, %v3279_v14  ;;  %7363 = vmatmul.mubr.msk.bf16.vlgmr.msra.gmra.mxu1 %vm1933_vm4, %v3419_v4  ;;  %v8998_v14 = vrot.slane %v8993_v60, %v10039_v63  ;;  %v3469_v63 = vmul.f32 %v8691_v58, %v8660_v40 }
0x161b   :  { %v7340_v38 = vpop.f32.mrf.mxu0  ;;  %7374 = vmatprep.mubr.msk.bf16.mxu1 %vm8149_vm0, %v10038_v16 }
0x161c   :  { %v3371_v12 = vadd.f32 %v3364_v2, %v3325_v59  ;;  %v2940_v43 = vadd.f32 %v8998_v14, %v8928_v32  ;;  %v2939_v44 = vadd.f32 %v8998_v14, %v8924_v0  ;;  %v3484_v38 = vmul.f32 %v8686_v53, %v8632_v51 }
0x161d   :  { %v3321_v5 = vpop.f32.mrf.mxu0 }
0x161e   :  { %v3326_v61 = vadd.f32 %v3321_v5, %v3280_v54  ;;  %v6540_v54 = vmul.f32 -1.442695, %v2940_v43  ;;  %v6539_v49 = vmul.f32 -1.442695, %v2939_v44 }
0x161f   :  { %v7341_v57 = vpop.f32.mrf.mxu0 }
0x1620   :  { %v3372_v37 = vadd.f32 %v3367_v62, %v3326_v61  ;;  %7888 = vpow2.f32 %v6540_v54  ;;  %v2982_v57 = vpop.permute.xlu1 %2981 }
0x1621   :  { %v3410_v13 = vpop.f32.mrf.mxu0  ;;  %7890 = vpow2.f32 %v6539_v49 }
0x1622   :  { %v3417_v17 = vadd.f32 %v3410_v13, %v3371_v12  ;;  %v3485_v12 = vmul.f32 %v8691_v58, %v8632_v51  ;;  %v2980_v13 = vpop.permute.xlu0 %2979 }
0x1623   :  { %v7356_v7 = vpop.f32.mrf.mxu0 }
0x1625   :  { %v3413_v52 = vpop.f32.mrf.mxu0 }
0x1626   :  { %v3418_v35 = vadd.f32 %v3413_v52, %v3372_v37 }
0x1627   :  { %v7357_v56 = vpop.f32.mrf.mxu0 }
0x162d   :  { %v7889_v55 = vpop.eup %7888 }
0x162e   :  { %v7891_v3 = vpop.eup %7890  ;;  %v2948_v4 = vadd.f32 1.0, %v7889_v55 }
0x162f   :  { %v2947_v11 = vadd.f32 1.0, %v7891_v3 }
0x16da   :  { %v3457_v2 = vpop.f32.mrf.mxu1 }
0x16db   :  { %v3464_v36 = vadd.f32 %v3457_v2, %v3417_v17 }
0x16dc   :  { %v7364_v62 = vpop.f32.mrf.mxu1 }
0x16dd   :  { %v9005_v39 = vadd.f32 %v8644_v24, %v3464_v36 }
0x16de   :  { %v3460_v28 = vpop.f32.mrf.mxu1 }
0x16df   :  { %7892 = vtanh.f32 %v9005_v39  ;;  %v3465_v22 = vadd.f32 %v3460_v28, %v3418_v35  ;;  %v3468_v35 = vmul.f32 %v8686_v53, %v8660_v40 }
0x16e0   :  { %v7365_v25 = vpop.f32.mrf.mxu1 }
0x16e1   :  { %v9009_v27 = vadd.f32 %v8644_v24, %v3465_v22  ;;  %v10040_v24 = vsub.s32 1, %v8621_v46  ;;  %v3470_v56 = vadd.f32 %v3468_v35, %v9005_v39 }
0x16e3   :  { %7894 = vtanh.f32 %v9009_v27  ;;  %v9019_v61 = vrot.slane %v8993_v60, %v10040_v24  ;;  %v6554_v43 = vmul.f32 -1.442695, %v3470_v56  ;;  %v3471_v44 = vadd.f32 %v3469_v63, %v9009_v27 }
0x16e4   :  { %7896 = vrcp.f32 %v2948_v4 }
0x16e5   :  { %7898 = vrcp.f32 %v2947_v11  ;;  %v6555_v54 = vmul.f32 -1.442695, %v3471_v44 }
0x16e6   :  { %7900 = vpow2.f32 %v6554_v43 }
0x16e7   :  { %7902 = vpow2.f32 %v6555_v54 }
0x16ec   :  { %v7893_v59 = vpop.eup %7892 }
0x16ed   :  { %3514 = vrot.lane.b32.xlu0 %v7893_v59, %s8152_s26 }
0x16f0   :  { %v7895_v5 = vpop.eup %7894 }
0x16f1   :  { %3488 = vrot.lane.b32.xlu0 %v3484_v38, %s8151_s23  ;;  %3516 = vrot.lane.b32.xlu1 %v7895_v5, %s8152_s26  ;;  %v7897_v17 = vpop.eup %7896 }
0x16f2   :  { %v7899_v7 = vpop.eup %7898  ;;  %v2986_v37 = vmul.f32 %v7897_v17, %v2982_v57 }
0x16f3   :  { %v2985_v52 = vmul.f32 %v7899_v7, %v2980_v13  ;;  %v7901_v49 = vpop.eup %7900 }
0x16f4   :  { %v3478_v2 = vadd.f32 1.0, %v7901_v49  ;;  %v7903_v36 = vpop.eup %7902 }
0x16f5   :  { %2958 = vrot.lane.b32.xlu0 %v9019_v61, %s8151_s23  ;;  %3490 = vrot.lane.b32.xlu1 %v3485_v12, %s8151_s23  ;;  %v3479_v62 = vadd.f32 1.0, %v7903_v36 }
0x16f6   :  { %7904 = vrcp.f32 %v3478_v2 }
0x16f7   :  { %7906 = vrcp.f32 %v3479_v62 }
0x16f9   :  { %2991 = vrot.lane.b32.xlu0 %v2986_v37, %s8151_s23  ;;  %2989 = vrot.lane.b32.xlu1 %v2985_v52, %s8151_s23 }
0x1703   :  { %v7905_v28 = vpop.eup %7904 }
0x1704   :  { %v7907_v55 = vpop.eup %7906 }
0x175f   :  { %v3515_v22 = vpop.permute.xlu0 %3514 }
0x1760   :  { %v3520_v53 = vmul.f32 %v7905_v28, %v3515_v22 }
0x1762   :  { %3524 = vrot.lane.b32.xlu1 %v3520_v53, %s8151_s23 }
0x1763   :  { %v3489_v25 = vpop.permute.xlu0 %3488  ;;  %v3517_v58 = vpop.permute.xlu1 %3516 }
0x1764   :  { %v3521_v3 = vmul.f32 %v7907_v55, %v3517_v58  ;;  %v3494_v43 = vadd.f32 %v3489_v25, %v9005_v39 }
0x1766   :  { %3526 = vrot.lane.b32.xlu0 %v3521_v3, %s8151_s23  ;;  %v6556_v44 = vmul.f32 -1.442695, %v3494_v43 }
0x1767   :  { %v2959_v4 = vpop.permute.xlu0 %2958  ;;  %v3491_v17 = vpop.permute.xlu1 %3490 }
0x1768   :  { %v2961_v11 = vadd.f32 %v2959_v4, %v8924_v0  ;;  %v2962_v59 = vadd.f32 %v2959_v4, %v8928_v32  ;;  %v3495_v54 = vadd.f32 %v3491_v17, %v9009_v27 }
0x176a   :  { %v6541_v38 = vmul.f32 -1.442695, %v2961_v11  ;;  %v6542_v5 = vmul.f32 -1.442695, %v2962_v59  ;;  %v6557_v49 = vmul.f32 -1.442695, %v3495_v54 }
0x176b   :  { %v2990_v37 = vpop.permute.xlu1 %2989  ;;  %v2992_v35 = vpop.permute.xlu0 %2991  ;;  %v10041_v59 = vsub.s32 3, %v8621_v46 }
0x176c   :  { %7908 = vpow2.f32 %v6541_v38 }
0x176d   :  { %7910 = vpow2.f32 %v6542_v5  ;;  %v9062_v38 = vrot.slane %v8993_v60, %v10041_v59 }
0x1779   :  { %v7909_v24 = vpop.eup %7908 }
0x177a   :  { %v7911_v57 = vpop.eup %7910  ;;  %v2969_v12 = vadd.f32 1.0, %v7909_v24 }
0x177b   :  { %v2970_v13 = vadd.f32 1.0, %v7911_v57 }
0x177c   :  { %7912 = vrcp.f32 %v2969_v12 }
0x177d   :  { %7914 = vrcp.f32 %v2970_v13 }
0x177e   :  { %7916 = vpow2.f32 %v6556_v44 }
0x177f   :  { %7918 = vpow2.f32 %v6557_v49 }
0x1789   :  { %v7913_v7 = vpop.eup %7912 }
0x178a   :  { %v7915_v52 = vpop.eup %7914  ;;  %v9039_v56 = vadd.f32 %v7913_v7, %v2990_v37 }
0x178b   :  { %v9041_v63 = vadd.f32 %v7915_v52, %v2992_v35  ;;  %v7917_v2 = vpop.eup %7916 }
0x178c   :  { %3003 = vrot.lane.b32.xlu1 %v9039_v56, %s8153_s0  ;;  %v3502_v36 = vadd.f32 1.0, %v7917_v2  ;;  %v7919_v62 = vpop.eup %7918 }
0x178d   :  { %3005 = vrot.lane.b32.xlu0 %v9041_v63, %s8153_s0  ;;  %v3503_v28 = vadd.f32 1.0, %v7919_v62 }
0x178e   :  { %7920 = vrcp.f32 %v3502_v36 }
0x178f   :  { %7922 = vrcp.f32 %v3503_v28 }
0x1790   :  { %7924 = vtanh.f32 %v9039_v56 }
0x179b   :  { %v7921_v22 = vpop.eup %7920 }
0x179c   :  { %v3508_v53 = vmul.f32 %v7921_v22, %v8670_v29  ;;  %v7923_v58 = vpop.eup %7922 }
0x179d   :  { %v3509_v25 = vmul.f32 %v7923_v58, %v8674_v34  ;;  %v7925_v12 = vpop.eup %7924 }
0x17d4   :  { %v3525_v55 = vpop.permute.xlu1 %3524 }
0x17d5   :  { %v9050_v3 = vadd.f32 %v3525_v55, %v3508_v53 }
0x17d7   :  { %3534 = vrot.lane.b32.xlu1 %v9050_v3, %s8153_s0  ;;  %7926 = vtanh.f32 %v9050_v3 }
0x17d8   :  { %v3527_v4 = vpop.permute.xlu0 %3526  ;;  %7928 = vtanh.f32 %v9041_v63 }
0x17d9   :  { %v9055_v11 = vadd.f32 %v3527_v4, %v3509_v25 }
0x17db   :  { %3536 = vrot.lane.b32.xlu0 %v9055_v11, %s8153_s0  ;;  %7930 = vtanh.f32 %v9055_v11 }
0x17e4   :  { %v7927_v17 = vpop.eup %7926 }
0x17e5   :  { %v7929_v7 = vpop.eup %7928 }
0x17e8   :  { %v7931_v37 = vpop.eup %7930 }
0x17fe   :  { %v9064_v29 = vpop.permute.xlu1 %3003 }
0x17ff   :  { %v3009_v5 = vmul.f32 %v9064_v29, %v9062_v38  ;;  %v9068_v24 = vpop.permute.xlu0 %3005 }
0x1800   :  { %v3010_v34 = vmul.f32 %v9068_v24, %v9062_v38 }
0x1801   :  { %3013 = vrot.lane.b32.xlu1 %v3009_v5, %s8153_s0 }
0x1802   :  { %3015 = vrot.lane.b32.xlu0 %v3010_v34, %s8153_s0 }
0x1849   :  { %v9077_v46 = vpop.permute.xlu1 %3534 }
0x184a   :  { %v3540_v60 = vmul.f32 %v9077_v46, %v8683_v45 }
0x184c   :  { %3544 = vrot.lane.b32.xlu1 %v3540_v60, %s8153_s0 }
0x184d   :  { %v9083_v57 = vpop.permute.xlu0 %3536 }
0x184e   :  { %v3541_v13 = vmul.f32 %v9083_v57, %v8683_v45 }
0x1850   :  { %3037 = vrot.lane.b32.xlu1 %v7925_v12, %s8152_s26  ;;  %3546 = vrot.lane.b32.xlu0 %v3541_v13, %s8153_s0 }
0x1854   :  { %3568 = vrot.lane.b32.xlu1 %v7927_v17, %s8152_s26  ;;  %3039 = vrot.lane.b32.xlu0 %v7929_v7, %s8152_s26 }
0x1858   :  { %3570 = vrot.lane.b32.xlu0 %v7931_v37, %s8152_s26 }
0x1873   :  { %v3014_v52 = vpop.permute.xlu1 %3013 }
0x1874   :  { %v3016_v35 = vpop.permute.xlu0 %3015  ;;  %v3019_v43 = vadd.f32 %v3014_v52, %v8924_v0 }
0x1875   :  { %v3020_v44 = vadd.f32 %v3016_v35, %v8928_v32 }
0x1876   :  { %v6543_v54 = vmul.f32 -1.442695, %v3019_v43 }
0x1877   :  { %v6544_v49 = vmul.f32 -1.442695, %v3020_v44 }
0x1878   :  { %7932 = vpow2.f32 %v6543_v54 }
0x1879   :  { %7934 = vpow2.f32 %v6544_v49 }
0x1885   :  { %v7933_v2 = vpop.eup %7932 }
0x1886   :  { %v7935_v36 = vpop.eup %7934  ;;  %v3027_v62 = vadd.f32 1.0, %v7933_v2 }
0x1887   :  { %v3028_v28 = vadd.f32 1.0, %v7935_v36 }
0x1888   :  { %7936 = vrcp.f32 %v3027_v62 }
0x1889   :  { %7938 = vrcp.f32 %v3028_v28 }
0x1895   :  { %v7937_v32 = vpop.eup %7936 }
0x1896   :  { %v7939_v5 = vpop.eup %7938 }
0x18be   :  { %v3545_v22 = vpop.permute.xlu1 %3544 }
0x18bf   :  { %v3550_v53 = vadd.f32 %v3545_v22, %v9005_v39 }
0x18c1   :  { %v6558_v55 = vmul.f32 -1.442695, %v3550_v53 }
0x18c2   :  { %v3038_v58 = vpop.permute.xlu1 %3037  ;;  %v3547_v25 = vpop.permute.xlu0 %3546 }
0x18c3   :  { %7940 = vpow2.f32 %v6558_v55  ;;  %v3551_v0 = vadd.f32 %v3547_v25, %v9009_v27  ;;  %v3043_v4 = vmul.f32 %v7937_v32, %v3038_v58 }
0x18c5   :  { %v6559_v59 = vmul.f32 -1.442695, %v3551_v0  ;;  %v3045_v12 = vmax.f32 %v3043_v4, 0.0 }
0x18c6   :  { %v3040_v34 = vpop.permute.xlu0 %3039  ;;  %v3569_v27 = vpop.permute.xlu1 %3568 }
0x18c7   :  { %7942 = vpow2.f32 %v6559_v59  ;;  %v3044_v60 = vmul.f32 %v7939_v5, %v3040_v34 }
0x18c9   :  { %v3046_v13 = vmax.f32 %v3044_v60, 0.0 }
0x18ca   :  { %v3571_v54 = vpop.permute.xlu0 %3570 }
0x18cb   :  { %v7779_v17 = vpack.i.bf16 %v3046_v13, %v3045_v12 }
0x18cd   :  { %7780 = vrot.lane.b32.xlu0 %v7779_v17, %s8152_s26 }
0x18d0   :  { %v7941_v7 = vpop.eup %7940 }
0x18d1   :  { %v3558_v39 = vadd.f32 1.0, %v7941_v7 }
0x18d3   :  { %7944 = vrcp.f32 %v3558_v39 }
0x18d4   :  { %v7943_v37 = vpop.eup %7942 }
0x18d5   :  { %v3559_v52 = vadd.f32 1.0, %v7943_v37 }
0x18d7   :  { %7946 = vrcp.f32 %v3559_v52 }
0x18e0   :  { %v7945_v35 = vpop.eup %7944 }
0x18e1   :  { %v3574_v43 = vmul.f32 %v7945_v35, %v3569_v27 }
0x18e3   :  { %v3576_v2 = vmax.f32 %v3574_v43, 0.0 }
0x18e4   :  { %v7947_v44 = vpop.eup %7946 }
0x18e5   :  { %v3575_v49 = vmul.f32 %v7947_v44, %v3571_v54  ;;  %v10044_v44 = vld [vmem:[#allocation12_spill] sm:$0xff]  ;;  %v10045_v54 = vld [vmem:[#allocation3_spill] sm:$0xff] }
0x18e7   :  { %v3577_v36 = vmax.f32 %v3575_v49, 0.0 }
0x18e9   :  { %v7774_v62 = vpack.i.bf16 %v3577_v36, %v3576_v2  ;;  %v4111_v28 = vpack.c.bf16 %v3577_v36, %v3576_v2 }
0x18eb   :  { %7775 = vrot.lane.b32.xlu1 %v7774_v62, %s8151_s23  ;;  %7785 = vrot.lane.b32.xlu0 %v7774_v62, %s8151_s23 }
0x18ef   :  { %4113 = vrot.lane.b32.xlu1 %v4111_v28, %s8151_s23 }
0x193f   :  { %v7781_v22 = vpop.permute.xlu0 %7780 }
0x1940   :  { %v7783_v55 = vunpack.i.h.bf16 %v7781_v22  ;;  %v7782_v58 = vunpack.i.l.bf16 %v7781_v22 }
0x195d   :  { %v7776_v53 = vpop.permute.xlu1 %7775 }
0x195e   :  { %v7778_v25 = vunpack.i.h.bf16 %v7776_v53  ;;  %v7777_v0 = vunpack.i.l.bf16 %v7776_v53 }
0x1960   :  { %v3594_v32 = vsel %vm1933_vm4, %v7777_v0, %v7782_v58  ;;  %v3595_v4 = vsel %vm1933_vm4, %v7778_v25, %v7783_v55 }
0x1961   :  { %v9102_v59 = vpack.c.bf16 %v3595_v4, %v3594_v32 }
0x1963   :  { %7367 = vmatpush3.bf16.msra.mxu0 %v9102_v59  ;;  %v3681_v39 = vunpack.c.h.bf16 %v9102_v59 }
0x1964   :  { %7378 = vmatprep.subr.bf16.mxu0 %v10038_v16 }
0x1966   :  { %7369 = vmatmul.mubr.msk.bf16.vlgmr.msra.gmra.mxu0 %vm65_vm1, %v8309_v50  ;;  %v3680_v50 = vunpack.c.l.bf16 %v9102_v59 }
0x1967   :  { %7380 = vmatprep.mubr.msk.bf16.mxu0 %vm8149_vm0, %v10038_v16 }
0x1a26   :  { %v3631_v5 = vpop.f32.mrf.mxu0 }
0x1a28   :  { %v7370_v34 = vpop.f32.mrf.mxu0 }
0x1a2a   :  { %v3634_v60 = vpop.f32.mrf.mxu0 }
0x1a2b   :  { %v3638_v12 = vpack.c.bf16 %v3634_v60, %v3631_v5 }
0x1a2c   :  { %v7371_v13 = vpop.f32.mrf.mxu0 }
0x1a2d   :  { %7373 = vmatpush3.bf16.msra.mxu1 %v3638_v12 }
0x1a2e   :  { %7384 = vmatprep.subr.bf16.mxu1 %v10038_v16 }
0x1a30   :  { %7375 = vmatmul.mubr.msk.bf16.vlgmr.msra.gmra.mxu1 %vm65_vm1, %v8277_v30 }
0x1a31   :  { %7386 = vmatprep.mubr.msk.bf16.mxu1 %vm8149_vm0, %v10038_v16 }
0x1af0   :  { %v3673_v17 = vpop.f32.mrf.mxu1 }
0x1af1   :  { %v9117_v52 = vsub.f32 %v3673_v17, %v3680_v50 }
0x1af2   :  { %v7376_v7 = vpop.f32.mrf.mxu1 }
0x1af4   :  { %v3676_v37 = vpop.f32.mrf.mxu1 }
0x1af5   :  { %v9119_v35 = vsub.f32 %v3676_v37, %v3681_v39 }
0x1af6   :  { %v7377_v27 = vpop.f32.mrf.mxu1 }
0x1af7   :  { %v3684_v43 = vpack.c.bf16 %v9119_v35, %v9117_v52  ;;  %v10046_v27 = vld [vmem:[#allocation2_spill] sm:$0xff] }
0x1af9   :  { %7379 = vmatpush3.bf16.msra.mxu0 %v3684_v43 }
0x1afa   :  { %7390 = vmatprep.subr.bf16.mxu0 %v10038_v16 }
0x1afc   :  { %7381 = vmatmul.mubr.msk.bf16.vlgmr.msra.gmra.mxu0 %vm65_vm1, %v8277_v30 }
0x1afd   :  { %7391 = vmatpush3.bf16.msra.mxu0 %v8735_v23  ;;  %7398 = vmatprep.mubr.msk.bf16.mxu0 %vm8149_vm0, %v10038_v16 }
0x1afe   :  { %7392 = vmatprep.subr.bf16.mxu0 %v10038_v16 }
0x1b01   :  { %7393 = vmatpush3.bf16.msra.mxu0 %v8744_v20 }
0x1b02   :  { %7394 = vmatprep.subr.bf16.mxu0 %v10038_v16 }
0x1b05   :  { %7395 = vmatpush3.bf16.msra.mxu0 %v8753_v10 }
0x1b06   :  { %7396 = vmatprep.subr.bf16.mxu0 %v10038_v16 }
0x1b09   :  { %7397 = vmatpush3.bf16.msra.mxu0 %v8760_v21 }
0x1b0a   :  { %7414 = vmatprep.subr.bf16.mxu0 %v10038_v16 }
0x1b0c   :  { %7399 = vmatmul.mubr.msk.bf16.vlgmr.msra.gmra.mxu0 %vm2578_vm5, %v3638_v12 }
0x1b0d   :  { %7415 = vmatpush3.bf16.msra.mxu0 %v8767_v26  ;;  %7422 = vmatprep.mubr.msk.bf16.mxu0 %vm8149_vm0, %v10038_v16 }
0x1b0e   :  { %7416 = vmatprep.subr.bf16.mxu0 %v10038_v16 }
0x1b11   :  { %7417 = vmatpush3.bf16.msra.mxu0 %v8775_v41 }
0x1b12   :  { %7418 = vmatprep.subr.bf16.mxu0 %v10038_v16 }
0x1b15   :  { %7419 = vmatpush3.bf16.msra.mxu0 %v8784_v1 }
0x1b16   :  { %7420 = vmatprep.subr.bf16.mxu0 %v10038_v16 }
0x1b19   :  { %7421 = vmatpush3.bf16.msra.mxu0 %v8791_v47 }
0x1b1a   :  { %7438 = vmatprep.subr.bf16.mxu0 %v10038_v16 }
0x1b1c   :  { %7423 = vmatmul.mubr.msk.bf16.vlgmr.msra.gmra.mxu0 %vm2578_vm5, %v3684_v43 }
0x1b1d   :  { %7439 = vmatpush3.bf16.msra.mxu0 %v8802_v33  ;;  %7446 = vmatprep.mubr.msk.bf16.mxu0 %vm8149_vm0, %v10038_v16 }
0x1b1e   :  { %7440 = vmatprep.subr.bf16.mxu0 %v10038_v16 }
0x1b21   :  { %7441 = vmatpush3.bf16.msra.mxu0 %v8808_v31 }
0x1b22   :  { %7442 = vmatprep.subr.bf16.mxu0 %v10038_v16 }
0x1b25   :  { %7443 = vmatpush3.bf16.msra.mxu0 %v8894_v18 }
0x1b26   :  { %7444 = vmatprep.subr.bf16.mxu0 %v10038_v16 }
0x1b29   :  { %7445 = vmatpush3.bf16.msra.mxu0 %v8901_v6 }
0x1b2a   :  { %7462 = vmatprep.subr.bf16.mxu0 %v10038_v16 }
0x1bbc   :  { %v3719_v23 = vpop.f32.mrf.mxu0 }
0x1bbd   :  { %v3726_v21 = vsub.f32 %v3719_v23, %v3631_v5 }
0x1bbe   :  { %v7382_v20 = vpop.f32.mrf.mxu0 }
0x1bc0   :  { %v3722_v10 = vpop.f32.mrf.mxu0 }
0x1bc1   :  { %v3727_v26 = vsub.f32 %v3722_v10, %v3634_v60 }
0x1bc2   :  { %v7383_v41 = vpop.f32.mrf.mxu0 }
0x1bc3   :  { %v3728_v1 = vpack.c.bf16 %v3727_v26, %v3726_v21 }
0x1bc5   :  { %7385 = vmatpush3.bf16.msra.mxu1 %v3728_v1 }
0x1bc6   :  { %7402 = vmatprep.subr.bf16.mxu1 %v10038_v16 }
0x1bc8   :  { %7387 = vmatmul.mubr.msk.bf16.vlgmr.msra.gmra.mxu1 %vm65_vm1, %v8277_v30 }
0x1bc9   :  { %7403 = vmatpush3.bf16.msra.mxu1 %v8818_v8  ;;  %7410 = vmatprep.mubr.msk.bf16.mxu1 %vm8149_vm0, %v10038_v16  ;;  %v10042_v8 = vld [vmem:[#allocation10_spill] sm:$0xff] }
0x1bca   :  { %7404 = vmatprep.subr.bf16.mxu1 %v10038_v16 }
0x1bcc   :  { %v3809_v47 = vpop.f32.mrf.mxu0 }
0x1bcd   :  { %7405 = vmatpush3.bf16.msra.mxu1 %v8827_v48 }
0x1bce   :  { %v7400_v33 = vpop.f32.mrf.mxu0  ;;  %7406 = vmatprep.subr.bf16.mxu1 %v10038_v16 }
0x1bd0   :  { %v3812_v31 = vpop.f32.mrf.mxu0 }
0x1bd1   :  { %7407 = vmatpush3.bf16.msra.mxu1 %v8836_v9 }
0x1bd2   :  { %v7401_v18 = vpop.f32.mrf.mxu0  ;;  %7408 = vmatprep.subr.bf16.mxu1 %v10038_v16 }
0x1bd5   :  { %7409 = vmatpush3.bf16.msra.mxu1 %v8843_v15  ;;  %v10043_v15 = vld [vmem:[#allocation11_spill] sm:$0xff] }
0x1bd6   :  { %7426 = vmatprep.subr.bf16.mxu1 %v10038_v16 }
0x1bd8   :  { %7411 = vmatmul.mubr.msk.bf16.vlgmr.msra.gmra.mxu1 %vm2578_vm5, %v9102_v59 }
0x1bd9   :  { %7427 = vmatpush3.bf16.msra.mxu1 %v8850_v19  ;;  %7434 = vmatprep.mubr.msk.bf16.mxu1 %vm8149_vm0, %v10038_v16  ;;  %v9183_v19 = vpop.permute.xlu1 %4113 }
0x1bda   :  { %7428 = vmatprep.subr.bf16.mxu1 %v10038_v16 }
0x1bdc   :  { %v3897_v30 = vpop.f32.mrf.mxu0 }
0x1bdd   :  { %7429 = vmatpush3.bf16.msra.mxu1 %v10042_v8 }
0x1bde   :  { %v7424_v48 = vpop.f32.mrf.mxu0  ;;  %7430 = vmatprep.subr.bf16.mxu1 %v10038_v16 }
0x1be0   :  { %v3900_v9 = vpop.f32.mrf.mxu0 }
0x1be1   :  { %7431 = vmatpush3.bf16.msra.mxu1 %v10043_v15 }
0x1be2   :  { %v7425_v6 = vpop.f32.mrf.mxu0  ;;  %7432 = vmatprep.subr.bf16.mxu1 %v10038_v16 }
0x1be5   :  { %7433 = vmatpush3.bf16.msra.mxu1 %v10044_v44 }
0x1be6   :  { %7450 = vmatprep.subr.bf16.mxu1 %v10038_v16 }
0x1be8   :  { %7435 = vmatmul.mubr.msk.bf16.vlgmr.msra.gmra.mxu1 %vm2578_vm5, %v3728_v1 }
0x1be9   :  { %7451 = vmatpush3.bf16.msra.mxu1 %v9183_v19  ;;  %7452 = vmatprep.mubr.msk.bf16.mxu1 %vm8149_vm0, %v10038_v16 }
0x1bea   :  { %7456 = vmatprep.subr.bf16.mxu1 %v10038_v16 }
0x1bf0   :  { %7453 = vmatmul.mubr.msk.bf16.vlgmr.msra.gmra.mxu1 %vm65_vm1, %v10045_v54 }
0x1bf1   :  { %7458 = vmatprep.mubr.msk.bf16.mxu1 %vm8149_vm0, %v10038_v16 }
0x1c88   :  { %v3763_v49 = vpop.f32.mrf.mxu1 }
0x1c89   :  { %v3770_v62 = vsub.f32 %v3763_v49, %v9117_v52  ;;  %v9235_v49 = vld [vmem:[%s9999_s3 + $0x8] sm:$0xff]  }
0x1c8a   :  { %v7388_v2 = vpop.f32.mrf.mxu1 }
0x1c8b   :  { %v9244_v2 = vld [vmem:[%s9999_s3] sm:$0xff]  }
0x1c8c   :  { %v3766_v36 = vpop.f32.mrf.mxu1 }
0x1c8d   :  { %v3771_v28 = vsub.f32 %v3766_v36, %v9119_v35  ;;  %v9253_v36 = vld [vmem:[%s9999_s3 + $0x28] sm:$0xff]  }
0x1c8e   :  { %v7389_v22 = vpop.f32.mrf.mxu1 }
0x1c8f   :  { %v3952_v53 = vpack.c.bf16 %v3771_v28, %v3770_v62  ;;  %v9262_v62 = vld [vmem:[%s9999_s3 + $0x20] sm:$0xff]  }
0x1c90   :  { %v9279_v28 = vld [vmem:[%s9999_s3 + $0x40] sm:$0xff]  }
0x1c91   :  { %7447 = vmatmul.mubr.msk.bf16.vlgmr.msra.gmra.mxu0 %vm2578_vm5, %v3952_v53 }
0x1c92   :  { %7464 = vmatprep.mubr.msk.bf16.mxu0 %vm8149_vm0, %v10038_v16 }
0x1c98   :  { %v3853_v55 = vpop.f32.mrf.mxu1 }
0x1c99   :  { %v3854_v32 = vadd.f32 %v3853_v55, %v3809_v47 }
0x1c9a   :  { %v7412_v58 = vpop.f32.mrf.mxu1 }
0x1c9b   :  { %v3904_v59 = vadd.f32 %v3897_v30, %v3854_v32 }
0x1c9c   :  { %v3856_v25 = vpop.f32.mrf.mxu1 }
0x1c9d   :  { %v3857_v4 = vadd.f32 %v3856_v25, %v3812_v31  ;;  %v7786_v31 = vpop.permute.xlu0 %7785 }
0x1c9e   :  { %v7413_v0 = vpop.f32.mrf.mxu1  ;;  %v7788_v8 = vunpack.i.h.bf16 %v7786_v31  ;;  %v7787_v48 = vunpack.i.l.bf16 %v7786_v31 }
0x1c9f   :  { %v3905_v12 = vadd.f32 %v3900_v9, %v3857_v4 }
0x1ca8   :  { %v3943_v5 = vpop.f32.mrf.mxu1 }
0x1ca9   :  { %v3950_v34 = vadd.f32 %v3943_v5, %v3904_v59  ;;  %v10047_v59 = vld [vmem:[#allocation6_spill] sm:$0xff] }
0x1caa   :  { %v7436_v60 = vpop.f32.mrf.mxu1 }
0x1cac   :  { %v3946_v13 = vpop.f32.mrf.mxu1 }
0x1cad   :  { %v3951_v17 = vadd.f32 %v3946_v13, %v3905_v12  ;;  %v10048_v12 = vld [vmem:[#allocation7_spill] sm:$0xff] }
0x1cae   :  { %v7437_v7 = vpop.f32.mrf.mxu1 }
0x1cb0   :  { %v9199_v50 = vpop.f32.mrf.mxu1 }
0x1cb2   :  { %v7454_v39 = vpop.f32.mrf.mxu1 }
0x1cb3   :  { %v9302_v39 = vld [vmem:[%s9999_s3 + $0x10] sm:$0xff]  }
0x1cb4   :  { %v9201_v37 = vpop.f32.mrf.mxu1 }
0x1cb5   :  { %v9205_v52 = vpack.c.bf16 %v9201_v37, %v9199_v50 }
0x1cb6   :  { %v7455_v35 = vpop.f32.mrf.mxu1 }
0x1cb7   :  { %7457 = vmatpush3.bf16.msra.mxu1 %v9205_v52 }
0x1cb8   :  { %7468 = vmatprep.subr.bf16.mxu1 %v10038_v16 }
0x1cba   :  { %7459 = vmatmul.mubr.msk.bf16.vlgmr.msra.gmra.mxu1 %vm65_vm1, %v10046_v27 }
0x1cbb   :  { %7470 = vmatprep.mubr.msk.bf16.mxu1 %vm8149_vm0, %v10038_v16 }
0x1d51   :  { %v3990_v43 = vpop.f32.mrf.mxu0 }
0x1d52   :  { %v3997_v23 = vadd.f32 %v3990_v43, %v3950_v34  ;;  %v9311_v43 = vld [vmem:[%s9999_s3 + $0x38] sm:$0xff]  }
0x1d53   :  { %v7448_v20 = vpop.f32.mrf.mxu0 }
0x1d54   :  { %v9214_v10 = vadd.f32 %v8921_v42, %v3997_v23  ;;  %v9320_v20 = vld [vmem:[%s9999_s3 + $0x30] sm:$0xff]  }
0x1d55   :  { %v3993_v21 = vpop.f32.mrf.mxu0 }
0x1d56   :  { %7948 = vtanh.f32 %v9214_v10  ;;  %v3998_v26 = vadd.f32 %v3993_v21, %v3951_v17  ;;  %v9293_v17 = vld [vmem:[%s9999_s3 + $0x18] sm:$0xff]  }
0x1d57   :  { %v7449_v41 = vpop.f32.mrf.mxu0 }
0x1d58   :  { %v9218_v1 = vadd.f32 %v8921_v42, %v3998_v26 }
0x1d5a   :  { %7950 = vtanh.f32 %v9218_v1 }
0x1d63   :  { %v7949_v47 = vpop.eup %7948 }
0x1d64   :  { %4047 = vrot.lane.b32.xlu1 %v7949_v47, %s8152_s26 }
0x1d67   :  { %v7951_v33 = vpop.eup %7950 }
0x1d68   :  { %4049 = vrot.lane.b32.xlu0 %v7951_v33, %s8152_s26 }
0x1d7a   :  { %v4192_v18 = vpop.f32.mrf.mxu1 }
0x1d7b   :  { %v9223_v15 = vsub.f32 %v4192_v18, %v7787_v48 }
0x1d7c   :  { %v7460_v30 = vpop.f32.mrf.mxu1 }
0x1d7e   :  { %v4195_v9 = vpop.f32.mrf.mxu1 }
0x1d7f   :  { %v9225_v6 = vsub.f32 %v4195_v9, %v7788_v8 }
0x1d80   :  { %v7461_v42 = vpop.f32.mrf.mxu1 }
0x1d81   :  { %v4211_v44 = vpack.c.bf16 %v9225_v6, %v9223_v15 }
0x1d83   :  { %7463 = vmatpush3.bf16.msra.mxu0 %v4211_v44 }
0x1d84   :  { %7474 = vmatprep.subr.bf16.mxu0 %v10038_v16 }
0x1d86   :  { %7465 = vmatmul.mubr.msk.bf16.vlgmr.msra.gmra.mxu0 %vm65_vm1, %v10046_v27 }
0x1d87   :  { %7475 = vmatpush3.bf16.msra.mxu0 %v9235_v49  ;;  %7478 = vmatprep.mubr.msk.bf16.mxu0 %vm8149_vm0, %v10038_v16 }
0x1d88   :  { %7476 = vmatprep.subr.bf16.mxu0 %v10038_v16 }
0x1d8b   :  { %7477 = vmatpush3.bf16.msra.mxu0 %v9244_v2 }
0x1d8c   :  { %7490 = vmatprep.subr.bf16.mxu0 %v10038_v16 }
0x1d8e   :  { %7479 = vmatmul.mubr.msk.bf16.vlgmr.msra.gmra.mxu0 %vm1933_vm4, %v9183_v19  ;;  %v9270_v19 = vld [vmem:[%s9999_s3 + $0x48] sm:$0xff]  }
0x1d8f   :  { %7491 = vmatpush3.bf16.msra.mxu0 %v9253_v36  ;;  %7494 = vmatprep.mubr.msk.bf16.mxu0 %vm8149_vm0, %v10038_v16 }
0x1d90   :  { %7492 = vmatprep.subr.bf16.mxu0 %v10038_v16 }
0x1d93   :  { %7493 = vmatpush3.bf16.msra.mxu0 %v9262_v62 }
0x1d94   :  { %7506 = vmatprep.subr.bf16.mxu0 %v10038_v16 }
0x1d96   :  { %7495 = vmatmul.mubr.msk.bf16.vlgmr.msra.gmra.mxu0 %vm1933_vm4, %v4211_v44 }
0x1d97   :  { %7507 = vmatpush3.bf16.msra.mxu0 %v9270_v19  ;;  %7510 = vmatprep.mubr.msk.bf16.mxu0 %vm8149_vm0, %v10038_v16 }
0x1d98   :  { %7508 = vmatprep.subr.bf16.mxu0 %v10038_v16 }
0x1d9b   :  { %7509 = vmatpush3.bf16.msra.mxu0 %v9279_v28 }
0x1d9c   :  { %7520 = vmatprep.subr.bf16.mxu0 %v10038_v16 }
0x1e46   :  { %v4246_v22 = vpop.f32.mrf.mxu0 }
0x1e47   :  { %v4253_v58 = vsub.f32 %v4246_v22, %v9199_v50 }
0x1e48   :  { %v7466_v53 = vpop.f32.mrf.mxu0 }
0x1e4a   :  { %v4249_v55 = vpop.f32.mrf.mxu0 }
0x1e4b   :  { %v4254_v25 = vsub.f32 %v4249_v55, %v9201_v37 }
0x1e4c   :  { %v7467_v0 = vpop.f32.mrf.mxu0 }
0x1e4d   :  { %v4255_v32 = vpack.c.bf16 %v4254_v25, %v4253_v58  ;;  %v4001_v0 = vmul.f32 %v9064_v29, %v8998_v14 }
0x1e4e   :  { %v4336_v4 = vpop.f32.mrf.mxu0 }
0x1e4f   :  { %v4343_v5 = vadd.f32 %v4336_v4, %v10047_v59  ;;  %7469 = vmatpush3.bf16.msra.mxu1 %v4255_v32  ;;  %v4002_v4 = vmul.f32 %v9068_v24, %v8998_v14 }
0x1e50   :  { %v7480_v34 = vpop.f32.mrf.mxu0  ;;  %7482 = vmatprep.subr.bf16.mxu1 %v10038_v16 }
0x1e52   :  { %7471 = vmatmul.mubr.msk.bf16.vlgmr.msra.gmra.mxu1 %vm65_vm1, %v10046_v27  ;;  %v4339_v60 = vpop.f32.mrf.mxu0 }
0x1e53   :  { %v4344_v13 = vadd.f32 %v4339_v60, %v10048_v12  ;;  %7483 = vmatpush3.bf16.msra.mxu1 %v9293_v17  ;;  %7486 = vmatprep.mubr.msk.bf16.mxu1 %vm8149_vm0, %v10038_v16 }
0x1e54   :  { %v7481_v7 = vpop.f32.mrf.mxu0  ;;  %7484 = vmatprep.subr.bf16.mxu1 %v10038_v16 }
0x1e55   :  { %v9341_v7 = vld [vmem:[%s10000_s6] ss:$0 sm:$0xff] }
0x1e56   :  { %v4428_v50 = vpop.f32.mrf.mxu0 }
0x1e57   :  { %7485 = vmatpush3.bf16.msra.mxu1 %v9302_v39 }
0x1e58   :  { %v7496_v37 = vpop.f32.mrf.mxu0  ;;  %7498 = vmatprep.subr.bf16.mxu1 %v10038_v16 }
0x1e5a   :  { %7487 = vmatmul.mubr.msk.bf16.vlgmr.msra.gmra.mxu1 %vm1933_vm4, %v9205_v52  ;;  %v4431_v35 = vpop.f32.mrf.mxu0 }
0x1e5b   :  { %7499 = vmatpush3.bf16.msra.mxu1 %v9311_v43  ;;  %7502 = vmatprep.mubr.msk.bf16.mxu1 %vm8149_vm0, %v10038_v16 }
0x1e5c   :  { %v7497_v23 = vpop.f32.mrf.mxu0  ;;  %7500 = vmatprep.subr.bf16.mxu1 %v10038_v16 }
0x1e5f   :  { %7501 = vmatpush3.bf16.msra.mxu1 %v9320_v20 }
0x1e60   :  { %7514 = vmatprep.subr.bf16.mxu1 %v10038_v16 }
0x1e62   :  { %7503 = vmatmul.mubr.msk.bf16.vlgmr.msra.gmra.mxu1 %vm1933_vm4, %v4255_v32  ;;  %v4003_v32 = vadd.f32 %v4001_v0, %v9214_v10 }
0x1e63   :  { %7516 = vmatprep.mubr.msk.bf16.mxu1 %vm8149_vm0, %v10038_v16 }
0x1e64   :  { %v6569_v59 = vmul.f32 -1.442695, %v4003_v32 }
0x1e66   :  { %7952 = vpow2.f32 %v6569_v59 }
0x1f12   :  { %v4290_v52 = vpop.f32.mrf.mxu1 }
0x1f13   :  { %v4297_v41 = vsub.f32 %v4290_v52, %v9223_v15 }
0x1f14   :  { %v7472_v21 = vpop.f32.mrf.mxu1 }
0x1f15   :  { %v7953_v21 = vpop.eup %7952 }
0x1f16   :  { %v4293_v26 = vpop.f32.mrf.mxu1 }
0x1f17   :  { %v4298_v47 = vsub.f32 %v4293_v26, %v9225_v6  ;;  %v4011_v26 = vadd.f32 1.0, %v7953_v21 }
0x1f18   :  { %v7473_v33 = vpop.f32.mrf.mxu1 }
0x1f19   :  { %v4483_v31 = vpack.c.bf16 %v4298_v47, %v4297_v41 }
0x1f1a   :  { %v4382_v18 = vpop.f32.mrf.mxu1 }
0x1f1b   :  { %v4389_v30 = vadd.f32 %v4382_v18, %v4343_v5  ;;  %7511 = vmatmul.mubr.msk.bf16.vlgmr.msra.gmra.mxu0 %vm1933_vm4, %v4483_v31  ;;  %v4004_v5 = vadd.f32 %v4002_v4, %v9218_v1  ;;  %v4017_v31 = vmul.f32 %v9064_v29, %v9019_v61  ;;  %v4549_v29 = vmul.f32 %v9083_v57, %v8632_v51 }
0x1f1c   :  { %v7488_v8 = vpop.f32.mrf.mxu1  ;;  %7522 = vmatprep.mubr.msk.bf16.mxu0 %vm8149_vm0, %v10038_v16 }
0x1f1d   :  { %v4435_v44 = vadd.f32 %v4428_v50, %v4389_v30  ;;  %v6570_v34 = vmul.f32 -1.442695, %v4004_v5  ;;  %v4548_v30 = vmul.f32 %v9077_v46, %v8632_v51  ;;  %v4018_v8 = vmul.f32 %v9068_v24, %v9019_v61 }
0x1f1e   :  { %v4385_v48 = vpop.f32.mrf.mxu1  ;;  %v4532_v24 = vmul.f32 %v9077_v46, %v8660_v40 }
0x1f1f   :  { %v4390_v9 = vadd.f32 %v4385_v48, %v4344_v13  ;;  %7954 = vpow2.f32 %v6570_v34  ;;  %v4048_v48 = vpop.permute.xlu1 %4047 }
0x1f20   :  { %v7489_v42 = vpop.f32.mrf.mxu1 }
0x1f21   :  { %v4436_v15 = vadd.f32 %v4431_v35, %v4390_v9 }
0x1f22   :  { %v4474_v22 = vpop.f32.mrf.mxu1 }
0x1f23   :  { %v4481_v53 = vadd.f32 %v4474_v22, %v4435_v44  ;;  %v4050_v44 = vpop.permute.xlu0 %4049 }
0x1f24   :  { %v7504_v55 = vpop.f32.mrf.mxu1 }
0x1f26   :  { %v4477_v58 = vpop.f32.mrf.mxu1 }
0x1f27   :  { %v4482_v6 = vadd.f32 %v4477_v58, %v4436_v15  ;;  %v4533_v15 = vmul.f32 %v9083_v57, %v8660_v40 }
0x1f28   :  { %v7505_v25 = vpop.f32.mrf.mxu1 }
0x1f2c   :  { %v7955_v41 = vpop.eup %7954 }
0x1f2d   :  { %v4012_v47 = vadd.f32 1.0, %v7955_v41 }
0x1fdb   :  { %v4521_v60 = vpop.f32.mrf.mxu0 }
0x1fdc   :  { %v4528_v12 = vadd.f32 %v4521_v60, %v4481_v53 }
0x1fdd   :  { %v7512_v13 = vpop.f32.mrf.mxu0 }
0x1fde   :  { %v9344_v50 = vadd.f32 %v9341_v7, %v4528_v12 }
0x1fdf   :  { %v4524_v37 = vpop.f32.mrf.mxu0 }
0x1fe0   :  { %7956 = vtanh.f32 %v9344_v50  ;;  %v4529_v35 = vadd.f32 %v4524_v37, %v4482_v6  ;;  %v4534_v55 = vadd.f32 %v4532_v24, %v9344_v50 }
0x1fe1   :  { %v7513_v23 = vpop.f32.mrf.mxu0 }
0x1fe2   :  { %v9348_v52 = vadd.f32 %v9341_v7, %v4529_v35  ;;  %v6584_v58 = vmul.f32 -1.442695, %v4534_v55 }
0x1fe4   :  { %7958 = vtanh.f32 %v9348_v52  ;;  %v4535_v6 = vadd.f32 %v4533_v15, %v9348_v52 }
0x1fe5   :  { %7960 = vrcp.f32 %v4011_v26 }
0x1fe6   :  { %7962 = vrcp.f32 %v4012_v47  ;;  %v6585_v25 = vmul.f32 -1.442695, %v4535_v6 }
0x1fe7   :  { %7964 = vpow2.f32 %v6584_v58 }
0x1fe8   :  { %7966 = vpow2.f32 %v6585_v25 }
0x1fed   :  { %v7957_v33 = vpop.eup %7956 }
0x1fee   :  { %4578 = vrot.lane.b32.xlu1 %v7957_v33, %s8152_s26 }
0x1ff1   :  { %v7959_v18 = vpop.eup %7958 }
0x1ff2   :  { %4021 = vrot.lane.b32.xlu1 %v4017_v31, %s8151_s23  ;;  %4580 = vrot.lane.b32.xlu0 %v7959_v18, %s8152_s26  ;;  %v7961_v9 = vpop.eup %7960 }
0x1ff3   :  { %v4053_v42 = vmul.f32 %v7961_v9, %v4048_v48  ;;  %v7963_v22 = vpop.eup %7962 }
0x1ff4   :  { %v4054_v53 = vmul.f32 %v7963_v22, %v4050_v44  ;;  %v7965_v0 = vpop.eup %7964 }
0x1ff5   :  { %v4542_v32 = vadd.f32 1.0, %v7965_v0  ;;  %v7967_v4 = vpop.eup %7966 }
0x1ff6   :  { %4552 = vrot.lane.b32.xlu1 %v4548_v30, %s8151_s23  ;;  %4023 = vrot.lane.b32.xlu0 %v4018_v8, %s8151_s23  ;;  %v4543_v59 = vadd.f32 1.0, %v7967_v4 }
0x1ff7   :  { %7968 = vrcp.f32 %v4542_v32 }
0x1ff8   :  { %7970 = vrcp.f32 %v4543_v59 }
0x1ffa   :  { %4057 = vrot.lane.b32.xlu1 %v4053_v42, %s8151_s23  ;;  %4554 = vrot.lane.b32.xlu0 %v4549_v29, %s8151_s23 }
0x1ffe   :  { %4059 = vrot.lane.b32.xlu0 %v4054_v53, %s8151_s23 }
0x2004   :  { %v7969_v5 = vpop.eup %7968 }
0x2005   :  { %v7971_v12 = vpop.eup %7970 }
0x2060   :  { %v4579_v34 = vpop.permute.xlu1 %4578 }
0x2061   :  { %v4584_v46 = vmul.f32 %v7969_v5, %v4579_v34 }
0x2063   :  { %4588 = vrot.lane.b32.xlu1 %v4584_v46, %s8151_s23 }
0x2064   :  { %v4022_v60 = vpop.permute.xlu1 %4021  ;;  %v4581_v13 = vpop.permute.xlu0 %4580 }
0x2065   :  { %v4027_v57 = vadd.f32 %v4022_v60, %v9214_v10  ;;  %v4585_v37 = vmul.f32 %v7971_v12, %v4581_v13 }
0x2067   :  { %v6571_v35 = vmul.f32 -1.442695, %v4027_v57  ;;  %4590 = vrot.lane.b32.xlu0 %v4585_v37, %s8151_s23 }
0x2068   :  { %v4024_v23 = vpop.permute.xlu0 %4023  ;;  %v4553_v18 = vpop.permute.xlu1 %4552 }
0x2069   :  { %7972 = vpow2.f32 %v6571_v35  ;;  %v4028_v21 = vadd.f32 %v4024_v23, %v9218_v1  ;;  %v4558_v24 = vadd.f32 %v4553_v18, %v9344_v50 }
0x206b   :  { %v6572_v26 = vmul.f32 -1.442695, %v4028_v21  ;;  %v6586_v55 = vmul.f32 -1.442695, %v4558_v24 }
0x206c   :  { %v4555_v48 = vpop.permute.xlu0 %4554  ;;  %v4058_v9 = vpop.permute.xlu1 %4057 }
0x206d   :  { %7974 = vpow2.f32 %v6572_v26 }
0x2070   :  { %v4060_v22 = vpop.permute.xlu0 %4059 }
0x2076   :  { %v7973_v41 = vpop.eup %7972 }
0x2077   :  { %v4035_v47 = vadd.f32 1.0, %v7973_v41 }
0x2079   :  { %7976 = vrcp.f32 %v4035_v47 }
0x207a   :  { %v7975_v33 = vpop.eup %7974 }
0x207b   :  { %v4036_v31 = vadd.f32 1.0, %v7975_v33 }
0x207d   :  { %7978 = vrcp.f32 %v4036_v31 }
0x207e   :  { %7980 = vpow2.f32 %v6586_v55 }
0x2086   :  { %v7977_v30 = vpop.eup %7976 }
0x2087   :  { %v4041_v8 = vmul.f32 %v7977_v30, %v9039_v56  ;;  %v4559_v56 = vadd.f32 %v4555_v48, %v9348_v52 }
0x2089   :  { %v9378_v42 = vadd.f32 %v4058_v9, %v4041_v8  ;;  %v6587_v15 = vmul.f32 -1.442695, %v4559_v56 }
0x208a   :  { %v7979_v29 = vpop.eup %7978 }
0x208b   :  { %4067 = vrot.lane.b32.xlu1 %v9378_v42, %s8153_s0  ;;  %v4042_v44 = vmul.f32 %v7979_v29, %v9041_v63  ;;  %7982 = vpow2.f32 %v6587_v15  ;;  %v7981_v58 = vpop.eup %7980 }
0x208c   :  { %v4566_v6 = vadd.f32 1.0, %v7981_v58 }
0x208d   :  { %v9383_v53 = vadd.f32 %v4060_v22, %v4042_v44 }
0x208e   :  { %7984 = vrcp.f32 %v4566_v6 }
0x208f   :  { %4069 = vrot.lane.b32.xlu0 %v9383_v53, %s8153_s0 }
0x2098   :  { %v7983_v25 = vpop.eup %7982 }
0x2099   :  { %v4567_v0 = vadd.f32 1.0, %v7983_v25 }
0x209b   :  { %7986 = vrcp.f32 %v4567_v0  ;;  %v7985_v63 = vpop.eup %7984 }
0x209c   :  { %v4572_v32 = vmul.f32 %v7985_v63, %v9050_v3  ;;  %7988 = vtanh.f32 %v9378_v42 }
0x20a8   :  { %v7987_v59 = vpop.eup %7986 }
0x20a9   :  { %v4573_v34 = vmul.f32 %v7987_v59, %v9055_v11  ;;  %v7989_v23 = vpop.eup %7988 }
0x20d5   :  { %v4589_v4 = vpop.permute.xlu1 %4588 }
0x20d6   :  { %v9390_v5 = vadd.f32 %v4589_v4, %v4572_v32 }
0x20d8   :  { %4598 = vrot.lane.b32.xlu1 %v9390_v5, %s8153_s0  ;;  %7990 = vtanh.f32 %v9390_v5 }
0x20d9   :  { %v4591_v46 = vpop.permute.xlu0 %4590  ;;  %7992 = vtanh.f32 %v9383_v53 }
0x20da   :  { %v9395_v60 = vadd.f32 %v4591_v46, %v4573_v34 }
0x20dc   :  { %4600 = vrot.lane.b32.xlu0 %v9395_v60, %s8153_s0  ;;  %7994 = vtanh.f32 %v9395_v60 }
0x20e5   :  { %v7991_v26 = vpop.eup %7990 }
0x20e6   :  { %v7993_v41 = vpop.eup %7992 }
0x20e9   :  { %v7995_v47 = vpop.eup %7994 }
0x20fd   :  { %v9399_v12 = vpop.permute.xlu1 %4067 }
0x20fe   :  { %v4073_v3 = vmul.f32 %v9399_v12, %v9062_v38 }
0x2100   :  { %4077 = vrot.lane.b32.xlu1 %v4073_v3, %s8153_s0 }
0x2101   :  { %v9404_v57 = vpop.permute.xlu0 %4069 }
0x2102   :  { %v4074_v13 = vmul.f32 %v9404_v57, %v9062_v38 }
0x2104   :  { %4079 = vrot.lane.b32.xlu0 %v4074_v13, %s8153_s0 }
0x214a   :  { %v9412_v11 = vpop.permute.xlu1 %4598 }
0x214b   :  { %v4604_v37 = vmul.f32 %v9412_v11, %v8683_v45 }
0x214d   :  { %4608 = vrot.lane.b32.xlu1 %v4604_v37, %s8153_s0 }
0x214e   :  { %v9418_v35 = vpop.permute.xlu0 %4600 }
0x214f   :  { %v4605_v21 = vmul.f32 %v9418_v35, %v8683_v45 }
0x2151   :  { %4101 = vrot.lane.b32.xlu1 %v7989_v23, %s8152_s26  ;;  %4610 = vrot.lane.b32.xlu0 %v4605_v21, %s8153_s0 }
0x2155   :  { %4632 = vrot.lane.b32.xlu1 %v7991_v26, %s8152_s26  ;;  %4103 = vrot.lane.b32.xlu0 %v7993_v41, %s8152_s26 }
0x2159   :  { %4634 = vrot.lane.b32.xlu0 %v7995_v47, %s8152_s26 }
0x2172   :  { %v4078_v33 = vpop.permute.xlu1 %4077 }
0x2173   :  { %v4083_v18 = vadd.f32 %v4078_v33, %v9214_v10 }
0x2175   :  { %v6573_v8 = vmul.f32 -1.442695, %v4083_v18 }
0x2176   :  { %v4080_v31 = vpop.permute.xlu0 %4079 }
0x2177   :  { %v4084_v30 = vadd.f32 %v4080_v31, %v9218_v1  ;;  %7996 = vpow2.f32 %v6573_v8 }
0x2179   :  { %v6574_v48 = vmul.f32 -1.442695, %v4084_v30 }
0x217b   :  { %7998 = vpow2.f32 %v6574_v48 }
0x2184   :  { %v7997_v9 = vpop.eup %7996 }
0x2185   :  { %v4091_v44 = vadd.f32 1.0, %v7997_v9 }
0x2187   :  { %8000 = vrcp.f32 %v4091_v44 }
0x2188   :  { %v7999_v29 = vpop.eup %7998 }
0x2189   :  { %v4092_v22 = vadd.f32 1.0, %v7999_v29 }
0x218b   :  { %8002 = vrcp.f32 %v4092_v22 }
0x2194   :  { %v8001_v1 = vpop.eup %8000 }
0x2198   :  { %v8003_v0 = vpop.eup %8002 }
0x21bf   :  { %v4609_v24 = vpop.permute.xlu1 %4608 }
0x21c0   :  { %v4614_v55 = vadd.f32 %v4609_v24, %v9344_v50 }
0x21c2   :  { %v6588_v56 = vmul.f32 -1.442695, %v4614_v55 }
0x21c3   :  { %v4102_v15 = vpop.permute.xlu1 %4101  ;;  %v4611_v58 = vpop.permute.xlu0 %4610 }
0x21c4   :  { %8004 = vpow2.f32 %v6588_v56  ;;  %v4615_v10 = vadd.f32 %v4611_v58, %v9348_v52  ;;  %v4107_v6 = vmul.f32 %v8001_v1, %v4102_v15 }
0x21c6   :  { %v6589_v25 = vmul.f32 -1.442695, %v4615_v10  ;;  %v4109_v4 = vmax.f32 %v4107_v6, 0.0 }
0x21c7   :  { %v4104_v63 = vpop.permute.xlu0 %4103  ;;  %v4633_v52 = vpop.permute.xlu1 %4632 }
0x21c8   :  { %8006 = vpow2.f32 %v6589_v25  ;;  %v4108_v32 = vmul.f32 %v8003_v0, %v4104_v63 }
0x21ca   :  { %v4110_v59 = vmax.f32 %v4108_v32, 0.0 }
0x21cb   :  { %v4635_v26 = vpop.permute.xlu0 %4634 }
0x21cc   :  { %v7794_v34 = vpack.i.bf16 %v4110_v59, %v4109_v4 }
0x21ce   :  { %7795 = vrot.lane.b32.xlu0 %v7794_v34, %s8152_s26 }
0x21d1   :  { %v8005_v46 = vpop.eup %8004 }
0x21d2   :  { %v4622_v50 = vadd.f32 1.0, %v8005_v46  ;;  %v9470_v46 = vld [vmem:[%s10001_s4 + $0x38] sm:$0xff]  }
0x21d4   :  { %8008 = vrcp.f32 %v4622_v50  ;;  %v9479_v50 = vld [vmem:[%s10001_s4 + $0x30] sm:$0xff]  }
0x21d5   :  { %v8007_v3 = vpop.eup %8006 }
0x21d6   :  { %v4623_v13 = vadd.f32 1.0, %v8007_v3  ;;  %v9486_v3 = vld [vmem:[%s10001_s4 + $0x28] sm:$0xff]  }
0x21d8   :  { %8010 = vrcp.f32 %v4623_v13  ;;  %v9493_v13 = vld [vmem:[%s10001_s4 + $0x20] sm:$0xff]  }
0x21e1   :  { %v8009_v37 = vpop.eup %8008 }
0x21e2   :  { %v4638_v23 = vmul.f32 %v8009_v37, %v4633_v52  ;;  %v9501_v37 = vld [vmem:[%s10001_s4 + $0x58] sm:$0xff]   ;;  %v9510_v52 = vld [vmem:[%s10001_s4 + $0x50] sm:$0xff]  }
0x21e4   :  { %v4640_v47 = vmax.f32 %v4638_v23, 0.0  ;;  %v9517_v23 = vld [vmem:[%s10001_s4 + $0x48] sm:$0xff]  }
0x21e5   :  { %v8011_v21 = vpop.eup %8010 }
0x21e6   :  { %v4639_v41 = vmul.f32 %v8011_v21, %v4635_v26  ;;  %v9524_v21 = vld [vmem:[%s10001_s4 + $0x40] sm:$0xff]   ;;  %v9532_v26 = vld [vmem:[%s10001_s4 + $0x98] sm:$0xff]  }
0x21e8   :  { %v4641_v33 = vmax.f32 %v4639_v41, 0.0  ;;  %v9541_v41 = vld [vmem:[%s10001_s4 + $0x90] sm:$0xff]  }
0x21ea   :  { %v7789_v31 = vpack.i.bf16 %v4641_v33, %v4640_v47  ;;  %v5175_v18 = vpack.c.bf16 %v4641_v33, %v4640_v47  ;;  %v9548_v47 = vld [vmem:[%s10001_s4 + $0x88] sm:$0xff]   ;;  %v9555_v33 = vld [vmem:[%s10001_s4 + $0x80] sm:$0xff]  }
0x21ec   :  { %7790 = vrot.lane.b32.xlu1 %v7789_v31, %s8151_s23  ;;  %7800 = vrot.lane.b32.xlu0 %v7789_v31, %s8151_s23 }
0x21f0   :  { %5177 = vrot.lane.b32.xlu1 %v5175_v18, %s8151_s23 }
0x2240   :  { %v7796_v30 = vpop.permute.xlu0 %7795 }
0x2241   :  { %v7798_v48 = vunpack.i.h.bf16 %v7796_v30  ;;  %v7797_v9 = vunpack.i.l.bf16 %v7796_v30 }
0x225e   :  { %v7791_v8 = vpop.permute.xlu1 %7790 }
0x225f   :  { %v7793_v29 = vunpack.i.h.bf16 %v7791_v8  ;;  %v7792_v44 = vunpack.i.l.bf16 %v7791_v8 }
0x2261   :  { %v4658_v22 = vsel %vm1933_vm4, %v7792_v44, %v7797_v9  ;;  %v4659_v24 = vsel %vm1933_vm4, %v7793_v29, %v7798_v48  ;;  %v9567_v44 = vld [vmem:[%s10001_s4 + $0x18] sm:$0xff]  }
0x2262   :  { %v9437_v55 = vpack.c.bf16 %v4659_v24, %v4658_v22  ;;  %v9576_v24 = vld [vmem:[%s10001_s4 + $0x10] sm:$0xff]  }
0x2263   :  { %10049 = vst [vmem:[#allocation10_spill] sm:$0xff] %v9576_v24 }
0x2264   :  { %7515 = vmatpush3.bf16.msra.mxu1 %v9437_v55  ;;  %v4744_v25 = vunpack.c.l.bf16 %v9437_v55  ;;  %v4745_v0 = vunpack.c.h.bf16 %v9437_v55 }
0x2265   :  { %7526 = vmatprep.subr.bf16.mxu1 %v10038_v16 }
0x2267   :  { %7517 = vmatmul.mubr.msk.bf16.vlgmr.msra.gmra.mxu1 %vm65_vm1, %v10045_v54 }
0x2268   :  { %7528 = vmatprep.mubr.msk.bf16.mxu1 %vm8149_vm0, %v10038_v16 }
0x2327   :  { %v9445_v56 = vpop.f32.mrf.mxu1 }
0x2329   :  { %v7518_v15 = vpop.f32.mrf.mxu1 }
0x232a   :  { %v9583_v15 = vld [vmem:[%s10001_s4 + $0x8] sm:$0xff]  }
0x232b   :  { %v9447_v58 = vpop.f32.mrf.mxu1  ;;  %10050 = vst [vmem:[#allocation11_spill] sm:$0xff] %v9583_v15 }
0x232c   :  { %v4702_v10 = vpack.c.bf16 %v9447_v58, %v9445_v56 }
0x232d   :  { %v7519_v1 = vpop.f32.mrf.mxu1 }
0x232e   :  { %7521 = vmatpush3.bf16.msra.mxu0 %v4702_v10  ;;  %v9599_v1 = vld [vmem:[%s10001_s4 + $0x78] sm:$0xff]  }
0x232f   :  { %7532 = vmatprep.subr.bf16.mxu0 %v10038_v16  ;;  %10052 = vst [vmem:[#allocation3_spill] sm:$0xff] %v9599_v1 }
0x2331   :  { %7523 = vmatmul.mubr.msk.bf16.vlgmr.msra.gmra.mxu0 %vm65_vm1, %v10046_v27 }
0x2332   :  { %7534 = vmatprep.mubr.msk.bf16.mxu0 %vm8149_vm0, %v10038_v16 }
0x23f1   :  { %v4737_v54 = vpop.f32.mrf.mxu0 }
0x23f2   :  { %v9458_v32 = vsub.f32 %v4737_v54, %v4744_v25 }
0x23f3   :  { %v7524_v6 = vpop.f32.mrf.mxu0 }
0x23f4   :  { %v9608_v6 = vld [vmem:[%s10001_s4 + $0x70] sm:$0xff]  }
0x23f5   :  { %v4740_v63 = vpop.f32.mrf.mxu0  ;;  %10053 = vst [vmem:[#allocation2_spill] sm:$0xff] %v9608_v6 }
0x23f6   :  { %v9460_v4 = vsub.f32 %v4740_v63, %v4745_v0  ;;  %v9615_v0 = vld [vmem:[%s10001_s4 + $0x68] sm:$0xff]  }
0x23f7   :  { %v7525_v59 = vpop.f32.mrf.mxu0  ;;  %10054 = vst [vmem:[#allocation6_spill] sm:$0xff] %v9615_v0 }
0x23f8   :  { %v4748_v34 = vpack.c.bf16 %v9460_v4, %v9458_v32  ;;  %v9622_v59 = vld [vmem:[%s10001_s4 + $0x60] sm:$0xff]  }
0x23f9   :  { %10055 = vst [vmem:[#allocation7_spill] sm:$0xff] %v9622_v59 }
0x23fa   :  { %7527 = vmatpush3.bf16.msra.mxu1 %v4748_v34 }
0x23fb   :  { %7538 = vmatprep.subr.bf16.mxu1 %v10038_v16 }
0x23fd   :  { %7529 = vmatmul.mubr.msk.bf16.vlgmr.msra.gmra.mxu1 %vm65_vm1, %v10046_v27 }
0x23fe   :  { %7539 = vmatpush3.bf16.msra.mxu1 %v9470_v46  ;;  %7546 = vmatprep.mubr.msk.bf16.mxu1 %vm8149_vm0, %v10038_v16 }
0x23ff   :  { %7540 = vmatprep.subr.bf16.mxu1 %v10038_v16 }
0x2402   :  { %7541 = vmatpush3.bf16.msra.mxu1 %v9479_v50 }
0x2403   :  { %7542 = vmatprep.subr.bf16.mxu1 %v10038_v16 }
0x2406   :  { %7543 = vmatpush3.bf16.msra.mxu1 %v9486_v3 }
0x2407   :  { %7544 = vmatprep.subr.bf16.mxu1 %v10038_v16 }
0x240a   :  { %7545 = vmatpush3.bf16.msra.mxu1 %v9493_v13 }
0x240b   :  { %7562 = vmatprep.subr.bf16.mxu1 %v10038_v16 }
0x240d   :  { %7547 = vmatmul.mubr.msk.bf16.vlgmr.msra.gmra.mxu1 %vm2578_vm5, %v4702_v10  ;;  %v9590_v10 = vld [vmem:[%s10001_s4] sm:$0xff]  }
0x240e   :  { %7563 = vmatpush3.bf16.msra.mxu1 %v9501_v37  ;;  %7570 = vmatprep.mubr.msk.bf16.mxu1 %vm8149_vm0, %v10038_v16  ;;  %10051 = vst [vmem:[#allocation12_spill] sm:$0xff] %v9590_v10 }
0x240f   :  { %7564 = vmatprep.subr.bf16.mxu1 %v10038_v16 }
0x2412   :  { %7565 = vmatpush3.bf16.msra.mxu1 %v9510_v52 }
0x2413   :  { %7566 = vmatprep.subr.bf16.mxu1 %v10038_v16 }
0x2416   :  { %7567 = vmatpush3.bf16.msra.mxu1 %v9517_v23 }
0x2417   :  { %7568 = vmatprep.subr.bf16.mxu1 %v10038_v16 }
0x241a   :  { %7569 = vmatpush3.bf16.msra.mxu1 %v9524_v21 }
0x241b   :  { %7586 = vmatprep.subr.bf16.mxu1 %v10038_v16 }
0x241d   :  { %7571 = vmatmul.mubr.msk.bf16.vlgmr.msra.gmra.mxu1 %vm2578_vm5, %v4748_v34  ;;  %v9626_v34 = vpop.permute.xlu1 %5177 }
0x241e   :  { %7587 = vmatpush3.bf16.msra.mxu1 %v9532_v26  ;;  %7594 = vmatprep.mubr.msk.bf16.mxu1 %vm8149_vm0, %v10038_v16 }
0x241f   :  { %7588 = vmatprep.subr.bf16.mxu1 %v10038_v16 }
0x2422   :  { %7589 = vmatpush3.bf16.msra.mxu1 %v9541_v41 }
0x2423   :  { %7590 = vmatprep.subr.bf16.mxu1 %v10038_v16 }
0x2426   :  { %7591 = vmatpush3.bf16.msra.mxu1 %v9548_v47 }
0x2427   :  { %7592 = vmatprep.subr.bf16.mxu1 %v10038_v16 }
0x242a   :  { %7593 = vmatpush3.bf16.msra.mxu1 %v9555_v33 }
0x242b   :  { %7610 = vmatprep.subr.bf16.mxu1 %v10038_v16 }
0x24bd   :  { %v4783_v31 = vpop.f32.mrf.mxu1 }
0x24be   :  { %v4790_v8 = vsub.f32 %v4783_v31, %v9445_v56  ;;  %v10056_v31 = vld [vmem:[#allocation5_spill] sm:$0xff] }
0x24bf   :  { %v7530_v18 = vpop.f32.mrf.mxu1 }
0x24c1   :  { %v4786_v30 = vpop.f32.mrf.mxu1 }
0x24c2   :  { %v4791_v48 = vsub.f32 %v4786_v30, %v9447_v58 }
0x24c3   :  { %v7531_v9 = vpop.f32.mrf.mxu1 }
0x24c4   :  { %v4792_v29 = vpack.c.bf16 %v4791_v48, %v4790_v8 }
0x24c6   :  { %7533 = vmatpush3.bf16.msra.mxu0 %v4792_v29 }
0x24c7   :  { %7550 = vmatprep.subr.bf16.mxu0 %v10038_v16 }
0x24c9   :  { %7535 = vmatmul.mubr.msk.bf16.vlgmr.msra.gmra.mxu0 %vm65_vm1, %v10046_v27 }
0x24ca   :  { %7551 = vmatpush3.bf16.msra.mxu0 %v9567_v44  ;;  %7558 = vmatprep.mubr.msk.bf16.mxu0 %vm8149_vm0, %v10038_v16 }
0x24cb   :  { %7552 = vmatprep.subr.bf16.mxu0 %v10038_v16 }
0x24cd   :  { %v4873_v22 = vpop.f32.mrf.mxu1 }
0x24ce   :  { %7553 = vmatpush3.bf16.msra.mxu0 %v9576_v24 }
0x24cf   :  { %v7548_v27 = vpop.f32.mrf.mxu1  ;;  %7554 = vmatprep.subr.bf16.mxu0 %v10038_v16 }
0x24d1   :  { %v4876_v56 = vpop.f32.mrf.mxu1 }
0x24d2   :  { %7555 = vmatpush3.bf16.msra.mxu0 %v9583_v15 }
0x24d3   :  { %v7549_v58 = vpop.f32.mrf.mxu1  ;;  %7556 = vmatprep.subr.bf16.mxu0 %v10038_v16 }
0x24d6   :  { %7557 = vmatpush3.bf16.msra.mxu0 %v9590_v10 }
0x24d7   :  { %7574 = vmatprep.subr.bf16.mxu0 %v10038_v16 }
0x24d9   :  { %7559 = vmatmul.mubr.msk.bf16.vlgmr.msra.gmra.mxu0 %vm2578_vm5, %v9437_v55 }
0x24da   :  { %7575 = vmatpush3.bf16.msra.mxu0 %v9599_v1  ;;  %7582 = vmatprep.mubr.msk.bf16.mxu0 %vm8149_vm0, %v10038_v16 }
0x24db   :  { %7576 = vmatprep.subr.bf16.mxu0 %v10038_v16 }
0x24dd   :  { %v4961_v54 = vpop.f32.mrf.mxu1 }
0x24de   :  { %7577 = vmatpush3.bf16.msra.mxu0 %v9608_v6 }
0x24df   :  { %v7572_v55 = vpop.f32.mrf.mxu1  ;;  %7578 = vmatprep.subr.bf16.mxu0 %v10038_v16 }
0x24e1   :  { %v4964_v25 = vpop.f32.mrf.mxu1 }
0x24e2   :  { %7579 = vmatpush3.bf16.msra.mxu0 %v9615_v0 }
0x24e3   :  { %v7573_v63 = vpop.f32.mrf.mxu1  ;;  %7580 = vmatprep.subr.bf16.mxu0 %v10038_v16 }
0x24e6   :  { %7581 = vmatpush3.bf16.msra.mxu0 %v9622_v59 }
0x24e7   :  { %7598 = vmatprep.subr.bf16.mxu0 %v10038_v16 }
0x24e9   :  { %7583 = vmatmul.mubr.msk.bf16.vlgmr.msra.gmra.mxu0 %vm2578_vm5, %v4792_v29 }
0x24ea   :  { %7599 = vmatpush3.bf16.msra.mxu0 %v9626_v34  ;;  %7600 = vmatprep.mubr.msk.bf16.mxu0 %vm8149_vm0, %v10038_v16 }
0x24eb   :  { %7604 = vmatprep.subr.bf16.mxu0 %v10038_v16 }
0x24f1   :  { %7601 = vmatmul.mubr.msk.bf16.vlgmr.msra.gmra.mxu0 %vm65_vm1, %v10056_v31 }
0x24f2   :  { %7606 = vmatprep.mubr.msk.bf16.mxu0 %vm8149_vm0, %v10038_v16 }
0x2589   :  { %v4827_v18 = vpop.f32.mrf.mxu0 }
0x258a   :  { %v4834_v48 = vsub.f32 %v4827_v18, %v9458_v32 }
0x258b   :  { %v7536_v30 = vpop.f32.mrf.mxu0 }
0x258d   :  { %v4830_v8 = vpop.f32.mrf.mxu0 }
0x258e   :  { %v4835_v9 = vsub.f32 %v4830_v8, %v9460_v4 }
0x258f   :  { %v7537_v29 = vpop.f32.mrf.mxu0 }
0x2590   :  { %v5016_v27 = vpack.c.bf16 %v4835_v9, %v4834_v48 }
0x2592   :  { %7595 = vmatmul.mubr.msk.bf16.vlgmr.msra.gmra.mxu1 %vm2578_vm5, %v5016_v27 }
0x2593   :  { %7612 = vmatprep.mubr.msk.bf16.mxu1 %vm8149_vm0, %v10038_v16 }
0x2599   :  { %v4917_v58 = vpop.f32.mrf.mxu0 }
0x259a   :  { %v4918_v0 = vadd.f32 %v4917_v58, %v4873_v22  ;;  %v10057_v22 = vld [vmem:[#allocation4_spill] sm:$0xff] }
0x259b   :  { %v7560_v55 = vpop.f32.mrf.mxu0 }
0x259c   :  { %v4968_v1 = vadd.f32 %v4961_v54, %v4918_v0  ;;  %v9653_v54 = vld [vmem:[%s10000_s6 + $0x8] ss:$0 sm:$0xff]  ;;  %v7801_v55 = vpop.permute.xlu0 %7800 }
0x259d   :  { %v4920_v63 = vpop.f32.mrf.mxu0 }
0x259e   :  { %v4921_v6 = vadd.f32 %v4920_v63, %v4876_v56 }
0x259f   :  { %v7561_v59 = vpop.f32.mrf.mxu0 }
0x25a0   :  { %v4969_v32 = vadd.f32 %v4964_v25, %v4921_v6 }
0x25a9   :  { %v5007_v30 = vpop.f32.mrf.mxu0 }
0x25aa   :  { %v5014_v10 = vadd.f32 %v5007_v30, %v4968_v1 }
0x25ab   :  { %v7584_v15 = vpop.f32.mrf.mxu0 }
0x25ad   :  { %v5010_v18 = vpop.f32.mrf.mxu0 }
0x25ae   :  { %v5015_v4 = vadd.f32 %v5010_v18, %v4969_v32  ;;  %v7803_v32 = vunpack.i.h.bf16 %v7801_v55  ;;  %v7802_v18 = vunpack.i.l.bf16 %v7801_v55 }
0x25af   :  { %v7585_v8 = vpop.f32.mrf.mxu0 }
0x25b1   :  { %v5214_v48 = vpop.f32.mrf.mxu0 }
0x25b3   :  { %v7602_v9 = vpop.f32.mrf.mxu0 }
0x25b5   :  { %v5217_v29 = vpop.f32.mrf.mxu0 }
0x25b6   :  { %v9642_v27 = vpack.c.bf16 %v5217_v29, %v5214_v48 }
0x25b7   :  { %v7603_v24 = vpop.f32.mrf.mxu0 }
0x25b8   :  { %7605 = vmatpush3.bf16.msra.mxu0 %v9642_v27 }
0x25b9   :  { %7616 = vmatprep.subr.bf16.mxu0 %v10038_v16 }
0x25bb   :  { %7607 = vmatmul.mubr.msk.bf16.vlgmr.msra.gmra.mxu0 %vm65_vm1, %v10057_v22 }
0x25bc   :  { %7618 = vmatprep.mubr.msk.bf16.mxu0 %vm8149_vm0, %v10038_v16 }
0x2652   :  { %v5054_v56 = vpop.f32.mrf.mxu1 }
0x2653   :  { %v5061_v15 = vadd.f32 %v5054_v56, %v5014_v10 }
0x2654   :  { %v7596_v1 = vpop.f32.mrf.mxu1 }
0x2655   :  { %v9656_v24 = vadd.f32 %v9653_v54, %v5061_v15 }
0x2656   :  { %v5057_v6 = vpop.f32.mrf.mxu1 }
0x2657   :  { %8012 = vtanh.f32 %v9656_v24  ;;  %v5062_v25 = vadd.f32 %v5057_v6, %v5015_v4 }
0x2658   :  { %v7597_v0 = vpop.f32.mrf.mxu1 }
0x2659   :  { %v9660_v59 = vadd.f32 %v9653_v54, %v5062_v25  ;;  %v10058_v0 = vld [vmem:[#allocation8_spill] sm:$0xff] }
0x265b   :  { %8014 = vtanh.f32 %v9660_v59 }
0x2664   :  { %v8013_v10 = vpop.eup %8012 }
0x2665   :  { %5111 = vrot.lane.b32.xlu1 %v8013_v10, %s8152_s26 }
0x2668   :  { %v8015_v58 = vpop.eup %8014 }
0x2669   :  { %5113 = vrot.lane.b32.xlu0 %v8015_v58, %s8152_s26  ;;  %v10059_v58 = vld [vmem:[#allocation9_spill] sm:$0xff] }
0x267b   :  { %v5256_v63 = vpop.f32.mrf.mxu0 }
0x267c   :  { %v9665_v9 = vsub.f32 %v5256_v63, %v7802_v18 }
0x267d   :  { %v7608_v30 = vpop.f32.mrf.mxu0 }
0x267f   :  { %v5259_v8 = vpop.f32.mrf.mxu0 }
0x2680   :  { %v9667_v4 = vsub.f32 %v5259_v8, %v7803_v32 }
0x2681   :  { %v7609_v56 = vpop.f32.mrf.mxu0 }
0x2682   :  { %v5275_v15 = vpack.c.bf16 %v9667_v4, %v9665_v9 }
0x2684   :  { %7611 = vmatpush3.bf16.msra.mxu1 %v5275_v15 }
0x2685   :  { %7622 = vmatprep.subr.bf16.mxu1 %v10038_v16 }
0x2687   :  { %7613 = vmatmul.mubr.msk.bf16.vlgmr.msra.gmra.mxu1 %vm65_vm1, %v10057_v22 }
0x2688   :  { %7623 = vmatpush3.bf16.msra.mxu1 %v9235_v49  ;;  %7626 = vmatprep.mubr.msk.bf16.mxu1 %vm8149_vm0, %v10038_v16 }
0x2689   :  { %7624 = vmatprep.subr.bf16.mxu1 %v10038_v16 }
0x268c   :  { %7625 = vmatpush3.bf16.msra.mxu1 %v9244_v2 }
0x268d   :  { %7638 = vmatprep.subr.bf16.mxu1 %v10038_v16 }
0x268f   :  { %7627 = vmatmul.mubr.msk.bf16.vlgmr.msra.gmra.mxu1 %vm1933_vm4, %v9626_v34 }
0x2690   :  { %7639 = vmatpush3.bf16.msra.mxu1 %v9253_v36  ;;  %7642 = vmatprep.mubr.msk.bf16.mxu1 %vm8149_vm0, %v10038_v16 }
0x2691   :  { %7640 = vmatprep.subr.bf16.mxu1 %v10038_v16 }
0x2694   :  { %7641 = vmatpush3.bf16.msra.mxu1 %v9262_v62 }
0x2695   :  { %7654 = vmatprep.subr.bf16.mxu1 %v10038_v16 }
0x2697   :  { %7643 = vmatmul.mubr.msk.bf16.vlgmr.msra.gmra.mxu1 %vm1933_vm4, %v5275_v15 }
0x2698   :  { %7655 = vmatpush3.bf16.msra.mxu1 %v9270_v19  ;;  %7658 = vmatprep.mubr.msk.bf16.mxu1 %vm8149_vm0, %v10038_v16 }
0x2699   :  { %7656 = vmatprep.subr.bf16.mxu1 %v10038_v16 }
0x269c   :  { %7657 = vmatpush3.bf16.msra.mxu1 %v9279_v28 }
0x269d   :  { %7668 = vmatprep.subr.bf16.mxu1 %v10038_v16 }
0x2747   :  { %v5310_v49 = vpop.f32.mrf.mxu1 }
0x2748   :  { %v5317_v34 = vsub.f32 %v5310_v49, %v5214_v48 }
0x2749   :  { %v7614_v2 = vpop.f32.mrf.mxu1 }
0x274b   :  { %v5313_v36 = vpop.f32.mrf.mxu1 }
0x274c   :  { %v5318_v62 = vsub.f32 %v5313_v36, %v5217_v29 }
0x274d   :  { %v7615_v1 = vpop.f32.mrf.mxu1 }
0x274e   :  { %v5319_v6 = vpack.c.bf16 %v5318_v62, %v5317_v34 }
0x274f   :  { %v5400_v25 = vpop.f32.mrf.mxu1 }
0x2750   :  { %v5407_v10 = vadd.f32 %v5400_v25, %v10058_v0  ;;  %7617 = vmatpush3.bf16.msra.mxu0 %v5319_v6 }
0x2751   :  { %v7628_v19 = vpop.f32.mrf.mxu1  ;;  %7630 = vmatprep.subr.bf16.mxu0 %v10038_v16 }
0x2753   :  { %7619 = vmatmul.mubr.msk.bf16.vlgmr.msra.gmra.mxu0 %vm65_vm1, %v10057_v22  ;;  %v5403_v28 = vpop.f32.mrf.mxu1 }
0x2754   :  { %v5408_v55 = vadd.f32 %v5403_v28, %v10059_v58  ;;  %7631 = vmatpush3.bf16.msra.mxu0 %v9293_v17  ;;  %7634 = vmatprep.mubr.msk.bf16.mxu0 %vm8149_vm0, %v10038_v16  ;;  %v5066_v58 = vmul.f32 %v9404_v57, %v8998_v14 }
0x2755   :  { %v7629_v48 = vpop.f32.mrf.mxu1  ;;  %7632 = vmatprep.subr.bf16.mxu0 %v10038_v16 }
0x2757   :  { %v5492_v29 = vpop.f32.mrf.mxu1 }
0x2758   :  { %7633 = vmatpush3.bf16.msra.mxu0 %v9302_v39 }
0x2759   :  { %v7644_v63 = vpop.f32.mrf.mxu1  ;;  %7646 = vmatprep.subr.bf16.mxu0 %v10038_v16 }
0x275b   :  { %7635 = vmatmul.mubr.msk.bf16.vlgmr.msra.gmra.mxu0 %vm1933_vm4, %v9642_v27  ;;  %v5495_v30 = vpop.f32.mrf.mxu1 }
0x275c   :  { %7647 = vmatpush3.bf16.msra.mxu0 %v9311_v43  ;;  %7650 = vmatprep.mubr.msk.bf16.mxu0 %vm8149_vm0, %v10038_v16 }
0x275d   :  { %v7645_v17 = vpop.f32.mrf.mxu1  ;;  %7648 = vmatprep.subr.bf16.mxu0 %v10038_v16 }
0x2760   :  { %7649 = vmatpush3.bf16.msra.mxu0 %v9320_v20 }
0x2761   :  { %7662 = vmatprep.subr.bf16.mxu0 %v10038_v16 }
0x2763   :  { %7651 = vmatmul.mubr.msk.bf16.vlgmr.msra.gmra.mxu0 %vm1933_vm4, %v5319_v6 }
0x2764   :  { %7664 = vmatprep.mubr.msk.bf16.mxu0 %vm8149_vm0, %v10038_v16 }
0x2813   :  { %v5354_v39 = vpop.f32.mrf.mxu0 }
0x2814   :  { %v5361_v43 = vsub.f32 %v5354_v39, %v9665_v9 }
0x2815   :  { %v7620_v27 = vpop.f32.mrf.mxu0 }
0x2817   :  { %v5357_v32 = vpop.f32.mrf.mxu0 }
0x2818   :  { %v5362_v18 = vsub.f32 %v5357_v32, %v9667_v4 }
0x2819   :  { %v7621_v8 = vpop.f32.mrf.mxu0 }
0x281a   :  { %v5547_v56 = vpack.c.bf16 %v5362_v18, %v5361_v43 }
0x281b   :  { %v5446_v15 = vpop.f32.mrf.mxu0 }
0x281c   :  { %v5453_v49 = vadd.f32 %v5446_v15, %v5407_v10  ;;  %7659 = vmatmul.mubr.msk.bf16.vlgmr.msra.gmra.mxu1 %vm1933_vm4, %v5547_v56  ;;  %v5065_v10 = vmul.f32 %v9399_v12, %v8998_v14 }
0x281d   :  { %v7636_v20 = vpop.f32.mrf.mxu0  ;;  %7670 = vmatprep.mubr.msk.bf16.mxu1 %vm8149_vm0, %v10038_v16 }
0x281e   :  { %v5499_v62 = vadd.f32 %v5492_v29, %v5453_v49  ;;  %v5067_v28 = vadd.f32 %v5065_v10, %v9656_v24 }
0x281f   :  { %v5449_v2 = vpop.f32.mrf.mxu0 }
0x2820   :  { %v5454_v36 = vadd.f32 %v5449_v2, %v5408_v55  ;;  %v6599_v48 = vmul.f32 -1.442695, %v5067_v28  ;;  %v5068_v55 = vadd.f32 %v5066_v58, %v9660_v59  ;;  %v5081_v2 = vmul.f32 %v9399_v12, %v9019_v61 }
0x2821   :  { %v7637_v34 = vpop.f32.mrf.mxu0  ;;  %v5613_v12 = vmul.f32 %v9418_v35, %v8632_v51 }
0x2822   :  { %v5500_v9 = vadd.f32 %v5495_v30, %v5454_v36  ;;  %8016 = vpow2.f32 %v6599_v48  ;;  %v6600_v29 = vmul.f32 -1.442695, %v5068_v55  ;;  %v5082_v34 = vmul.f32 %v9404_v57, %v9019_v61 }
0x2823   :  { %v5538_v1 = vpop.f32.mrf.mxu0  ;;  %v5596_v57 = vmul.f32 %v9412_v11, %v8660_v40 }
0x2824   :  { %v5545_v6 = vadd.f32 %v5538_v1, %v5499_v62  ;;  %8018 = vpow2.f32 %v6600_v29  ;;  %v5112_v62 = vpop.permute.xlu1 %5111 }
0x2825   :  { %v7652_v25 = vpop.f32.mrf.mxu0 }
0x2826   :  { %v5114_v25 = vpop.permute.xlu0 %5113 }
0x2827   :  { %v5541_v0 = vpop.f32.mrf.mxu0 }
0x2828   :  { %v5546_v4 = vadd.f32 %v5541_v0, %v5500_v9 }
0x2829   :  { %v7653_v19 = vpop.f32.mrf.mxu0 }
0x282a   :  { %v5597_v19 = vmul.f32 %v9418_v35, %v8660_v40 }
0x282f   :  { %v8017_v8 = vpop.eup %8016 }
0x2830   :  { %v5075_v56 = vadd.f32 1.0, %v8017_v8 }
0x2831   :  { %v8019_v15 = vpop.eup %8018 }
0x2832   :  { %v5076_v49 = vadd.f32 1.0, %v8019_v15 }
0x28dc   :  { %v5585_v63 = vpop.f32.mrf.mxu1 }
0x28dd   :  { %v5592_v17 = vadd.f32 %v5585_v63, %v5545_v6 }
0x28de   :  { %v7660_v30 = vpop.f32.mrf.mxu1 }
0x28df   :  { %v9729_v39 = vadd.f32 %v9341_v7, %v5592_v17 }
0x28e0   :  { %v5588_v27 = vpop.f32.mrf.mxu1 }
0x28e1   :  { %8020 = vtanh.f32 %v9729_v39  ;;  %v5593_v32 = vadd.f32 %v5588_v27, %v5546_v4  ;;  %v5598_v4 = vadd.f32 %v5596_v57, %v9729_v39 }
0x28e2   :  { %v7661_v43 = vpop.f32.mrf.mxu1 }
0x28e3   :  { %v9733_v18 = vadd.f32 %v9341_v7, %v5593_v32  ;;  %v5612_v7 = vmul.f32 %v9412_v11, %v8632_v51  ;;  %v6614_v10 = vmul.f32 -1.442695, %v5598_v4 }
0x28e5   :  { %8022 = vtanh.f32 %v9733_v18  ;;  %v5599_v51 = vadd.f32 %v5597_v19, %v9733_v18 }
0x28e6   :  { %8024 = vrcp.f32 %v5075_v56 }
0x28e7   :  { %8026 = vrcp.f32 %v5076_v49  ;;  %v6615_v28 = vmul.f32 -1.442695, %v5599_v51 }
0x28e8   :  { %8028 = vpow2.f32 %v6614_v10 }
0x28e9   :  { %8030 = vpow2.f32 %v6615_v28 }
0x28ee   :  { %v8021_v20 = vpop.eup %8020 }
0x28ef   :  { %5642 = vrot.lane.b32.xlu1 %v8021_v20, %s8152_s26 }
0x28f2   :  { %v8023_v36 = vpop.eup %8022 }
0x28f3   :  { %5085 = vrot.lane.b32.xlu1 %v5081_v2, %s8151_s23  ;;  %5644 = vrot.lane.b32.xlu0 %v8023_v36, %s8152_s26  ;;  %v8025_v1 = vpop.eup %8024 }
0x28f4   :  { %v5117_v6 = vmul.f32 %v8025_v1, %v5112_v62  ;;  %v8027_v9 = vpop.eup %8026 }
0x28f5   :  { %v5118_v0 = vmul.f32 %v8027_v9, %v5114_v25  ;;  %v8029_v58 = vpop.eup %8028 }
0x28f6   :  { %v5606_v48 = vadd.f32 1.0, %v8029_v58  ;;  %v8031_v55 = vpop.eup %8030 }
0x28f7   :  { %5616 = vrot.lane.b32.xlu1 %v5612_v7, %s8151_s23  ;;  %5087 = vrot.lane.b32.xlu0 %v5082_v34, %s8151_s23  ;;  %v5607_v29 = vadd.f32 1.0, %v8031_v55 }
0x28f8   :  { %8032 = vrcp.f32 %v5606_v48 }
0x28f9   :  { %8034 = vrcp.f32 %v5607_v29 }
0x28fb   :  { %5121 = vrot.lane.b32.xlu1 %v5117_v6, %s8151_s23  ;;  %5618 = vrot.lane.b32.xlu0 %v5613_v12, %s8151_s23 }
0x28ff   :  { %5123 = vrot.lane.b32.xlu0 %v5118_v0, %s8151_s23 }
0x2905   :  { %v8033_v63 = vpop.eup %8032 }
0x2906   :  { %v8035_v27 = vpop.eup %8034 }
0x2961   :  { %v5643_v17 = vpop.permute.xlu1 %5642 }
0x2962   :  { %v5648_v11 = vmul.f32 %v8033_v63, %v5643_v17 }
0x2964   :  { %5652 = vrot.lane.b32.xlu1 %v5648_v11, %s8151_s23 }
0x2965   :  { %v5086_v30 = vpop.permute.xlu1 %5085  ;;  %v5645_v35 = vpop.permute.xlu0 %5644 }
0x2966   :  { %v5091_v40 = vadd.f32 %v5086_v30, %v9656_v24  ;;  %v5649_v32 = vmul.f32 %v8035_v27, %v5645_v35 }
0x2968   :  { %v6601_v43 = vmul.f32 -1.442695, %v5091_v40  ;;  %5654 = vrot.lane.b32.xlu0 %v5649_v32, %s8151_s23 }
0x2969   :  { %v5088_v8 = vpop.permute.xlu0 %5087  ;;  %v5617_v7 = vpop.permute.xlu1 %5616 }
0x296a   :  { %8036 = vpow2.f32 %v6601_v43  ;;  %v5092_v56 = vadd.f32 %v5088_v8, %v9660_v59  ;;  %v5622_v4 = vadd.f32 %v5617_v7, %v9729_v39 }
0x296c   :  { %v6602_v15 = vmul.f32 -1.442695, %v5092_v56  ;;  %v6616_v19 = vmul.f32 -1.442695, %v5622_v4 }
0x296d   :  { %v5619_v1 = vpop.permute.xlu0 %5618  ;;  %v5122_v6 = vpop.permute.xlu1 %5121 }
0x296e   :  { %8038 = vpow2.f32 %v6602_v15 }
0x2971   :  { %v5124_v0 = vpop.permute.xlu0 %5123 }
0x2977   :  { %v8037_v49 = vpop.eup %8036 }
0x2978   :  { %v5099_v20 = vadd.f32 1.0, %v8037_v49 }
0x297a   :  { %8040 = vrcp.f32 %v5099_v20 }
0x297b   :  { %v8039_v2 = vpop.eup %8038 }
0x297c   :  { %v5100_v36 = vadd.f32 1.0, %v8039_v2 }
0x297e   :  { %8042 = vrcp.f32 %v5100_v36 }
0x297f   :  { %8044 = vpow2.f32 %v6616_v19 }
0x2987   :  { %v8041_v34 = vpop.eup %8040 }
0x2988   :  { %v5105_v62 = vmul.f32 %v8041_v34, %v9378_v42  ;;  %v5623_v42 = vadd.f32 %v5619_v1, %v9733_v18 }
0x298a   :  { %v9763_v12 = vadd.f32 %v5122_v6, %v5105_v62  ;;  %v6617_v10 = vmul.f32 -1.442695, %v5623_v42 }
0x298b   :  { %v8043_v25 = vpop.eup %8042 }
0x298c   :  { %5131 = vrot.lane.b32.xlu1 %v9763_v12, %s8153_s0  ;;  %v5106_v9 = vmul.f32 %v8043_v25, %v9383_v53  ;;  %8046 = vpow2.f32 %v6617_v10  ;;  %v8045_v51 = vpop.eup %8044 }
0x298d   :  { %v5630_v28 = vadd.f32 1.0, %v8045_v51 }
0x298e   :  { %v9768_v57 = vadd.f32 %v5124_v0, %v5106_v9 }
0x298f   :  { %8048 = vrcp.f32 %v5630_v28 }
0x2990   :  { %5133 = vrot.lane.b32.xlu0 %v9768_v57, %s8153_s0 }
0x2999   :  { %v8047_v58 = vpop.eup %8046 }
0x299a   :  { %v5631_v48 = vadd.f32 1.0, %v8047_v58 }
0x299c   :  { %8050 = vrcp.f32 %v5631_v48  ;;  %v8049_v53 = vpop.eup %8048 }
0x299d   :  { %v5636_v55 = vmul.f32 %v8049_v53, %v9390_v5  ;;  %8052 = vtanh.f32 %v9763_v12 }
0x29a9   :  { %v8051_v63 = vpop.eup %8050 }
0x29aa   :  { %v5637_v11 = vmul.f32 %v8051_v63, %v9395_v60  ;;  %v8053_v56 = vpop.eup %8052 }
0x29d6   :  { %v5653_v29 = vpop.permute.xlu1 %5652 }
0x29d7   :  { %v9775_v17 = vadd.f32 %v5653_v29, %v5636_v55 }
0x29d9   :  { %5662 = vrot.lane.b32.xlu1 %v9775_v17, %s8153_s0  ;;  %8054 = vtanh.f32 %v9775_v17 }
0x29da   :  { %v5655_v30 = vpop.permute.xlu0 %5654  ;;  %8056 = vtanh.f32 %v9768_v57 }
0x29db   :  { %v9780_v27 = vadd.f32 %v5655_v30, %v5637_v11 }
0x29dd   :  { %5664 = vrot.lane.b32.xlu0 %v9780_v27, %s8153_s0  ;;  %8058 = vtanh.f32 %v9780_v27 }
0x29e6   :  { %v8055_v49 = vpop.eup %8054 }
0x29e7   :  { %v8057_v20 = vpop.eup %8056 }
0x29ea   :  { %v8059_v2 = vpop.eup %8058 }
0x29fe   :  { %v9784_v40 = vpop.permute.xlu1 %5131 }
0x29ff   :  { %v5137_v5 = vmul.f32 %v9784_v40, %v9062_v38 }
0x2a01   :  { %5141 = vrot.lane.b32.xlu1 %v5137_v5, %s8153_s0 }
0x2a02   :  { %v9789_v35 = vpop.permute.xlu0 %5133 }
0x2a03   :  { %v5138_v32 = vmul.f32 %v9789_v35, %v9062_v38 }
0x2a05   :  { %5143 = vrot.lane.b32.xlu0 %v5138_v32, %s8153_s0 }
0x2a4b   :  { %v5663_v60 = vpop.permute.xlu1 %5662 }
0x2a4c   :  { %v5668_v43 = vmul.f32 %v5663_v60, %v8683_v45 }
0x2a4e   :  { %5672 = vrot.lane.b32.xlu1 %v5668_v43, %s8153_s0 }
0x2a4f   :  { %v5665_v8 = vpop.permute.xlu0 %5664 }
0x2a50   :  { %v5669_v15 = vmul.f32 %v5665_v8, %v8683_v45 }
0x2a52   :  { %5165 = vrot.lane.b32.xlu1 %v8053_v56, %s8152_s26  ;;  %5674 = vrot.lane.b32.xlu0 %v5669_v15, %s8153_s0 }
0x2a56   :  { %5696 = vrot.lane.b32.xlu1 %v8055_v49, %s8152_s26  ;;  %5167 = vrot.lane.b32.xlu0 %v8057_v20, %s8152_s26 }
0x2a5a   :  { %5698 = vrot.lane.b32.xlu0 %v8059_v2, %s8152_s26 }
0x2a73   :  { %v5142_v36 = vpop.permute.xlu1 %5141 }
0x2a74   :  { %v5147_v34 = vadd.f32 %v5142_v36, %v9656_v24 }
0x2a76   :  { %v6603_v45 = vmul.f32 -1.442695, %v5147_v34 }
0x2a77   :  { %v5144_v7 = vpop.permute.xlu0 %5143 }
0x2a78   :  { %v5148_v62 = vadd.f32 %v5144_v7, %v9660_v59  ;;  %8060 = vpow2.f32 %v6603_v45 }
0x2a7a   :  { %v6604_v1 = vmul.f32 -1.442695, %v5148_v62 }
0x2a7c   :  { %8062 = vpow2.f32 %v6604_v1 }
0x2a85   :  { %v8061_v6 = vpop.eup %8060 }
0x2a86   :  { %v5155_v9 = vadd.f32 1.0, %v8061_v6 }
0x2a88   :  { %8064 = vrcp.f32 %v5155_v9 }
0x2a89   :  { %v8063_v25 = vpop.eup %8062 }
0x2a8a   :  { %v5156_v0 = vadd.f32 1.0, %v8063_v25 }
0x2a8c   :  { %8066 = vrcp.f32 %v5156_v0 }
0x2a95   :  { %v8065_v59 = vpop.eup %8064 }
0x2a99   :  { %v8067_v48 = vpop.eup %8066 }
0x2ac0   :  { %v5673_v4 = vpop.permute.xlu1 %5672 }
0x2ac1   :  { %v5678_v19 = vadd.f32 %v5673_v4, %v9729_v39 }
0x2ac3   :  { %v6618_v42 = vmul.f32 -1.442695, %v5678_v19 }
0x2ac4   :  { %v5166_v10 = vpop.permute.xlu1 %5165  ;;  %v5675_v51 = vpop.permute.xlu0 %5674 }
0x2ac5   :  { %8068 = vpow2.f32 %v6618_v42  ;;  %v5679_v24 = vadd.f32 %v5675_v51, %v9733_v18  ;;  %v5171_v28 = vmul.f32 %v8065_v59, %v5166_v10 }
0x2ac7   :  { %v6619_v58 = vmul.f32 -1.442695, %v5679_v24  ;;  %v5173_v29 = vmax.f32 %v5171_v28, 0.0 }
0x2ac8   :  { %v5168_v53 = vpop.permute.xlu0 %5167  ;;  %v5697_v18 = vpop.permute.xlu1 %5696 }
0x2ac9   :  { %8070 = vpow2.f32 %v6619_v58  ;;  %v5172_v55 = vmul.f32 %v8067_v48, %v5168_v53 }
0x2acb   :  { %v5174_v63 = vmax.f32 %v5172_v55, 0.0 }
0x2acc   :  { %v5699_v56 = vpop.permute.xlu0 %5698 }
0x2acd   :  { %v7809_v11 = vpack.i.bf16 %v5174_v63, %v5173_v29 }
0x2acf   :  { %7810 = vrot.lane.b32.xlu0 %v7809_v11, %s8152_s26  ;;  %v10064_v11 = vld [vmem:[#allocation2_spill] sm:$0xff] }
0x2ad2   :  { %v8069_v30 = vpop.eup %8068 }
0x2ad3   :  { %v5686_v39 = vadd.f32 1.0, %v8069_v30 }
0x2ad5   :  { %8072 = vrcp.f32 %v5686_v39 }
0x2ad6   :  { %v8071_v5 = vpop.eup %8070 }
0x2ad7   :  { %v5687_v32 = vadd.f32 1.0, %v8071_v5  ;;  %v10065_v5 = vld [vmem:[#allocation6_spill] sm:$0xff] }
0x2ad9   :  { %8074 = vrcp.f32 %v5687_v32 }
0x2ae2   :  { %v8073_v60 = vpop.eup %8072 }
0x2ae3   :  { %v9811_v43 = vmul.f32 %v8073_v60, %v5697_v18  ;;  %v10066_v60 = vld [vmem:[#allocation7_spill] sm:$0xff] }
0x2ae5   :  { %v5704_v49 = vmax.f32 %v9811_v43, 0.0 }
0x2ae6   :  { %v8075_v8 = vpop.eup %8074 }
0x2ae7   :  { %v9813_v15 = vmul.f32 %v8075_v8, %v5699_v56 }
0x2ae9   :  { %v5705_v20 = vmax.f32 %v9813_v15, 0.0 }
0x2aeb   :  { %v7804_v2 = vpack.i.bf16 %v5705_v20, %v5704_v49 }
0x2aed   :  { %7805 = vrot.lane.b32.xlu1 %v7804_v2, %s8151_s23 }
0x2b41   :  { %v7811_v36 = vpop.permute.xlu0 %7810 }
0x2b42   :  { %v7813_v34 = vunpack.i.h.bf16 %v7811_v36  ;;  %v7812_v62 = vunpack.i.l.bf16 %v7811_v36 }
0x2b5f   :  { %v7806_v7 = vpop.permute.xlu1 %7805 }
0x2b60   :  { %v7808_v45 = vunpack.i.h.bf16 %v7806_v7  ;;  %v7807_v1 = vunpack.i.l.bf16 %v7806_v7 }
0x2b62   :  { %v5722_v6 = vsel %vm1933_vm4, %v7807_v1, %v7812_v62  ;;  %v5723_v25 = vsel %vm1933_vm4, %v7808_v45, %v7813_v34 }
0x2b63   :  { %v9824_v9 = vpack.c.bf16 %v5723_v25, %v5722_v6 }
0x2b65   :  { %7663 = vmatpush3.bf16.msra.mxu0 %v9824_v9  ;;  %v5809_v59 = vunpack.c.h.bf16 %v9824_v9 }
0x2b66   :  { %7674 = vmatprep.subr.bf16.mxu0 %v10038_v16 }
0x2b68   :  { %7665 = vmatmul.mubr.msk.bf16.vlgmr.msra.gmra.mxu0 %vm65_vm1, %v10056_v31  ;;  %v5808_v31 = vunpack.c.l.bf16 %v9824_v9 }
0x2b69   :  { %7676 = vmatprep.mubr.msk.bf16.mxu0 %vm8149_vm0, %v10038_v16 }
0x2c28   :  { %v5759_v0 = vpop.f32.mrf.mxu0 }
0x2c2a   :  { %v7666_v4 = vpop.f32.mrf.mxu0 }
0x2c2c   :  { %v5762_v19 = vpop.f32.mrf.mxu0 }
0x2c2d   :  { %v5766_v42 = vpack.c.bf16 %v5762_v19, %v5759_v0 }
0x2c2e   :  { %v7667_v10 = vpop.f32.mrf.mxu0 }
0x2c2f   :  { %7669 = vmatpush3.bf16.msra.mxu1 %v5766_v42 }
0x2c30   :  { %7680 = vmatprep.subr.bf16.mxu1 %v10038_v16 }
0x2c32   :  { %7671 = vmatmul.mubr.msk.bf16.vlgmr.msra.gmra.mxu1 %vm65_vm1, %v10057_v22 }
0x2c33   :  { %7682 = vmatprep.mubr.msk.bf16.mxu1 %vm8149_vm0, %v10038_v16 }
0x2cf2   :  { %v5801_v51 = vpop.f32.mrf.mxu1 }
0x2cf3   :  { %v9839_v58 = vsub.f32 %v5801_v51, %v5808_v31 }
0x2cf4   :  { %v7672_v24 = vpop.f32.mrf.mxu1 }
0x2cf6   :  { %v5804_v28 = vpop.f32.mrf.mxu1 }
0x2cf7   :  { %v9841_v48 = vsub.f32 %v5804_v28, %v5809_v59 }
0x2cf8   :  { %v7673_v53 = vpop.f32.mrf.mxu1 }
0x2cf9   :  { %v5812_v55 = vpack.c.bf16 %v9841_v48, %v9839_v58 }
0x2cfb   :  { %7675 = vmatpush3.bf16.msra.mxu0 %v5812_v55 }
0x2cfc   :  { %7686 = vmatprep.subr.bf16.mxu0 %v10038_v16 }
0x2cfe   :  { %7677 = vmatmul.mubr.msk.bf16.vlgmr.msra.gmra.mxu0 %vm65_vm1, %v10057_v22 }
0x2cff   :  { %7687 = vmatpush3.bf16.msra.mxu0 %v9470_v46  ;;  %7694 = vmatprep.mubr.msk.bf16.mxu0 %vm8149_vm0, %v10038_v16 }
0x2d00   :  { %7688 = vmatprep.subr.bf16.mxu0 %v10038_v16 }
0x2d03   :  { %7689 = vmatpush3.bf16.msra.mxu0 %v9479_v50 }
0x2d04   :  { %7690 = vmatprep.subr.bf16.mxu0 %v10038_v16 }
0x2d07   :  { %7691 = vmatpush3.bf16.msra.mxu0 %v9486_v3 }
0x2d08   :  { %7692 = vmatprep.subr.bf16.mxu0 %v10038_v16 }
0x2d0b   :  { %7693 = vmatpush3.bf16.msra.mxu0 %v9493_v13 }
0x2d0c   :  { %7710 = vmatprep.subr.bf16.mxu0 %v10038_v16 }
0x2d0e   :  { %7695 = vmatmul.mubr.msk.bf16.vlgmr.msra.gmra.mxu0 %vm2578_vm5, %v5766_v42 }
0x2d0f   :  { %7711 = vmatpush3.bf16.msra.mxu0 %v9501_v37  ;;  %7718 = vmatprep.mubr.msk.bf16.mxu0 %vm8149_vm0, %v10038_v16 }
0x2d10   :  { %7712 = vmatprep.subr.bf16.mxu0 %v10038_v16 }
0x2d13   :  { %7713 = vmatpush3.bf16.msra.mxu0 %v9510_v52 }
0x2d14   :  { %7714 = vmatprep.subr.bf16.mxu0 %v10038_v16 }
0x2d17   :  { %7715 = vmatpush3.bf16.msra.mxu0 %v9517_v23 }
0x2d18   :  { %7716 = vmatprep.subr.bf16.mxu0 %v10038_v16 }
0x2d1b   :  { %7717 = vmatpush3.bf16.msra.mxu0 %v9524_v21 }
0x2d1c   :  { %7734 = vmatprep.subr.bf16.mxu0 %v10038_v16 }
0x2d1e   :  { %7719 = vmatmul.mubr.msk.bf16.vlgmr.msra.gmra.mxu0 %vm2578_vm5, %v5812_v55 }
0x2d1f   :  { %7735 = vmatpush3.bf16.msra.mxu0 %v9532_v26  ;;  %7742 = vmatprep.mubr.msk.bf16.mxu0 %vm8149_vm0, %v10038_v16  ;;  %v10060_v26 = vld [vmem:[#allocation10_spill] sm:$0xff] }
0x2d20   :  { %7736 = vmatprep.subr.bf16.mxu0 %v10038_v16 }
0x2d23   :  { %7737 = vmatpush3.bf16.msra.mxu0 %v9541_v41 }
0x2d24   :  { %7738 = vmatprep.subr.bf16.mxu0 %v10038_v16 }
0x2d27   :  { %7739 = vmatpush3.bf16.msra.mxu0 %v9548_v47 }
0x2d28   :  { %7740 = vmatprep.subr.bf16.mxu0 %v10038_v16 }
0x2d2b   :  { %7741 = vmatpush3.bf16.msra.mxu0 %v9555_v33  ;;  %v10061_v33 = vld [vmem:[#allocation11_spill] sm:$0xff] }
0x2dbe   :  { %v5847_v46 = vpop.f32.mrf.mxu0 }
0x2dbf   :  { %v5854_v13 = vsub.f32 %v5847_v46, %v5759_v0 }
0x2dc0   :  { %v7678_v50 = vpop.f32.mrf.mxu0 }
0x2dc2   :  { %v5850_v3 = vpop.f32.mrf.mxu0 }
0x2dc3   :  { %v5855_v37 = vsub.f32 %v5850_v3, %v5762_v19 }
0x2dc4   :  { %v7679_v52 = vpop.f32.mrf.mxu0 }
0x2dc5   :  { %v5856_v23 = vpack.c.bf16 %v5855_v37, %v5854_v13  ;;  %v6145_v13 = vmul.f32 %v9784_v40, %v9019_v61  ;;  %v6146_v52 = vmul.f32 %v9789_v35, %v9019_v61 }
0x2dc7   :  { %7681 = vmatpush3.bf16.msra.mxu1 %v5856_v23 }
0x2dc8   :  { %7698 = vmatprep.subr.bf16.mxu1 %v10038_v16 }
0x2dca   :  { %7683 = vmatmul.mubr.msk.bf16.vlgmr.msra.gmra.mxu1 %vm65_vm1, %v10057_v22  ;;  %v10062_v22 = vld [vmem:[#allocation12_spill] sm:$0xff] }
0x2dcb   :  { %7699 = vmatpush3.bf16.msra.mxu1 %v9567_v44  ;;  %7706 = vmatprep.mubr.msk.bf16.mxu1 %vm8149_vm0, %v10038_v16  ;;  %v10063_v44 = vld [vmem:[#allocation3_spill] sm:$0xff] }
0x2dcc   :  { %7700 = vmatprep.subr.bf16.mxu1 %v10038_v16 }
0x2dce   :  { %v5937_v21 = vpop.f32.mrf.mxu0 }
0x2dcf   :  { %7701 = vmatpush3.bf16.msra.mxu1 %v10060_v26 }
0x2dd0   :  { %v7696_v41 = vpop.f32.mrf.mxu0  ;;  %7702 = vmatprep.subr.bf16.mxu1 %v10038_v16 }
0x2dd2   :  { %v5940_v47 = vpop.f32.mrf.mxu0 }
0x2dd3   :  { %7703 = vmatpush3.bf16.msra.mxu1 %v10061_v33 }
0x2dd4   :  { %v7697_v29 = vpop.f32.mrf.mxu0  ;;  %7704 = vmatprep.subr.bf16.mxu1 %v10038_v16 }
0x2dd7   :  { %7705 = vmatpush3.bf16.msra.mxu1 %v10062_v22 }
0x2dd8   :  { %7722 = vmatprep.subr.bf16.mxu1 %v10038_v16 }
0x2dda   :  { %7707 = vmatmul.mubr.msk.bf16.vlgmr.msra.gmra.mxu1 %vm2578_vm5, %v9824_v9 }
0x2ddb   :  { %7723 = vmatpush3.bf16.msra.mxu1 %v10063_v44  ;;  %7730 = vmatprep.mubr.msk.bf16.mxu1 %vm8149_vm0, %v10038_v16 }
0x2ddc   :  { %7724 = vmatprep.subr.bf16.mxu1 %v10038_v16 }
0x2dde   :  { %v6025_v63 = vpop.f32.mrf.mxu0 }
0x2ddf   :  { %7725 = vmatpush3.bf16.msra.mxu1 %v10064_v11 }
0x2de0   :  { %v7720_v30 = vpop.f32.mrf.mxu0  ;;  %7726 = vmatprep.subr.bf16.mxu1 %v10038_v16 }
0x2de2   :  { %v6028_v39 = vpop.f32.mrf.mxu0 }
0x2de3   :  { %7727 = vmatpush3.bf16.msra.mxu1 %v10065_v5 }
0x2de4   :  { %v7721_v32 = vpop.f32.mrf.mxu0  ;;  %7728 = vmatprep.subr.bf16.mxu1 %v10038_v16 }
0x2de7   :  { %7729 = vmatpush3.bf16.msra.mxu1 %v10066_v60 }
0x2de8   :  { %7746 = vmatprep.subr.bf16.mxu1 %v10038_v16 }
0x2dea   :  { %7731 = vmatmul.mubr.msk.bf16.vlgmr.msra.gmra.mxu1 %vm2578_vm5, %v5856_v23 }
0x2deb   :  { %7750 = vmatprep.mubr.msk.bf16.mxu1 %vm8149_vm0, %v10038_v16 }
0x2e8a   :  { %v5891_v18 = vpop.f32.mrf.mxu1 }
0x2e8b   :  { %v5898_v2 = vsub.f32 %v5891_v18, %v9839_v58 }
0x2e8c   :  { %v7684_v8 = vpop.f32.mrf.mxu1 }
0x2e8e   :  { %v5894_v56 = vpop.f32.mrf.mxu1 }
0x2e8f   :  { %v5899_v36 = vsub.f32 %v5894_v56, %v9841_v48 }
0x2e90   :  { %v7685_v7 = vpop.f32.mrf.mxu1 }
0x2e91   :  { %v6080_v34 = vpack.c.bf16 %v5899_v36, %v5898_v2 }
0x2e93   :  { %7743 = vmatmul.mubr.msk.bf16.vlgmr.msra.gmra.mxu0 %vm2578_vm5, %v6080_v34 }
0x2e9a   :  { %v5981_v62 = vpop.f32.mrf.mxu1 }
0x2e9b   :  { %v5982_v25 = vadd.f32 %v5981_v62, %v5937_v21  ;;  %v6130_v21 = vmul.f32 %v9789_v35, %v8998_v14 }
0x2e9c   :  { %v7708_v45 = vpop.f32.mrf.mxu1 }
0x2e9d   :  { %v6032_v0 = vadd.f32 %v6025_v63, %v5982_v25 }
0x2e9e   :  { %v5984_v1 = vpop.f32.mrf.mxu1 }
0x2e9f   :  { %v5985_v9 = vadd.f32 %v5984_v1, %v5940_v47 }
0x2ea0   :  { %v7709_v6 = vpop.f32.mrf.mxu1 }
0x2ea1   :  { %v6033_v10 = vadd.f32 %v6028_v39, %v5985_v9 }
0x2eaa   :  { %v6071_v4 = vpop.f32.mrf.mxu1 }
0x2eab   :  { %v6078_v19 = vadd.f32 %v6071_v4, %v6032_v0 }
0x2eac   :  { %v7732_v42 = vpop.f32.mrf.mxu1 }
0x2eae   :  { %v6074_v51 = vpop.f32.mrf.mxu1 }
0x2eaf   :  { %v6079_v24 = vadd.f32 %v6074_v51, %v6033_v10  ;;  %v7849_v10 = vld [vmem:[%s10002_s5 + $0x8] sm:$0xff]   ;;  %v7850_v51 = vld [vmem:[%s10002_s5] sm:$0xff]  }
0x2eb0   :  { %v7733_v31 = vpop.f32.mrf.mxu1  ;;  %7747 = vmatpush3.bf16.msra.mxu1 %v7849_v10 }
0x2eb1   :  { %7748 = vmatprep.subr.bf16.mxu1 %v10038_v16 }
0x2eb4   :  { %7749 = vmatpush3.bf16.msra.mxu1 %v7850_v51 }
0x2f53   :  { %v6118_v59 = vpop.f32.mrf.mxu0 }
0x2f54   :  { %v6125_v28 = vadd.f32 %v6118_v59, %v6078_v19 }
0x2f55   :  { %v7744_v58 = vpop.f32.mrf.mxu0 }
0x2f56   :  { %v9911_v48 = vadd.f32 %v9653_v54, %v6125_v28 }
0x2f57   :  { %v6121_v53 = vpop.f32.mrf.mxu0 }
0x2f58   :  { %8076 = vtanh.f32 %v9911_v48  ;;  %v6126_v55 = vadd.f32 %v6121_v53, %v6079_v24 }
0x2f59   :  { %v7745_v46 = vpop.f32.mrf.mxu0 }
0x2f5a   :  { %v9915_v50 = vadd.f32 %v9653_v54, %v6126_v55  ;;  %v6129_v54 = vmul.f32 %v9784_v40, %v8998_v14 }
0x2f5c   :  { %8078 = vtanh.f32 %v9915_v50  ;;  %v6131_v23 = vadd.f32 %v6129_v54, %v9911_v48  ;;  %v6132_v41 = vadd.f32 %v6130_v21, %v9915_v50 }
0x2f5e   :  { %v6629_v26 = vmul.f32 -1.442695, %v6131_v23  ;;  %v6630_v47 = vmul.f32 -1.442695, %v6132_v41  ;;  %v6635_v41 = vld [vmem:[%s10000_s6 + $0x10] ss:$0 sm:$0xff] }
0x2f5f   :  { %s8155_s6 = smov 8  }
0x2f60   :  { %8080 = vpow2.f32 %v6629_v26 }
0x2f61   :  { %8082 = vpow2.f32 %v6630_v47 }
0x2f65   :  { %v8077_v3 = vpop.eup %8076 }
0x2f66   :  { %6175 = vrot.lane.b32.xlu1 %v8077_v3, %s8152_s26 }
0x2f69   :  { %v8079_v37 = vpop.eup %8078 }
0x2f6a   :  { %6149 = vrot.lane.b32.xlu1 %v6145_v13, %s8151_s23  ;;  %6177 = vrot.lane.b32.xlu0 %v8079_v37, %s8152_s26 }
0x2f6d   :  { %v8081_v33 = vpop.eup %8080 }
0x2f6e   :  { %6151 = vrot.lane.b32.xlu0 %v6146_v52, %s8151_s23  ;;  %v6139_v29 = vadd.f32 1.0, %v8081_v33  ;;  %v8083_v22 = vpop.eup %8082 }
0x2f6f   :  { %v6140_v61 = vadd.f32 1.0, %v8083_v22 }
0x2f70   :  { %8084 = vrcp.f32 %v6139_v29 }
0x2f71   :  { %8086 = vrcp.f32 %v6140_v61 }
0x2f7d   :  { %v8085_v44 = vpop.eup %8084 }
0x2f7e   :  { %v8087_v11 = vpop.eup %8086 }
0x2fd8   :  { %v6176_v63 = vpop.permute.xlu1 %6175 }
0x2fd9   :  { %v6181_v40 = vmul.f32 %v8085_v44, %v6176_v63 }
0x2fdb   :  { %6185 = vrot.lane.b32.xlu1 %v6181_v40, %s8151_s23 }
0x2fdc   :  { %v6178_v30 = vpop.permute.xlu0 %6177  ;;  %v6150_v35 = vpop.permute.xlu1 %6149 }
0x2fdd   :  { %v6182_v14 = vmul.f32 %v8087_v11, %v6178_v30  ;;  %v6155_v39 = vadd.f32 %v6150_v35, %v9911_v48 }
0x2fdf   :  { %6187 = vrot.lane.b32.xlu0 %v6182_v14, %s8151_s23  ;;  %v6631_v32 = vmul.f32 -1.442695, %v6155_v39 }
0x2fe0   :  { %v6152_v5 = vpop.permute.xlu0 %6151 }
0x2fe1   :  { %v6156_v60 = vadd.f32 %v6152_v5, %v9915_v50  ;;  %8088 = vpow2.f32 %v6631_v32 }
0x2fe3   :  { %v6632_v18 = vmul.f32 -1.442695, %v6156_v60 }
0x2fe5   :  { %8090 = vpow2.f32 %v6632_v18 }
0x2fee   :  { %v8089_v8 = vpop.eup %8088 }
0x2fef   :  { %v6163_v56 = vadd.f32 1.0, %v8089_v8 }
0x2ff1   :  { %8092 = vrcp.f32 %v6163_v56 }
0x2ff2   :  { %v8091_v2 = vpop.eup %8090 }
0x2ff3   :  { %v6164_v36 = vadd.f32 1.0, %v8091_v2 }
0x2ff5   :  { %8094 = vrcp.f32 %v6164_v36 }
0x2ffe   :  { %v8093_v7 = vpop.eup %8092 }
0x2fff   :  { %v6169_v34 = vmul.f32 %v8093_v7, %v9763_v12 }
0x3002   :  { %v8095_v45 = vpop.eup %8094 }
0x3003   :  { %v6170_v6 = vmul.f32 %v8095_v45, %v9768_v57 }
0x304d   :  { %v6186_v62 = vpop.permute.xlu1 %6185 }
0x304e   :  { %v9937_v1 = vadd.f32 %v6186_v62, %v6169_v34 }
0x3050   :  { %6195 = vrot.lane.b32.xlu1 %v9937_v1, %s8153_s0  ;;  %8096 = vtanh.f32 %v9937_v1 }
0x3051   :  { %v6188_v25 = vpop.permute.xlu0 %6187 }
0x3052   :  { %v9942_v9 = vadd.f32 %v6188_v25, %v6170_v6 }
0x3054   :  { %6197 = vrot.lane.b32.xlu0 %v9942_v9, %s8153_s0  ;;  %8098 = vtanh.f32 %v9942_v9 }
0x305d   :  { %v8097_v19 = vpop.eup %8096 }
0x3061   :  { %v8099_v57 = vpop.eup %8098 }
0x30c2   :  { %v6196_v12 = vpop.permute.xlu1 %6195 }
0x30c3   :  { %v6201_v0 = vmul.f32 %v6196_v12, %v9062_v38 }
0x30c5   :  { %6205 = vrot.lane.b32.xlu1 %v6201_v0, %s8153_s0 }
0x30c6   :  { %v6198_v4 = vpop.permute.xlu0 %6197 }
0x30c7   :  { %v6202_v42 = vmul.f32 %v6198_v4, %v9062_v38 }
0x30c9   :  { %6229 = vrot.lane.b32.xlu1 %v8097_v19, %s8152_s26  ;;  %6207 = vrot.lane.b32.xlu0 %v6202_v42, %s8153_s0  ;;  %s8156_s0 = smov 104  }
0x30cd   :  { %6231 = vrot.lane.b32.xlu0 %v8099_v57, %s8152_s26 }
0x3137   :  { %v6206_v38 = vpop.permute.xlu1 %6205 }
0x3138   :  { %v6211_v24 = vadd.f32 %v6206_v38, %v9911_v48 }
0x313a   :  { %v6633_v31 = vmul.f32 -1.442695, %v6211_v24 }
0x313b   :  { %v6208_v59 = vpop.permute.xlu0 %6207  ;;  %v6230_v37 = vpop.permute.xlu1 %6229 }
0x313c   :  { %8100 = vpow2.f32 %v6633_v31  ;;  %v6212_v28 = vadd.f32 %v6208_v59, %v9915_v50 }
0x313e   :  { %v6634_v58 = vmul.f32 -1.442695, %v6212_v28 }
0x313f   :  { %v6232_v54 = vpop.permute.xlu0 %6231 }
0x3140   :  { %8102 = vpow2.f32 %v6634_v58 }
0x3149   :  { %v8101_v53 = vpop.eup %8100 }
0x314a   :  { %v6219_v55 = vadd.f32 1.0, %v8101_v53 }
0x314c   :  { %8104 = vrcp.f32 %v6219_v55 }
0x314d   :  { %v8103_v46 = vpop.eup %8102 }
0x314e   :  { %v6220_v3 = vadd.f32 1.0, %v8103_v46 }
0x3150   :  { %8106 = vrcp.f32 %v6220_v3 }
0x3159   :  { %v8105_v13 = vpop.eup %8104 }
0x315a   :  { %v6235_v16 = vmul.f32 %v8105_v13, %v6230_v37 }
0x315c   :  { %v6237_v48 = vmax.f32 %v6235_v16, 0.0 }
0x315d   :  { %v8107_v52 = vpop.eup %8106 }
0x315e   :  { %v6236_v23 = vmul.f32 %v8107_v52, %v6232_v54 }
0x3160   :  { %v6238_v21 = vmax.f32 %v6236_v23, 0.0 }
0x3162   :  { %v6239_v26 = vpack.c.bf16 %v6238_v21, %v6237_v48 }
0x3164   :  { %6249 = vrot.lane.b32.xlu1 %v6239_v26, %s8151_s23  ;;  %s8154_s23 = smov 40  }
0x31d6   :  { %v6250_v50 = vpop.permute.xlu1 %6249 }
0x31d7   :  { %7751 = vmatmul.mubr.msk.bf16.vlgmr.msra.gmra.mxu1 %vm1933_vm4, %v6250_v50 }
0x3297   :  { %v6300_v47 = vpop.f32.mrf.mxu1 }
0x3298   :  { %v6301_v33 = vadd.f32 %v6635_v41, %v6300_v47 }
0x3299   :  { %v7752_v29 = vpop.f32.mrf.mxu1 }
0x329a   :  { %v6307_v22 = vsel %vm255_vm3, %v6301_v33, -inf }
0x329b   :  { %6308 = vmax.xlane.f32.xlu0 %v6307_v22  ;;  %v6303_v61 = vpop.f32.mrf.mxu1 }
0x329c   :  { %v6304_v44 = vadd.f32 %v6635_v41, %v6303_v61 }
0x329d   :  { %v7753_v63 = vpop.f32.mrf.mxu1 }
0x329e   :  { %v6310_v40 = vsel %vm255_vm3, %v6304_v44, -inf }
0x329f   :  { %6311 = vmax.xlane.f32.xlu1 %v6310_v40 }
0x32b0   :  { %6331 = vrot.lane.b32.xlu1 %v5704_v49, %s8154_s23 }
0x32b1   :  { %6333 = vrot.lane.b32.xlu0 %v5705_v20, %s8154_s23 }
0x32b4   :  { %6337 = vrot.lane.b32.xlu1 %v9775_v17, %s8155_s6 }
0x32b8   :  { %6339 = vrot.lane.b32.xlu1 %v9780_v27, %s8155_s6 }
0x32bc   :  { %6347 = vrot.lane.b32.xlu1 %v6238_v21, %s8156_s0 }
0x32c0   :  { %6353 = vrot.lane.b32.xlu1 %v9942_v9, %s8157_s2 }
0x3324   :  { %v6309_v11 = vpop.xlane.xlu0 %6308 }
0x3325   :  { %v6313_v30 = vsub.f32 %v6301_v33, %v6309_v11 }
0x3327   :  { %v6315_v14 = vmul.f32 1.442695, %v6313_v30 }
0x3328   :  { %v6312_v35 = vpop.xlane.xlu1 %6311  ;;  %v6334_v56 = vpop.permute.xlu0 %6333 }
0x3329   :  { %8108 = vpow2.f32 %v6315_v14  ;;  %v6314_v43 = vsub.f32 %v6304_v44, %v6312_v35 }
0x332b   :  { %v6317_v49 = vmul.f32 1.442695, %v6314_v43 }
0x332c   :  { %v6332_v39 = vpop.permute.xlu1 %6331 }
0x332d   :  { %8110 = vpow2.f32 %v6317_v49 }
0x3330   :  { %v6338_v15 = vpop.permute.xlu1 %6337 }
0x3334   :  { %v6340_v20 = vpop.permute.xlu1 %6339 }
0x3336   :  { %v8109_v5 = vpop.eup %8108 }
0x3337   :  { %v6319_v17 = vsel %vm255_vm3, %v8109_v5, 0.0 }
0x3338   :  { %6320 = vadd.xlane.f32.xlu0 %v6319_v17  ;;  %v6348_v27 = vpop.permute.xlu1 %6347 }
0x333a   :  { %v8111_v32 = vpop.eup %8110 }
0x333b   :  { %v6322_v60 = vsel %vm255_vm3, %v8111_v32, 0.0 }
0x333c   :  { %6323 = vadd.xlane.f32.xlu0 %v6322_v60  ;;  %v6354_v18 = vpop.permute.xlu1 %6353 }
0x333d   :  { %v6369_v8 = vsel %vm255_vm3, %v6354_v18, 0.0 }
0x333e   :  { %6373 = vst [vmem:[%s10003_s7 + $0x18] sm:$0xff] %v6369_v8 }
0x3352   :  { %6345 = vrot.lane.b32.xlu0 %v6237_v48, %s8156_s0 }
0x3356   :  { %6351 = vrot.lane.b32.xlu0 %v9937_v1, %s8157_s2 }
0x33c1   :  { %v6321_v2 = vpop.xlane.xlu0 %6320 }
0x33c2   :  { %8112 = vlog2.f32 %v6321_v2 }
0x33c5   :  { %v6324_v36 = vpop.xlane.xlu0 %6323 }
0x33c6   :  { %8114 = vlog2.f32 %v6324_v36 }
0x33c9   :  { %v6346_v7 = vpop.permute.xlu0 %6345 }
0x33cd   :  { %v6352_v34 = vpop.permute.xlu0 %6351 }
0x33ce   :  { %v6368_v62 = vsel %vm255_vm3, %v6352_v34, 0.0 }
0x33cf   :  { %v8113_v45 = vpop.eup %8112  ;;  %6371 = vst [vmem:[%s10003_s7 + $0x8] sm:$0xff] %v6368_v62 }
0x33d0   :  { %v6326_v6 = vmul.f32 0.6931472, %v8113_v45 }
0x33d2   :  { %v6329_v25 = vsub.f32 %v6313_v30, %v6326_v6 }
0x33d3   :  { %v8115_v9 = vpop.eup %8114 }
0x33d4   :  { %v6328_v1 = vmul.f32 0.6931472, %v8115_v9  ;;  %v6357_v12 = vsel %vm255_vm3, %v6329_v25, %v6332_v39 }
0x33d5   :  { %v6360_v0 = vsel %vm6359_vm6, %v6357_v12, %v6338_v15 }
0x33d6   :  { %v6330_v4 = vsub.f32 %v6314_v43, %v6328_v1  ;;  %v6363_v19 = vsel %vm6362_vm7, %v6360_v0, %v6346_v7 }
0x33d7   :  { %v6366_v42 = vsel %vm6365_vm8, %v6363_v19, %v6352_v34 }
0x33d8   :  { %v6358_v57 = vsel %vm255_vm3, %v6330_v4, %v6334_v56  ;;  %6370 = vst [vmem:[%s10003_s7] sm:$0xff] %v6366_v42 }
0x33d9   :  { %v6361_v10 = vsel %vm6359_vm6, %v6358_v57, %v6340_v20 }
0x33da   :  { %v6364_v51 = vsel %vm6362_vm7, %v6361_v10, %v6348_v27 }
0x33db   :  { %v6367_v38 = vsel %vm6365_vm8, %v6364_v51, %v6354_v18 }
0x33dc   :  { %6372 = vst [vmem:[%s10003_s7 + $0x10] sm:$0xff] %v6367_v38 }

</bundles_post_ra>
